<compile_context>
chip_gen: v6e
topology: v6e:2x2x1
jax: 0.10.0
libtpu: 0.0.40
codegen_flags: <defaults>
</compile_context>

<pallas_src>
import functools

import numpy as np
import jax
import jax.numpy as jnp
from jax.experimental import pallas as pl
from jax.experimental.pallas import tpu as pltpu


# -----------------------------------------------------------------------------
# Module configuration (small, consistent with the PyTorch __init__ contract)
# -----------------------------------------------------------------------------
W_DIM = 32
CHANNELS = 64
SIZE = 16                       # -> out_size for layer 0
SAMPLING_RATE = 16.0
BANDWIDTH = 2.0
DISTRIBUTION_THRESHOLD = 2.0
LAST_REDIST_LAYER = 1
N_BINS = 4
BIN_TRANSFORM_OFFSET = 1.0
BIN_BLEND_WIDTH = 1.0
BIN_BLEND_OFFSET = 0.0
ALL_SIZES = [16, 32]
PROGRESSIVE_FREQS = False

_TWO_PI = 2.0 * np.pi
_PACK_K = 8                     # packed param / grid-row count (sublane-aligned)


# -----------------------------------------------------------------------------
# Deterministic parameter / buffer initialization (mirrors __init__)
# -----------------------------------------------------------------------------
def init_params(key):
    k_freq, k_phase, k_weight, _k_affine = jax.random.split(key, 4)

    num_points = CHANNELS
    freqs = jax.random.normal(k_freq, (CHANNELS, 2), dtype=jnp.float32)
    radii = jnp.sqrt(jnp.sum(jnp.square(freqs), axis=1, keepdims=True))
    new_radii = jnp.linspace(1.0 / num_points, 1.0, num_points, dtype=jnp.float32)
    freqs = freqs / radii
    freqs = freqs * new_radii[:, None]
    freqs = freqs * BANDWIDTH

    phases = jax.random.uniform(k_phase, (CHANNELS,), dtype=jnp.float32) - 0.5

    radii = jnp.sqrt(jnp.sum(jnp.square(freqs), axis=1, keepdims=True))
    order = jnp.argsort(radii[:, 0])
    freqs = freqs[order]
    phases = phases[order]
    sorted_radii = np.asarray(radii[:, 0][order])

    # split_indices[0]: radii below sizes[0] / distribution_threshold
    split0 = np.nonzero(sorted_radii < ALL_SIZES[0] / DISTRIBUTION_THRESHOLD)[0]
    c0 = int(split0.shape[0])

    weight = jax.random.normal(k_weight, (c0, c0), dtype=jnp.float32)

    # NOTE: the module also creates self.affine (FullyConnectedLayer) and a
    # transform buffer, but the forward pass never uses the affine layer, so
    # no parameters are needed for it here.
    return {
        "freqs": freqs,            # [CHANNELS, 2]
        "phases": phases,          # [CHANNELS]
        "split0": jnp.asarray(split0, dtype=jnp.int32),
        "weight": weight,          # [C0, C0]
    }


# -----------------------------------------------------------------------------
# Pallas kernel: fused Fourier-feature synthesis + block-diagonal channel mix
# (single grid step, whole batch resident; total footprint << VMEM on all gens)
# -----------------------------------------------------------------------------
def _synthesis_kernel(pg_ref, grid_ref, wbd_ref, out_ref):
    # pg_ref:   [B*C, K]     packed [2*pi*f0, 2*pi*f1, 2*pi*phase, 0...] (f32)
    # grid_ref: [K, HW]      rows: gx, gy, ones, zeros... (f32)
    # wbd_ref:  [B*C, B*C]   block-diagonal (weight/sqrt(C) * bin_amp) in bf16
    # out_ref:  [B*C, HW]    HW = 256 on the lane axis -> unmasked stores
    arg = jnp.dot(pg_ref[...], grid_ref[...],
                  preferred_element_type=jnp.float32)          # [B*C, HW] f32 (MXU)
    feat = jnp.sin(arg)                                         # [B*C, HW] (EUP/VPU)
    # bf16 operands, f32 accumulation: native MXU rate on v6e/v7x.
    out_ref[...] = jnp.dot(wbd_ref[...], feat.astype(jnp.bfloat16),
                           preferred_element_type=jnp.float32)  # [B*C, HW]


def synthesis_input_pallas(pg2d, grid_rows, wbd):
    BC, K = pg2d.shape
    _, HW = grid_rows.shape
    return pl.pallas_call(
        _synthesis_kernel,
        out_shape=jax.ShapeDtypeStruct((BC, HW), jnp.float32),
        grid_spec=pltpu.PrefetchScalarGridSpec(
            num_scalar_prefetch=0,
            # One grid step for everything: the whole problem is ~200 KB resident
            # and is launch/step-overhead bound, so more steps only add overhead.
            # TODO(synk): for large B or out_size, switch to grid=(B,) with
            # dimension_semantics=("parallel",) to engage both v7x TensorCores.
            grid=(1,),
            in_specs=[
                pl.BlockSpec((BC, K), lambda t: (0, 0)),      # packed params (f32)
                pl.BlockSpec((K, HW), lambda t: (0, 0)),      # grid rows (f32)
                pl.BlockSpec((BC, BC), lambda t: (0, 0)),     # block-diag weight (bf16)
            ],
            out_specs=pl.BlockSpec((BC, HW), lambda t: (0, 0)),
        ),
        compiler_params=pltpu.CompilerParams(
            dimension_semantics=("arbitrary",)),
    )(pg2d, grid_rows, wbd)


# -----------------------------------------------------------------------------
# Cached grid-row constant (affine_grid with theta = diag(0.5, 0.5),
# align_corners=True): gx varies over j (fast axis), gy over i, plus a ones row.
# -----------------------------------------------------------------------------
@functools.lru_cache(maxsize=None)
def _grid_rows_np(out_size: int):
    lin = 0.5 * np.linspace(-1.0, 1.0, out_size, dtype=np.float32)
    hw = out_size * out_size
    rows = np.zeros((_PACK_K, hw), dtype=np.float32)
    rows[0] = np.tile(lin, out_size)        # gx: varies over j
    rows[1] = np.repeat(lin, out_size)      # gy: varies over i
    rows[2] = 1.0                           # phase row
    return rows


# -----------------------------------------------------------------------------
# Forward (layer=0 path), faithful to the PyTorch semantics
# -----------------------------------------------------------------------------
def multiscale_synthesis_input_forward(w, params, transform=None, factor=1.0):
    B = w.shape[0]
    split0 = np.asarray(params["split0"])
    C = int(split0.shape[0])
    assert C % 8 == 0, f"C={C} should be a multiple of 8 for full sublane use"
    out_size = SIZE                                   # layer == 0 -> size[1]

    freqs = params["freqs"][split0, :]                # [C, 2]
    phases = params["phases"][split0]                 # [C]

    # bin-wise frequency scaling
    bin_idx = jnp.arange(C, dtype=jnp.float32) % N_BINS
    if N_BINS > 1:
        freqs = freqs * 2.0 ** (bin_idx[:, None] * BIN_TRANSFORM_OFFSET)

    if transform is None:
        transform = jnp.eye(3, dtype=jnp.float32)[None]    # [1, 3, 3]

    m_t = jnp.broadcast_to(jnp.eye(3, dtype=jnp.float32), (B, 3, 3))
    transforms = m_t @ transform                            # [B, 3, 3]
    t_fac = np.sqrt(factor)

    # phases: [1,C] + (freqs @ (t_fac * t[:, :2, 2:])).squeeze(2)  -> [B, C]
    phases_b = phases[None, :] + jnp.einsum(
        "cd,bde->bce", freqs, t_fac * transforms[:, :2, 2:])[..., 0]
    # freqs @ t[:, :2, :2] -> [B, C, 2]
    freqs_b = jnp.einsum("cd,bde->bce", freqs, transforms[:, :2, :2])

    # amplitudes (returned, matching compute_amplitudes; NOT applied to x for
    # layer 0, exactly as in the PyTorch forward)
    norms = jnp.sqrt(jnp.sum(jnp.square(freqs_b), axis=2))
    amplitudes = jnp.clip(
        1.0 - (norms - BANDWIDTH) / (SAMPLING_RATE / 2.0 - BANDWIDTH), 0.0, 1.0)

    # bin blending amplitudes (derived from the *raw* user transform, as in PyTorch)
    if N_BINS > 1:
        scaling = transform[:, 0, 0]                         # [Tb]
        scaling_log = jnp.log2(1.0 / scaling)                # [Tb]
        amp_pre = (1.0 / BIN_BLEND_WIDTH) * (
            scaling_log[:, None]
            - bin_idx[None, :] * BIN_TRANSFORM_OFFSET
            - BIN_BLEND_OFFSET)
        amp_pre = jnp.where(bin_idx[None, :] == 0, 1.0, amp_pre)
        bins_amp = jnp.broadcast_to(jnp.clip(amp_pre, 0.0, 1.0), (B, C))
    else:
        bins_amp = jnp.ones((B, C), dtype=jnp.float32)

    grid_rows = jnp.asarray(_grid_rows_np(out_size))         # [K, HW] cached const

    # packed per-channel params with 2*pi folded in, batch-fused: [B*C, K]
    pg = jnp.zeros((B, C, _PACK_K), dtype=jnp.float32)
    pg = pg.at[..., 0].set(_TWO_PI * freqs_b[..., 0])
    pg = pg.at[..., 1].set(_TWO_PI * freqs_b[..., 1])
    pg = pg.at[..., 2].set(_TWO_PI * phases_b)
    pg2d = pg.reshape(B * C, _PACK_K)

    # block-diagonal per-batch weight: (weight / sqrt(C)) with bin amplitudes
    # folded into the contraction columns; out = Wbd @ sin(arg).
    # (Contraction depth B*C = 128 fills the v5e MXU; fine up to B=4 on v6e/v7x.)
    W = (params["weight"] / np.sqrt(C)).astype(jnp.float32)          # [Cout, Cin]
    wb = W[None, :, :] * bins_amp[:, None, :]                        # [B, Cout, Cin]
    eye_b = jnp.eye(B, dtype=jnp.float32)
    wbd = jnp.einsum("bij,bd->bidj", wb, eye_b).reshape(B * C, B * C)
    wbd = wbd.astype(jnp.bfloat16)                                   # bf16 MXU operand

    out = synthesis_input_pallas(pg2d, grid_rows, wbd)               # [B*C, HW]
    # [B*C, HW] -> NCHW directly (no transpose needed in this layout)
    x = out.reshape(B, C, out_size, out_size)
    return x, amplitudes


if __name__ == "__main__":
    key = jax.random.PRNGKey(0)
    k_param, k_w = jax.random.split(key)

    params = init_params(k_param)

    B = 2
    w = jax.random.normal(k_w, (B, W_DIM), dtype=jnp.float32)  # only batch size / dtype matter

    # Non-trivial transform (scaling 1/8 + translation) to exercise the full path.
    s, tx, ty = 0.125, 0.3, -0.2
    transform = jnp.asarray(
        [[[s, 0.0, tx],
          [0.0, s, ty],
          [0.0, 0.0, 1.0]]], dtype=jnp.float32)

    x, amplitudes = multiscale_synthesis_input_forward(w, params, transform=transform, factor=1.0)
    x = jax.block_until_ready(x)
    amplitudes = jax.block_until_ready(amplitudes)

    # ------------------------------------------------------------------
    # Sanity check against a pure-JAX f32 reference in the original
    # (PyTorch) orientation: [B, H, W, C] then permute to NCHW.
    # Tolerance is loosened vs. the pure-f32 kernel because the channel-mix
    # matmul now runs with bf16 operands (f32 accumulate).
    # ------------------------------------------------------------------
    split0 = np.asarray(params["split0"])
    C = int(split0.shape[0])
    assert x.shape == (B, C, SIZE, SIZE), x.shape
    assert amplitudes.shape == (B, C), amplitudes.shape

    freqs = params["freqs"][split0, :]
    phases = params["phases"][split0]
    bin_idx = jnp.arange(C, dtype=jnp.float32) % N_BINS
    freqs = freqs * 2.0 ** (bin_idx[:, None] * BIN_TRANSFORM_OFFSET)
    transforms = jnp.broadcast_to(jnp.eye(3, dtype=jnp.float32), (B, 3, 3)) @ transform
    phases_b = phases[None, :] + jnp.einsum("cd,bde->bce", freqs, transforms[:, :2, 2:])[..., 0]
    freqs_b = jnp.einsum("cd,bde->bce", freqs, transforms[:, :2, :2])
    scaling_log = jnp.log2(1.0 / transform[:, 0, 0])
    amp_pre = (scaling_log[:, None] - bin_idx[None, :] * BIN_TRANSFORM_OFFSET
               - BIN_BLEND_OFFSET) / BIN_BLEND_WIDTH
    amp_pre = jnp.where(bin_idx[None, :] == 0, 1.0, amp_pre)
    bins_amp = jnp.broadcast_to(jnp.clip(amp_pre, 0.0, 1.0), (B, C))
    lin = 0.5 * jnp.linspace(-1.0, 1.0, SIZE, dtype=jnp.float32)
    gx = jnp.tile(lin, SIZE)
    gy = jnp.repeat(lin, SIZE)
    arg = (gx[None, :, None] * freqs_b[:, None, :, 0]
           + gy[None, :, None] * freqs_b[:, None, :, 1]
           + phases_b[:, None, :])                                    # [B, HW, C]
    feat = jnp.sin(arg * (2.0 * np.pi)) * bins_amp[:, None, :]
    W = params["weight"] / np.sqrt(C)
    ref = jnp.einsum("bpc,oc->bpo", feat, W)                          # [B, HW, Cout]
    ref_nchw = ref.reshape(B, SIZE, SIZE, C).transpose(0, 3, 1, 2)
    np.testing.assert_allclose(np.asarray(x), np.asarray(ref_nchw), rtol=2e-2, atol=2e-2)

    # TODO(synk): verify the t_fac=sqrt(factor) translation scaling against
    # PyTorch for factor != 1 (self-test only exercises factor == 1.0).

    print("KERNEL_OK")
</pallas_src>

<mosaic_0001>
module attributes {stable_mosaic.version = 11 : i64} {
  func.func @_synthesis_kernel(%arg0: i32, %arg1: memref<128x8xf32, #tpu.memory_space<vmem>>, %arg2: memref<8x256xf32, #tpu.memory_space<vmem>>, %arg3: memref<128x128xbf16, #tpu.memory_space<vmem>>, %arg4: memref<128x256xf32, #tpu.memory_space<vmem>>) attributes {dimension_semantics = [#tpu.dimension_semantics<arbitrary>], iteration_bounds = array<i64: 1>, scalar_prefetch = 0 : i64, scratch_operands = 0 : i64, tpu.core_type = #tpu.core_type<tc>, window_params = [{pipeline_mode = #tpu.pipeline_mode<synchronous>, transform_indices = @transform_0, window_bounds = array<i64: 128, 8>}, {pipeline_mode = #tpu.pipeline_mode<synchronous>, transform_indices = @transform_1, window_bounds = array<i64: 8, 256>}, {pipeline_mode = #tpu.pipeline_mode<synchronous>, transform_indices = @transform_2, window_bounds = array<i64: 128, 128>}, {pipeline_mode = #tpu.pipeline_mode<synchronous>, transform_indices = @transform_3, window_bounds = array<i64: 128, 256>}]} {
    %c0 = arith.constant 0 : index
    %c0_0 = arith.constant 0 : index
    %0 = vector.load %arg1[%c0, %c0_0] : memref<128x8xf32, #tpu.memory_space<vmem>>, vector<128x8xf32>
    %c0_1 = arith.constant 0 : index
    %c0_2 = arith.constant 0 : index
    %1 = vector.load %arg2[%c0_1, %c0_2] : memref<8x256xf32, #tpu.memory_space<vmem>>, vector<8x256xf32>
    %cst = arith.constant dense<0.000000e+00> : vector<128x256xf32>
    %2 = tpu.matmul %0, %1, %cst {dimension_numbers = #tpu.dot_dimension_numbers<[1], [0], [0], [1], [0, 0, 1, 1], [], []>} : vector<128x8xf32>, vector<8x256xf32>, vector<128x256xf32> -> vector<128x256xf32>
    %3 = math.sin %2 : vector<128x256xf32>
    %c0_3 = arith.constant 0 : index
    %c0_4 = arith.constant 0 : index
    %4 = vector.load %arg3[%c0_3, %c0_4] : memref<128x128xbf16, #tpu.memory_space<vmem>>, vector<128x128xbf16>
    %5 = arith.truncf %3 : vector<128x256xf32> to vector<128x256xbf16>
    %cst_5 = arith.constant dense<0.000000e+00> : vector<128x256xf32>
    %6 = tpu.matmul %4, %5, %cst_5 {dimension_numbers = #tpu.dot_dimension_numbers<[1], [0], [0], [1], [0, 0, 1, 1], [], []>} : vector<128x128xbf16>, vector<128x256xbf16>, vector<128x256xf32> -> vector<128x256xf32>
    %c0_6 = arith.constant 0 : index
    %c0_7 = arith.constant 0 : index
    %7 = vector.load %arg4[%c0_6, %c0_7] : memref<128x256xf32, #tpu.memory_space<vmem>>, vector<128x256xf32>
    tpu.vector_store %arg4[%c0_6, %c0_7], %6 {strides = array<i32>} : memref<128x256xf32, #tpu.memory_space<vmem>>, vector<128x256xf32>,
    return
  }
  func.func @transform_0(%arg0: i32) -> (i32, i32) {
    %c0_i32 = arith.constant 0 : i32
    %c0_i32_0 = arith.constant 0 : i32
    %c0_i32_1 = arith.constant 0 : i32
    return %c0_i32, %c0_i32_0 : i32, i32
  }
  func.func @transform_1(%arg0: i32) -> (i32, i32) {
    %c0_i32 = arith.constant 0 : i32
    %c0_i32_0 = arith.constant 0 : i32
    %c0_i32_1 = arith.constant 0 : i32
    return %c0_i32, %c0_i32_0 : i32, i32
  }
  func.func @transform_2(%arg0: i32) -> (i32, i32) {
    %c0_i32 = arith.constant 0 : i32
    %c0_i32_0 = arith.constant 0 : i32
    %c0_i32_1 = arith.constant 0 : i32
    return %c0_i32, %c0_i32_0 : i32, i32
  }
  func.func @transform_3(%arg0: i32) -> (i32, i32) {
    %c0_i32 = arith.constant 0 : i32
    %c0_i32_0 = arith.constant 0 : i32
    %c0_i32_1 = arith.constant 0 : i32
    return %c0_i32, %c0_i32_0 : i32, i32
  }
}

</mosaic_0001>

<bundles_post_ra>
// kernel: tpu_custom_call.1
= control target key start
LH: loop header
LB: loop body
LE: loop exit
PB: predicated region body
PF: predicated region fallthrough
CT: control target
= control target key end

     0   :  { %vm34_vm0 = vcmask 64512   ;;  %v4278_v3 = vmov 0.0   ;;  %s7559_s0 = inlined_call_operand.vmem [shape: f32[128,8], index: 0, kind: input, shape index: {}]   ;;  %s7560_s1 = inlined_call_operand.vmem [shape: f32[8,256], index: 1, kind: input, shape index: {}]   ;;  %s7561_s2 = inlined_call_operand.vmem [shape: bf16[128,128], index: 2, kind: input, shape index: {}]   ;;  %s7562_s3 = inlined_call_operand.hbm [shape: f32[128,256], index: 3, kind: output, shape index: {}]  }
   0x1   :  { %v33_v0 = vld [vmem:[%s7560_s1 + $0x8] sm:$0xff]  ;;  %v32_v1 = vld [vmem:[%s7560_s1] sm:$0xff]  ;;  %147 = vmatprep.mubr.f32.mxu0 %v4278_v3  ;;  %v18_v5 = vld [vmem:[%s7559_s0 + $0x10] sm:$0xff] }
   0x2   :  { %v16_v2 = vld [vmem:[%s7559_s0] sm:$0xff]  ;;  %113 = vmatprep.subr.mxu0 %v33_v0  ;;  %v17_v4 = vld [vmem:[%s7559_s0 + $0x8] sm:$0xff] }
   0x3   :  { %114 = vmatpush1.msra.mxu0 %v32_v1 }
   0x4   :  { %3813 = vmatmul.mubr.msk.f32.vlgmr.msra.gmra.mxu0 %vm34_vm0, %v16_v2 }
   0x5   :  { %153 = vmatprep.mubr.f32.mxu0 %v4278_v3 }
   0x8   :  { %3814 = vmatmul.mubr.msk.f32.gmra.mxu0 %vm34_vm0, %v17_v4 }
   0x9   :  { %159 = vmatprep.mubr.f32.mxu0 %v4278_v3 }
   0xc   :  { %3815 = vmatmul.mubr.msk.f32.gmra.mxu0 %vm34_vm0, %v18_v5 }
   0xd   :  { %8 = vsyncpa [#allocation3], 0  ;;  %165 = vmatprep.mubr.f32.mxu0 %v4278_v3  ;;  %v19_v6 = vld [vmem:[%s7559_s0 + $0x18] sm:$0xff]  ;;  %v20_v7 = vld [vmem:[%s7559_s0 + $0x20] sm:$0xff]  ;;  %v7576_v38 = vmov 683565275  }
   0xe   :  { %v21_v8 = vld [vmem:[%s7559_s0 + $0x28] sm:$0xff]  ;;  %v22_v9 = vld [vmem:[%s7559_s0 + $0x30] sm:$0xff]  ;;  %v23_v10 = vld [vmem:[%s7559_s0 + $0x38] sm:$0xff]  ;;  %v7574_v40 = vmov 2475754826  }
   0xf   :  { %v24_v11 = vld [vmem:[%s7559_s0 + $0x40] sm:$0xff]  ;;  %v25_v12 = vld [vmem:[%s7559_s0 + $0x48] sm:$0xff]  ;;  %v26_v13 = vld [vmem:[%s7559_s0 + $0x50] sm:$0xff]  ;;  %v7579_v43 = vmov 2131351028  }
  0x10   :  { %3816 = vmatmul.mubr.msk.f32.gmra.mxu0 %vm34_vm0, %v19_v6  ;;  %v27_v14 = vld [vmem:[%s7559_s0 + $0x58] sm:$0xff]  ;;  %v28_v15 = vld [vmem:[%s7559_s0 + $0x60] sm:$0xff]  ;;  %v29_v16 = vld [vmem:[%s7559_s0 + $0x68] sm:$0xff]  ;;  %v7571_v46 = vmov 2102212464  }
  0x11   :  { %171 = vmatprep.mubr.f32.mxu0 %v4278_v3  ;;  %v30_v17 = vld [vmem:[%s7559_s0 + $0x70] sm:$0xff]  ;;  %v31_v18 = vld [vmem:[%s7559_s0 + $0x78] sm:$0xff]  ;;  %v7569_v49 = vmov 920167782   ;;  %v7567_v52 = vmov 1326507024  }
  0x14   :  { %3817 = vmatmul.mubr.msk.f32.gmra.mxu0 %vm34_vm0, %v20_v7 }
  0x15   :  { %177 = vmatprep.mubr.f32.mxu0 %v4278_v3 }
  0x18   :  { %3818 = vmatmul.mubr.msk.f32.gmra.mxu0 %vm34_vm0, %v21_v8 }
  0x19   :  { %183 = vmatprep.mubr.f32.mxu0 %v4278_v3 }
  0x1c   :  { %3819 = vmatmul.mubr.msk.f32.gmra.mxu0 %vm34_vm0, %v22_v9 }
  0x1d   :  { %189 = vmatprep.mubr.f32.mxu0 %v4278_v3 }
  0x20   :  { %3820 = vmatmul.mubr.msk.f32.gmra.mxu0 %vm34_vm0, %v23_v10 }
  0x21   :  { %195 = vmatprep.mubr.f32.mxu0 %v4278_v3 }
  0x24   :  { %3821 = vmatmul.mubr.msk.f32.gmra.mxu0 %vm34_vm0, %v24_v11 }
  0x25   :  { %201 = vmatprep.mubr.f32.mxu0 %v4278_v3 }
  0x28   :  { %3822 = vmatmul.mubr.msk.f32.gmra.mxu0 %vm34_vm0, %v25_v12 }
  0x29   :  { %207 = vmatprep.mubr.f32.mxu0 %v4278_v3 }
  0x2c   :  { %3823 = vmatmul.mubr.msk.f32.gmra.mxu0 %vm34_vm0, %v26_v13 }
  0x2d   :  { %213 = vmatprep.mubr.f32.mxu0 %v4278_v3 }
  0x30   :  { %3824 = vmatmul.mubr.msk.f32.gmra.mxu0 %vm34_vm0, %v27_v14 }
  0x31   :  { %219 = vmatprep.mubr.f32.mxu0 %v4278_v3 }
  0x34   :  { %3825 = vmatmul.mubr.msk.f32.gmra.mxu0 %vm34_vm0, %v28_v15 }
  0x35   :  { %225 = vmatprep.mubr.f32.mxu0 %v4278_v3 }
  0x38   :  { %3826 = vmatmul.mubr.msk.f32.gmra.mxu0 %vm34_vm0, %v29_v16 }
  0x39   :  { %231 = vmatprep.mubr.f32.mxu0 %v4278_v3 }
  0x3c   :  { %3827 = vmatmul.mubr.msk.f32.gmra.mxu0 %vm34_vm0, %v30_v17 }
  0x3d   :  { %237 = vmatprep.mubr.f32.mxu0 %v4278_v3 }
  0x40   :  { %3828 = vmatmul.mubr.msk.f32.gmra.mxu0 %vm34_vm0, %v31_v18 }
  0xc4   :  { %v4379_v19 = vpop.f32.mrf.mxu0 }
  0xc5   :  { %7710 = vst [vmem:[#allocation5_spill] sm:$0xff] %v4379_v19  ;;  %v247_v20 = vand.u32 2139095040, %v4379_v19  ;;  %v244_v24 = vand.u32 2147483647, %v4379_v19 }
  0xc6   :  { %v4382_v21 = vpop.f32.mrf.mxu0 }
  0xc7   :  { %7711 = vst [vmem:[#allocation6_spill] sm:$0xff] %v4382_v21  ;;  %v248_v22 = vshrl.u32 %v247_v20, 23  ;;  %v351_v23 = vand.u32 2139095040, %v4382_v21  ;;  %v251_v29 = vand.u32 8388607, %v244_v24 }
  0xc8   :  { %v4388_v32 = vpop.f32.mrf.mxu0  ;;  %v348_v62 = vand.u32 2147483647, %v4382_v21 }
  0xc9   :  { %v3829_v25 = vadd.s32 4294967169, %v248_v22  ;;  %v352_v26 = vshrl.u32 %v351_v23, 23  ;;  %7712 = vst [vmem:[#allocation7_spill] sm:$0xff] %v4388_v32  ;;  %v252_v34 = vor.u32 8388608, %v251_v29  ;;  %v455_v36 = vand.u32 2139095040, %v4388_v32 }
  0xca   :  { %v355_v12 = vand.u32 8388607, %v348_v62 }
  0xcb   :  { %v254_v27 = vadd.s32 1, %v3829_v25  ;;  %v3833_v28 = vadd.s32 4294967169, %v352_v26  ;;  %v456_v63 = vshrl.u32 %v455_v36, 23  ;;  %v292_v7 = vshll.u32 %v252_v34, 8 }
  0xcd   :  { %vm255_vm1 = vcmp.gt.s32.totalorder %v254_v27, 0  ;;  %v358_v31 = vadd.s32 1, %v3833_v28  ;;  %v3837_v8 = vadd.s32 4294967169, %v456_v63 }
  0xce   :  { %v256_v30 = vsel %vm255_vm1, %v254_v27, 0 }
  0xcf   :  { %v258_v33 = vand.u32 31, %v256_v30  ;;  %v4393_v37 = vshrl.u32 %v256_v30, 5  ;;  %vm359_vm2 = vcmp.gt.s32.totalorder %v358_v31, 0  ;;  %v462_v27 = vadd.s32 1, %v3837_v8 }
  0xd0   :  { %v360_v57 = vsel %vm359_vm2, %v358_v31, 0 }
  0xd1   :  { %v4390_v35 = vsub.s32 32, %v258_v33  ;;  %v261_v39 = vshll.u32 %v7576_v38, %v258_v33  ;;  %v264_v41 = vshll.u32 %v7574_v40, %v258_v33  ;;  %v267_v45 = vshll.u32 %v7579_v43, %v258_v33 }
  0xd2   :  { %v270_v48 = vshll.u32 %v7571_v46, %v258_v33  ;;  %v273_v51 = vshll.u32 %v7569_v49, %v258_v33  ;;  %vm276_vm3 = vcmp.lt.s32.totalorder %v4393_v37, 1  ;;  %v362_v60 = vand.u32 31, %v360_v57 }
  0xd3   :  { %v262_v42 = vshrl.u32 %v7574_v40, %v4390_v35  ;;  %v265_v44 = vshrl.u32 %v7579_v43, %v4390_v35  ;;  %v268_v47 = vshrl.u32 %v7571_v46, %v4390_v35  ;;  %v271_v50 = vshrl.u32 %v7569_v49, %v4390_v35 }
  0xd4   :  { %v274_v53 = vshrl.u32 %v7567_v52, %v4390_v35  ;;  %vm279_vm4 = vcmp.lt.s32.totalorder %v4393_v37, 4  ;;  %vm277_vm5 = vcmp.lt.s32.totalorder %v4393_v37, 2  ;;  %vm278_vm6 = vcmp.lt.s32.totalorder %v4393_v37, 3 }
  0xd5   :  { %v263_v54 = vor.u32 %v262_v42, %v261_v39  ;;  %v266_v55 = vor.u32 %v265_v44, %v264_v41  ;;  %v269_v56 = vor.u32 %v268_v47, %v267_v45  ;;  %v272_v58 = vor.u32 %v271_v50, %v270_v48 }
  0xd6   :  { %v275_v59 = vor.u32 %v274_v53, %v273_v51  ;;  %v4428_v5 = vsub.s32 32, %v362_v60  ;;  %v4440_v13 = vshrl.u32 %v360_v57, 5  ;;  %v374_v18 = vshll.u32 %v7571_v46, %v362_v60 }
  0xd7   :  { %v284_v61 = vsel %vm276_vm3, %v263_v54, %v266_v55  ;;  %v285_v0 = vsel %vm279_vm4, %v272_v58, 920167782  ;;  %v288_v3 = vsel %vm276_vm3, %v266_v55, %v269_v56  ;;  %v377_v20 = vshll.u32 %v7569_v49, %v362_v60 }
  0xd8   :  { %v289_v1 = vsel %vm279_vm4, %v275_v59, 1326507024  ;;  %v286_v2 = vsel %vm278_vm6, %v269_v56, %v285_v0  ;;  %v366_v14 = vshrl.u32 %v7574_v40, %v4428_v5  ;;  %v369_v15 = vshrl.u32 %v7579_v43, %v4428_v5 }
  0xd9   :  { %v290_v4 = vsel %vm278_vm6, %v272_v58, %v289_v1  ;;  %v287_v6 = vsel %vm277_vm5, %v284_v61, %v286_v2  ;;  %v375_v16 = vshrl.u32 %v7569_v49, %v4428_v5  ;;  %v372_v17 = vshrl.u32 %v7571_v46, %v4428_v5 }
  0xda   :  { %v291_v9 = vsel %vm277_vm5, %v288_v3, %v290_v4  ;;  %v4434_v10 = vmul.u32.u64.low %v292_v7, %v287_v6  ;;  %v4435_v11 = vmul.u32.u64.high %v292_v7, %v287_v6, %v4434_v10  ;;  %v378_v22 = vshrl.u32 %v7567_v52, %v4428_v5 }
  0xdb   :  { %v4454_v23 = vmul.u32.u64.low %v292_v7, %v291_v9  ;;  %v4455_v25 = vmul.u32.u64.high %v292_v7, %v291_v9, %v4454_v23  ;;  %v365_v26 = vshll.u32 %v7576_v38, %v362_v60  ;;  %v368_v28 = vshll.u32 %v7574_v40, %v362_v60 }
  0xdc   :  { %v371_v29 = vshll.u32 %v7579_v43, %v362_v60  ;;  %v376_v30 = vor.u32 %v375_v16, %v374_v18  ;;  %v379_v31 = vor.u32 %v378_v22, %v377_v20  ;;  %v281_v33 = vsel %vm279_vm4, %v269_v56, 2102212464  ;;  %v4524_v23 = vpop.f32.mrf.mxu0 }
  0xdd   :  { %v367_v34 = vor.u32 %v366_v14, %v365_v26  ;;  %v370_v36 = vor.u32 %v369_v15, %v368_v28  ;;  %vm383_vm7 = vcmp.lt.s32.totalorder %v4440_v13, 4  ;;  %v260_v41 = vshrl.u32 %v7576_v38, %v4390_v35  ;;  %7713 = vst [vmem:[#allocation8_spill] sm:$0xff] %v4524_v23 }
  0xde   :  { %v373_v39 = vor.u32 %v372_v17, %v371_v29  ;;  %v389_v42 = vsel %vm383_vm7, %v376_v30, 920167782  ;;  %vm463_vm8 = vcmp.gt.s32.totalorder %v462_v27, 0  ;;  %v356_v44 = vor.u32 8388608, %v355_v12 }
  0xdf   :  { %v393_v45 = vsel %vm383_vm7, %v379_v31, 1326507024  ;;  %v452_v47 = vand.u32 2147483647, %v4388_v32  ;;  %v280_v48 = vsel %vm276_vm3, %v260_v41, %v263_v54  ;;  %v282_v50 = vsel %vm278_vm6, %v266_v55, %v281_v33 }
  0xe0   :  { %vm380_vm9 = vcmp.lt.s32.totalorder %v4440_v13, 1  ;;  %vm382_vm10 = vcmp.lt.s32.totalorder %v4440_v13, 3  ;;  %v302_v35 = vadd.s32 1, %v4435_v11  ;;  %v464_v56 = vsel %vm463_vm8, %v462_v27, 0 }
  0xe1   :  { %v388_v51 = vsel %vm380_vm9, %v367_v34, %v370_v36  ;;  %v390_v53 = vsel %vm382_vm10, %v373_v39, %v389_v42  ;;  %vm301_vm11 = vc.u32 %v4455_v25, %v4434_v10  ;;  %v392_v54 = vsel %vm380_vm9, %v370_v36, %v373_v39 }
  0xe2   :  { %v394_v55 = vsel %vm382_vm10, %v376_v30, %v393_v45  ;;  %v466_v57 = vand.u32 31, %v464_v56  ;;  %v283_v58 = vsel %vm277_vm5, %v280_v48, %v282_v50  ;;  %vm381_vm12 = vcmp.lt.s32.totalorder %v4440_v13, 2 }
  0xe3   :  { %v391_v59 = vsel %vm381_vm12, %v388_v51, %v390_v53  ;;  %v303_v61 = vsel %vm301_vm11, %v302_v35, %v4435_v11  ;;  %v395_v63 = vsel %vm381_vm12, %v392_v54, %v394_v55  ;;  %v396_v0 = vshll.u32 %v356_v44, 8 }
  0xe4   :  { %v4492_v60 = vsub.s32 32, %v466_v57  ;;  %v299_v1 = vmul.u32 %v292_v7, %v283_v58  ;;  %v459_v2 = vand.u32 8388607, %v452_v47  ;;  %v385_v12 = vsel %vm383_vm7, %v373_v39, 2102212464 }
  0xe5   :  { %v4499_v3 = vmul.u32.u64.low %v396_v0, %v391_v59  ;;  %v4500_v37 = vmul.u32.u64.high %v396_v0, %v391_v59, %v4499_v3  ;;  %v4507_v9 = vmul.u32.u64.low %v396_v0, %v395_v63  ;;  %v4508_v11 = vmul.u32.u64.high %v396_v0, %v395_v63, %v4507_v9 }
  0xe6   :  { %v470_v4 = vshrl.u32 %v7574_v40, %v4492_v60  ;;  %v473_v6 = vshrl.u32 %v7579_v43, %v4492_v60  ;;  %v304_v8 = vadd.s32 %v303_v61, %v299_v1  ;;  %v476_v7 = vshrl.u32 %v7571_v46, %v4492_v60 }
  0xe7   :  { %v4514_v14 = vshrl.u32 %v464_v56, 5  ;;  %v469_v15 = vshll.u32 %v7576_v38, %v466_v57  ;;  %v472_v16 = vshll.u32 %v7574_v40, %v466_v57  ;;  %v475_v17 = vshll.u32 %v7579_v43, %v466_v57 }
  0xe8   :  { %v478_v18 = vshll.u32 %v7571_v46, %v466_v57  ;;  %v479_v20 = vshrl.u32 %v7569_v49, %v4492_v60  ;;  %v482_v22 = vshrl.u32 %v7567_v52, %v4492_v60  ;;  %v364_v26 = vshrl.u32 %v7576_v38, %v4428_v5 }
  0xe9   :  { %v471_v27 = vor.u32 %v470_v4, %v469_v15  ;;  %v474_v28 = vor.u32 %v473_v6, %v472_v16  ;;  %v460_v29 = vor.u32 8388608, %v459_v2  ;;  %v477_v30 = vor.u32 %v476_v7, %v475_v17 }
  0xea   :  { %v480_v31 = vor.u32 %v479_v20, %v478_v18  ;;  %v481_v33 = vshll.u32 %v7569_v49, %v466_v57  ;;  %v384_v39 = vsel %vm380_vm9, %v364_v26, %v367_v34  ;;  %v386_v41 = vsel %vm382_vm10, %v370_v36, %v385_v12 }
  0xeb   :  { %vm487_vm13 = vcmp.lt.s32.totalorder %v4514_v14, 4  ;;  %v559_v42 = vand.u32 2139095040, %v4524_v23  ;;  %v305_v44 = vadd.s32 536870912, %v304_v8  ;;  %vm484_vm14 = vcmp.lt.s32.totalorder %v4514_v14, 1 }
  0xec   :  { %v483_v45 = vor.u32 %v482_v22, %v481_v33  ;;  %v493_v5 = vsel %vm487_vm13, %v480_v31, 920167782  ;;  %v406_v48 = vadd.s32 1, %v4500_v37  ;;  %vm486_vm15 = vcmp.lt.s32.totalorder %v4514_v14, 3 }
  0xed   :  { %v492_v34 = vsel %vm484_vm14, %v471_v27, %v474_v28  ;;  %vm405_vm0 = vc.u32 %v4508_v11, %v4499_v3  ;;  %v494_v36 = vsel %vm486_vm15, %v477_v30, %v493_v5  ;;  %v387_v50 = vsel %vm381_vm12, %v384_v39, %v386_v41 }
  0xee   :  { %vm485_vm1 = vcmp.lt.s32.totalorder %v4514_v14, 2  ;;  %v496_v35 = vsel %vm484_vm14, %v474_v28, %v477_v30  ;;  %v560_v51 = vshrl.u32 %v559_v42, 23  ;;  %v4551_v53 = vshrl.u32 %v305_v44, 30 }
  0xef   :  { %v495_v56 = vsel %vm485_vm1, %v492_v34, %v494_v36  ;;  %v497_v54 = vsel %vm487_vm13, %v483_v45, 1326507024  ;;  %v500_v55 = vshll.u32 %v460_v29, 8  ;;  %v407_v57 = vsel %vm405_vm0, %v406_v48, %v4500_v37  ;;  %v4597_v48 = vpop.f32.mrf.mxu0 }
  0xf0   :  { %v498_v13 = vsel %vm486_vm15, %v480_v31, %v497_v54  ;;  %v403_v58 = vmul.u32 %v396_v0, %v387_v50  ;;  %v3841_v1 = vadd.s32 4294967169, %v560_v51  ;;  %v307_v2 = vshll.u32 %v4551_v53, 30  ;;  %7714 = vst [vmem:[#allocation9_spill] sm:$0xff] %v4597_v48 }
  0xf1   :  { %v499_v59 = vsel %vm485_vm1, %v496_v35, %v498_v13  ;;  %v4562_v61 = vmul.u32.u64.low %v500_v55, %v495_v56  ;;  %v4563_v63 = vmul.u32.u64.high %v500_v55, %v495_v56, %v4562_v61  ;;  %v489_v37 = vsel %vm487_vm13, %v477_v30, 2102212464 }
  0xf2   :  { %v408_v4 = vadd.s32 %v407_v57, %v403_v58  ;;  %v4567_v6 = vmul.u32.u64.low %v500_v55, %v499_v59  ;;  %v4568_v9 = vmul.u32.u64.high %v500_v55, %v499_v59, %v4567_v6  ;;  %v566_v7 = vadd.s32 1, %v3841_v1 }
  0xf3   :  { %v468_v0 = vshrl.u32 %v7576_v38, %v4492_v60  ;;  %v556_v12 = vand.u32 2147483647, %v4524_v23  ;;  %v4575_v15 = vsub.s32 %v304_v8, %v307_v2  ;;  %v490_v20 = vsel %vm486_vm15, %v474_v28, %v489_v37 }
  0xf4   :  { %vm567_vm2 = vcmp.gt.s32.totalorder %v566_v7, 0  ;;  %v409_v16 = vadd.s32 536870912, %v408_v4  ;;  %v510_v22 = vadd.s32 1, %v4563_v63  ;;  %vm509_vm3 = vc.u32 %v4568_v9, %v4562_v61 }
  0xf5   :  { %v568_v17 = vsel %vm567_vm2, %v566_v7, 0  ;;  %v488_v18 = vsel %vm484_vm14, %v468_v0, %v471_v27  ;;  %v563_v60 = vand.u32 8388607, %v556_v12  ;;  %v310_v8 = vsub.s32 0, %v4575_v15 }
  0xf6   :  { %v570_v26 = vand.u32 31, %v568_v17  ;;  %v4587_v29 = vshrl.u32 %v409_v16, 30  ;;  %v491_v30 = vsel %vm485_vm1, %v488_v18, %v490_v20  ;;  %v511_v31 = vsel %vm509_vm3, %v510_v22, %v4563_v63 }
  0xf7   :  { %v507_v28 = vmul.u32 %v500_v55, %v491_v30  ;;  %v564_v33 = vor.u32 8388608, %v563_v60  ;;  %v3830_v42 = vmin.u32 %v310_v8, %v4575_v15  ;;  %v569_v45 = vshrl.u32 %v568_v17, 5 }
  0xf8   :  { %v571_v27 = vsub.s32 32, %v570_v26  ;;  %v411_v44 = vshll.u32 %v4587_v29, 30  ;;  %v573_v34 = vshll.u32 %v7576_v38, %v570_v26  ;;  %v576_v36 = vshll.u32 %v7574_v40, %v570_v26 }
  0xf9   :  { %v512_v14 = vadd.s32 %v511_v31, %v507_v28  ;;  %v579_v50 = vshll.u32 %v7579_v43, %v570_v26  ;;  %v582_v35 = vshll.u32 %v7571_v46, %v570_v26  ;;  %v585_v56 = vshll.u32 %v7569_v49, %v570_v26 }
  0xfa   :  { %v574_v39 = vshrl.u32 %v7574_v40, %v571_v27  ;;  %v577_v41 = vshrl.u32 %v7579_v43, %v571_v27  ;;  %v580_v5 = vshrl.u32 %v7571_v46, %v571_v27  ;;  %v583_v51 = vshrl.u32 %v7569_v49, %v571_v27 }
  0xfb   :  { %v586_v54 = vshrl.u32 %v7567_v52, %v571_v27  ;;  %v663_v13 = vand.u32 2139095040, %v4597_v48  ;;  %v513_v1 = vadd.s32 536870912, %v512_v14  ;;  %v312_v2 = vclz %v3830_v42 }
  0xfc   :  { %v575_v55 = vor.u32 %v574_v39, %v573_v34  ;;  %v578_v57 = vor.u32 %v577_v41, %v576_v36  ;;  %v581_v58 = vor.u32 %v580_v5, %v579_v50  ;;  %v584_v59 = vor.u32 %v583_v51, %v582_v35 }
  0xfd   :  { %v587_v63 = vor.u32 %v586_v54, %v585_v56  ;;  %v4607_v6 = vsub.s32 %v408_v4, %v411_v44  ;;  %vm588_vm4 = vcmp.lt.s32.totalorder %v569_v45, 1  ;;  %v604_v7 = vshll.u32 %v564_v33, 8 }
  0xfe   :  { %v572_v37 = vshrl.u32 %v7576_v38, %v571_v27  ;;  %vm591_vm5 = vcmp.lt.s32.totalorder %v569_v45, 4  ;;  %v596_v0 = vsel %vm588_vm4, %v575_v55, %v578_v57  ;;  %v664_v16 = vshrl.u32 %v663_v13, 23 }
  0xff   :  { %vm590_vm6 = vcmp.lt.s32.totalorder %v569_v45, 3  ;;  %v597_v17 = vsel %vm591_vm5, %v584_v59, 920167782  ;;  %v600_v18 = vsel %vm588_vm4, %v578_v57, %v581_v58  ;;  %v601_v20 = vsel %vm591_vm5, %v587_v63, 1326507024 }
 0x100   :  { %v4612_v22 = vshrl.u32 %v513_v1, 30  ;;  %vm589_vm7 = vcmp.lt.s32.totalorder %v569_v45, 2  ;;  %v593_v26 = vsel %vm591_vm5, %v581_v58, 2102212464  ;;  %v598_v60 = vsel %vm590_vm6, %v581_v58, %v597_v17  ;;  %v4645_v1 = vpop.f32.mrf.mxu0 }
 0x101   :  { %v3831_v4 = vadd.s32 4294967294, %v312_v2  ;;  %v599_v8 = vsel %vm589_vm7, %v596_v0, %v598_v60  ;;  %v602_v30 = vsel %vm590_vm6, %v584_v59, %v601_v20  ;;  %v592_v27 = vsel %vm588_vm4, %v572_v37, %v575_v55  ;;  %7717 = vst [vmem:[#allocation10_spill] sm:$0xff] %v4645_v1 }
 0x102   :  { %v603_v31 = vsel %vm589_vm7, %v600_v18, %v602_v30  ;;  %v4617_v28 = vmul.u32.u64.low %v604_v7, %v599_v8  ;;  %v4618_v33 = vmul.u32.u64.high %v604_v7, %v599_v8, %v4617_v28  ;;  %v594_v39 = vsel %vm590_vm6, %v578_v57, %v593_v26 }
 0x103   :  { %v4621_v41 = vmul.u32.u64.low %v604_v7, %v603_v31  ;;  %v4622_v42 = vmul.u32.u64.high %v604_v7, %v603_v31, %v4621_v41  ;;  %v3845_v44 = vadd.s32 4294967169, %v664_v16  ;;  %v414_v5 = vsub.s32 0, %v4607_v6 }
 0x104   :  { %v515_v34 = vshll.u32 %v4612_v22, 30  ;;  %vm3832_vm8 = vcmp.lt.s32.totalorder %v3831_v4, 0  ;;  %v595_v50 = vsel %vm589_vm7, %v592_v27, %v594_v39  ;;  %v614_v35 = vadd.s32 1, %v4618_v33 }
 0x105   :  { %v670_v36 = vadd.s32 1, %v3845_v44  ;;  %v330_v51 = vsub.s32 4, %v4551_v53  ;;  %vm613_vm9 = vc.u32 %v4622_v42, %v4617_v28  ;;  %v7564_v56 = vand.u32 2147483647, %v4597_v48 }
 0x106   :  { %v3834_v54 = vmin.u32 %v414_v5, %v4607_v6  ;;  %v4633_v55 = vsub.s32 %v512_v14, %v515_v34  ;;  %v615_v57 = vsel %vm613_vm9, %v614_v35, %v4618_v33  ;;  %v4636_v58 = vsel %vm3832_vm8, 0, %v3831_v4 }
 0x107   :  { %vm671_vm10 = vcmp.gt.s32.totalorder %v670_v36, 0  ;;  %v611_v45 = vmul.u32 %v604_v7, %v595_v50  ;;  %vm4640_vm11 = vcmp.le.f32.partialorder %v244_v24, 0.7853982  ;;  %vm246_vm12 = vcmp.lt.s32.totalorder %v4379_v19, 0 }
 0x108   :  { %v672_v13 = vsel %vm671_vm10, %v670_v36, 0  ;;  %v300_v14 = vadd.s32 %v4434_v10, %v4455_v25  ;;  %v4652_v2 = vsel %vm246_vm12, %v330_v51, %v4551_v53  ;;  %v320_v24 = vsub.s32 4294967266, %v4636_v58 }
 0x109   :  { %v674_v59 = vand.u32 31, %v672_v13  ;;  %v4654_v7 = vadd.s32 %v615_v57, %v611_v45  ;;  %v416_v0 = vclz %v3834_v54  ;;  %v518_v16 = vsub.s32 0, %v4633_v55 }
 0x10a   :  { %v667_v17 = vand.u32 8388607, %v7564_v56  ;;  %v767_v53 = vand.u32 2139095040, %v4645_v1  ;;  %v316_v8 = vsub.s32 32, %v4636_v58  ;;  %v673_v27 = vshrl.u32 %v672_v13, 5 }
 0x10b   :  { %v675_v37 = vsub.s32 32, %v674_v59  ;;  %v677_v18 = vshll.u32 %v7576_v38, %v674_v59  ;;  %v680_v20 = vshll.u32 %v7574_v40, %v674_v59  ;;  %v686_v60 = vshll.u32 %v7571_v46, %v674_v59 }
 0x10c   :  { %v617_v30 = vadd.s32 536870912, %v4654_v7  ;;  %v683_v31 = vshll.u32 %v7579_v43, %v674_v59  ;;  %v321_v5 = vadd.s32 127, %v320_v24  ;;  %v3835_v34 = vadd.s32 4294967294, %v416_v0 }
 0x10d   :  { %v678_v10 = vshrl.u32 %v7574_v40, %v675_v37  ;;  %v681_v25 = vshrl.u32 %v7579_v43, %v675_v37  ;;  %v684_v26 = vshrl.u32 %v7571_v46, %v675_v37  ;;  %v687_v4 = vshrl.u32 %v7569_v49, %v675_v37 }
 0x10e   :  { %v690_v44 = vshrl.u32 %v7567_v52, %v675_v37  ;;  %v689_v36 = vshll.u32 %v7569_v49, %v674_v59  ;;  %v768_v50 = vshrl.u32 %v767_v53, 23  ;;  %v333_v35 = vsel %vm4640_vm11, 0, %v4652_v2 }
 0x10f   :  { %v679_v33 = vor.u32 %v678_v10, %v677_v18  ;;  %v682_v39 = vor.u32 %v681_v25, %v680_v20  ;;  %v688_v41 = vor.u32 %v687_v4, %v686_v60  ;;  %v3838_v51 = vmin.u32 %v518_v16, %v4633_v55 }
 0x110   :  { %v668_v54 = vor.u32 8388608, %v667_v17  ;;  %v685_v57 = vor.u32 %v684_v26, %v683_v31  ;;  %v4677_v13 = vshrl.u32 %v617_v30, 30  ;;  %v691_v45 = vor.u32 %v690_v44, %v689_v36 }
 0x111   :  { %vm692_vm13 = vcmp.lt.s32.totalorder %v673_v27, 1  ;;  %vm695_vm14 = vcmp.lt.s32.totalorder %v673_v27, 4  ;;  %v317_v24 = vshll.u32 %v4575_v15, %v4636_v58  ;;  %v318_v0 = vshrl.u32 %v300_v14, %v316_v8 }
 0x112   :  { %v700_v59 = vsel %vm692_vm13, %v679_v33, %v682_v39  ;;  %v701_v18 = vsel %vm695_vm14, %v688_v41, 920167782  ;;  %v322_v10 = vshll.u32 %v321_v5, 23  ;;  %vm3836_vm15 = vcmp.lt.s32.totalorder %v3835_v34, 0 }
 0x113   :  { %vm694_vm0 = vcmp.lt.s32.totalorder %v673_v27, 3  ;;  %v3849_v2 = vadd.s32 4294967169, %v768_v50  ;;  %vm350_vm1 = vcmp.lt.s32.totalorder %v4382_v21, 0  ;;  %vm693_vm2 = vcmp.lt.s32.totalorder %v673_v27, 2 }
 0x114   :  { %v702_v16 = vsel %vm694_vm0, %v685_v57, %v701_v18  ;;  %v704_v17 = vsel %vm692_vm13, %v682_v39, %v685_v57  ;;  %v708_v25 = vshll.u32 %v668_v54, 8  ;;  %v520_v53 = vclz %v3838_v51 }
 0x115   :  { %v619_v15 = vshll.u32 %v4677_v13, 30  ;;  %v703_v58 = vsel %vm693_vm2, %v700_v59, %v702_v16  ;;  %v705_v14 = vsel %vm695_vm14, %v691_v45, 1326507024  ;;  %v697_v20 = vsel %vm695_vm14, %v685_v57, 2102212464 }
 0x116   :  { %v706_v26 = vsel %vm694_vm0, %v688_v41, %v705_v14  ;;  %v4691_v60 = vmul.u32.u64.low %v708_v25, %v703_v58  ;;  %v4692_v4 = vmul.u32.u64.high %v708_v25, %v703_v58, %v4691_v60  ;;  %v4695_v8 = vsel %vm3836_vm15, 0, %v3835_v34 }
 0x117   :  { %v676_v30 = vshrl.u32 %v7576_v38, %v675_v37  ;;  %v707_v31 = vsel %vm693_vm2, %v704_v17, %v706_v26  ;;  %v774_v44 = vadd.s32 1, %v3849_v2  ;;  %v319_v5 = vor.u32 %v318_v0, %v317_v24 }
 0x118   :  { %v434_v36 = vsub.s32 4, %v4587_v29  ;;  %v4700_v50 = vmul.u32.u64.low %v708_v25, %v707_v31  ;;  %v4701_v51 = vmul.u32.u64.high %v708_v25, %v707_v31, %v4700_v50  ;;  %v323_v54 = vor.u32 4788187, %v322_v10 }
 0x119   :  { %v696_v41 = vsel %vm692_vm13, %v676_v30, %v679_v33  ;;  %v698_v57 = vsel %vm694_vm0, %v682_v39, %v697_v20  ;;  %vm775_vm3 = vcmp.gt.s32.totalorder %v774_v44, 0  ;;  %v424_v34 = vsub.s32 4294967266, %v4695_v8 }
 0x11a   :  { %v3839_v45 = vadd.s32 4294967294, %v520_v53  ;;  %v4707_v37 = vsub.s32 %v4654_v7, %v619_v15  ;;  %v776_v59 = vsel %vm775_vm3, %v774_v44, 0  ;;  %vm4711_vm4 = vcmp.le.f32.partialorder %v348_v62, 0.7853982 }
 0x11b   :  { %v404_v0 = vadd.s32 %v4499_v3, %v4508_v11  ;;  %v718_v33 = vadd.s32 1, %v4692_v4  ;;  %v7563_v39 = vand.u32 2147483647, %v4645_v1  ;;  %v4719_v18 = vadd.s32 3, %v333_v35 }
 0x11c   :  { %v699_v10 = vsel %vm693_vm2, %v696_v41, %v698_v57  ;;  %vm717_vm5 = vc.u32 %v4701_v51, %v4691_v60  ;;  %v778_v7 = vand.u32 31, %v776_v59  ;;  %v324_v2 = vand.u32 2147483647, %v323_v54  ;;  %v4745_v54 = vpop.f32.mrf.mxu0 }
 0x11d   :  { %v326_v62 = vcvt.s32.f32 %v319_v5  ;;  %v420_v16 = vsub.s32 32, %v4695_v8  ;;  %v4728_v3 = vsel %vm350_vm1, %v434_v36, %v4587_v29  ;;  %v425_v11 = vadd.s32 127, %v424_v34  ;;  %7720 = vst [vmem:[#allocation11_spill] sm:$0xff] %v4745_v54 }
 0x11e   :  { %vm3840_vm6 = vcmp.lt.s32.totalorder %v3839_v45, 0  ;;  %v622_v35 = vsub.s32 0, %v4707_v37  ;;  %v779_v17 = vsub.s32 32, %v778_v7  ;;  %v715_v27 = vmul.u32 %v708_v25, %v699_v10 }
 0x11f   :  { %v719_v53 = vsel %vm717_vm5, %v718_v33, %v4692_v4  ;;  %v771_v15 = vand.u32 8388607, %v7563_v39  ;;  %v777_v58 = vshrl.u32 %v776_v59, 5  ;;  %v781_v14 = vshll.u32 %v7576_v38, %v778_v7 }
 0x120   :  { %v782_v20 = vshrl.u32 %v7574_v40, %v779_v17  ;;  %v784_v26 = vshll.u32 %v7574_v40, %v778_v7  ;;  %v785_v29 = vshrl.u32 %v7579_v43, %v779_v17  ;;  %v787_v30 = vshll.u32 %v7579_v43, %v778_v7 }
 0x121   :  { %v788_v31 = vshrl.u32 %v7571_v46, %v779_v17  ;;  %v790_v25 = vshll.u32 %v7571_v46, %v778_v7  ;;  %v791_v4 = vshrl.u32 %v7569_v49, %v779_v17  ;;  %v3842_v44 = vmin.u32 %v622_v35, %v4707_v37 }
 0x122   :  { %v4743_v5 = vadd.s32 %v719_v53, %v715_v27  ;;  %v783_v36 = vor.u32 %v782_v20, %v781_v14  ;;  %v786_v50 = vor.u32 %v785_v29, %v784_v26  ;;  %v793_v34 = vshll.u32 %v7569_v49, %v778_v7 }
 0x123   :  { %v789_v41 = vor.u32 %v788_v31, %v787_v30  ;;  %v792_v57 = vor.u32 %v791_v4, %v790_v25  ;;  %v794_v59 = vshrl.u32 %v7567_v52, %v779_v17  ;;  %v327_v33 = vmul.f32 %v326_v62, %v324_v2 }
 0x124   :  { %v422_v10 = vshrl.u32 %v404_v0, %v420_v16  ;;  %v437_v39 = vsel %vm4711_vm4, 0, %v4728_v3  ;;  %v772_v56 = vor.u32 8388608, %v771_v15  ;;  %v426_v35 = vshll.u32 %v425_v11, 23 }
 0x125   :  { %v795_v27 = vor.u32 %v794_v59, %v793_v34  ;;  %vm796_vm7 = vcmp.lt.s32.totalorder %v777_v58, 1  ;;  %v871_v53 = vand.u32 2139095040, %v4745_v54  ;;  %v4754_v14 = vsel %vm3840_vm6, 0, %v3839_v45 }
 0x126   :  { %v624_v20 = vclz %v3842_v44  ;;  %vm799_vm8 = vcmp.lt.s32.totalorder %v777_v58, 4  ;;  %v804_v7 = vsel %vm796_vm7, %v783_v36, %v786_v50  ;;  %v721_v2 = vadd.s32 536870912, %v4743_v5 }
 0x127   :  { %vm798_vm9 = vcmp.lt.s32.totalorder %v777_v58, 3  ;;  %v801_v0 = vsel %vm799_vm8, %v789_v41, 2102212464  ;;  %v805_v62 = vsel %vm799_vm8, %v792_v57, 920167782  ;;  %v780_v16 = vshrl.u32 %v7576_v38, %v779_v17 }
 0x128   :  { %vm797_vm10 = vcmp.lt.s32.totalorder %v777_v58, 2  ;;  %v806_v3 = vsel %vm798_vm9, %v789_v41, %v805_v62  ;;  %v812_v11 = vshll.u32 %v772_v56, 8  ;;  %vm454_vm13 = vcmp.lt.s32.totalorder %v4388_v32, 0 }
 0x129   :  { %v807_v15 = vsel %vm797_vm10, %v804_v7, %v806_v3  ;;  %v808_v45 = vsel %vm796_vm7, %v786_v50, %v789_v41  ;;  %v809_v26 = vsel %vm799_vm8, %v795_v27, 1326507024  ;;  %v872_v29 = vshrl.u32 %v871_v53, 23 }
 0x12a   :  { %v528_v30 = vsub.s32 4294967266, %v4754_v14  ;;  %v800_v31 = vsel %vm796_vm7, %v780_v16, %v783_v36  ;;  %v802_v25 = vsel %vm798_vm9, %v786_v50, %v801_v0  ;;  %v810_v4 = vsel %vm798_vm9, %v792_v57, %v809_v26 }
 0x12b   :  { %v4764_v44 = vshrl.u32 %v721_v2, 30  ;;  %v811_v17 = vsel %vm797_vm10, %v808_v45, %v810_v4  ;;  %v4767_v34 = vmul.u32.u64.low %v812_v11, %v807_v15  ;;  %v4768_v56 = vmul.u32.u64.high %v812_v11, %v807_v15, %v4767_v34  ;;  %v4794_v45 = vpop.f32.mrf.mxu0 }
 0x12c   :  { %v421_v59 = vshll.u32 %v4607_v6, %v4695_v8  ;;  %v3843_v41 = vadd.s32 4294967294, %v624_v20  ;;  %v4773_v27 = vmul.u32.u64.low %v812_v11, %v811_v17  ;;  %v4774_v53 = vmul.u32.u64.high %v812_v11, %v811_v17, %v4773_v27  ;;  %7723 = vst [vmem:[#allocation12_spill] sm:$0xff] %v4794_v45 }
 0x12d   :  { %v328_v7 = vxor.u32 2147483648, %v327_v33  ;;  %v427_v62 = vor.u32 4788187, %v426_v35  ;;  %vm4778_vm14 = vcmp.le.f32.partialorder %v452_v47, 0.7853982  ;;  %v803_v50 = vsel %vm797_vm10, %v800_v31, %v802_v25 }
 0x12e   :  { %v3853_v57 = vadd.s32 4294967169, %v872_v29  ;;  %v423_v2 = vor.u32 %v422_v10, %v421_v59  ;;  %v441_v0 = vadd.s32 3, %v437_v39  ;;  %v529_v16 = vadd.s32 127, %v528_v30 }
 0x12f   :  { %v538_v6 = vsub.s32 4, %v4612_v22  ;;  %v524_v8 = vsub.s32 32, %v4754_v14  ;;  %v723_v20 = vshll.u32 %v4764_v44, 30  ;;  %v822_v35 = vadd.s32 1, %v4768_v56 }
 0x130   :  { %v878_v3 = vadd.s32 1, %v3853_v57  ;;  %v508_v47 = vadd.s32 %v4562_v61, %v4568_v9  ;;  %vm3844_vm15 = vcmp.lt.s32.totalorder %v3843_v41, 0  ;;  %v819_v15 = vmul.u32 %v812_v11, %v803_v50 }
 0x131   :  { %vm821_vm0 = vc.u32 %v4774_v53, %v4767_v34  ;;  %v329_v39 = vsel %vm246_vm12, %v328_v7, %v327_v33  ;;  %v428_v58 = vand.u32 2147483647, %v427_v62  ;;  %v430_v26 = vcvt.s32.f32 %v423_v2 }
 0x132   :  { %v823_v10 = vsel %vm821_vm0, %v822_v35, %v4768_v56  ;;  %vm879_vm2 = vcmp.gt.s32.totalorder %v878_v3, 0  ;;  %v530_v29 = vshll.u32 %v529_v16, 23  ;;  %v4799_v61 = vsel %vm454_vm13, %v538_v6, %v4612_v22 }
 0x133   :  { %v824_v9 = vadd.s32 %v823_v10, %v819_v15  ;;  %v526_v11 = vshrl.u32 %v508_v47, %v524_v8  ;;  %v4801_v30 = vsel %vm3844_vm15, 0, %v3843_v41  ;;  %v4804_v31 = vsub.s32 %v4743_v5, %v723_v20 }
 0x134   :  { %v880_v33 = vsel %vm879_vm2, %v878_v3, 0  ;;  %v4807_v25 = vand.u32 3, %v4719_v18  ;;  %v4809_v4 = vand.u32 3, %v441_v0  ;;  %v7565_v17 = vand.u32 2147483647, %v4745_v54 }
 0x135   :  { %v975_v56 = vand.u32 2139095040, %v4794_v45  ;;  %v4816_v22 = vsel %vm4640_vm11, %v4379_v19, %v329_v39  ;;  %v4818_v59 = vmul.f32 %v430_v26, %v428_v58  ;;  %v525_v5 = vshll.u32 %v4633_v55, %v4754_v14 }
 0x136   :  { %7724 = vst [vmem:[#allocation13_spill] sm:$0xff] %v4807_v25  ;;  %7725 = vst [vmem:[#allocation14_spill] sm:$0xff] %v4809_v4  ;;  %v882_v41 = vand.u32 31, %v880_v33  ;;  %v4822_v27 = vor.u32 4788187, %v530_v29  ;;  %v541_v18 = vsel %vm4778_vm14, 0, %v4799_v61  ;;  %v612_v63 = vadd.s32 %v4617_v28, %v4622_v42 }
 0x137   :  { %v632_v7 = vsub.s32 4294967266, %v4801_v30  ;;  %v825_v62 = vadd.s32 536870912, %v824_v9  ;;  %v4828_v50 = vor.u32 %v526_v11, %v525_v5  ;;  %v726_v57 = vsub.s32 0, %v4804_v31 }
 0x138   :  { %v883_v2 = vsub.s32 32, %v882_v41  ;;  %v628_v55 = vsub.s32 32, %v4801_v30  ;;  %v875_v14 = vand.u32 8388607, %v7565_v17  ;;  %v885_v0 = vshll.u32 %v7576_v38, %v882_v41 }
 0x139   :  { %v976_v16 = vshrl.u32 %v975_v56, 23  ;;  %v888_v8 = vshll.u32 %v7574_v40, %v882_v41  ;;  %v532_v28 = vand.u32 2147483647, %v4822_v27  ;;  %v633_v42 = vadd.s32 127, %v632_v7 }
 0x13a   :  { %v886_v6 = vshrl.u32 %v7574_v40, %v883_v2  ;;  %v889_v20 = vshrl.u32 %v7579_v43, %v883_v2  ;;  %v892_v35 = vshrl.u32 %v7571_v46, %v883_v2  ;;  %v4842_v3 = vshrl.u32 %v825_v62, 30 }
 0x13b   :  { %v881_v47 = vshrl.u32 %v880_v33, 5  ;;  %v3846_v15 = vmin.u32 %v726_v57, %v4804_v31  ;;  %v891_v10 = vshll.u32 %v7579_v43, %v882_v41  ;;  %v630_v26 = vshrl.u32 %v612_v63, %v628_v55 }
 0x13c   :  { %v887_v39 = vor.u32 %v886_v6, %v885_v0  ;;  %v890_v58 = vor.u32 %v889_v20, %v888_v8  ;;  %v894_v29 = vshll.u32 %v7571_v46, %v882_v41  ;;  %v895_v11 = vshrl.u32 %v7569_v49, %v883_v2 }
 0x13d   :  { %v3857_v56 = vadd.s32 4294967169, %v976_v16  ;;  %v876_v5 = vor.u32 8388608, %v875_v14  ;;  %v893_v17 = vor.u32 %v892_v35, %v891_v10  ;;  %v897_v27 = vshll.u32 %v7569_v49, %v882_v41 }
 0x13e   :  { %v898_v7 = vshrl.u32 %v7567_v52, %v883_v2  ;;  %v634_v62 = vshll.u32 %v633_v42, 23  ;;  %v827_v33 = vshll.u32 %v4842_v3, 30  ;;  %v896_v57 = vor.u32 %v895_v11, %v894_v29 }
 0x13f   :  { %vm900_vm11 = vcmp.lt.s32.totalorder %v881_v47, 1  ;;  %v728_v0 = vclz %v3846_v15  ;;  %vm903_vm12 = vcmp.lt.s32.totalorder %v881_v47, 4  ;;  %vm902_vm3 = vcmp.lt.s32.totalorder %v881_v47, 3 }
 0x140   :  { %v899_v6 = vor.u32 %v898_v7, %v897_v27  ;;  %v908_v63 = vsel %vm900_vm11, %v887_v39, %v890_v58  ;;  %v909_v55 = vsel %vm903_vm12, %v896_v57, 920167782  ;;  %v7566_v16 = vand.u32 2147483647, %v4794_v45 }
 0x141   :  { %v982_v14 = vadd.s32 1, %v3857_v56  ;;  %vm901_vm5 = vcmp.lt.s32.totalorder %v881_v47, 2  ;;  %v905_v8 = vsel %vm903_vm12, %v893_v17, 2102212464  ;;  %v910_v41 = vsel %vm902_vm3, %v893_v17, %v909_v55 }
 0x142   :  { %v916_v20 = vshll.u32 %v876_v5, 8  ;;  %v4854_v35 = vsub.s32 %v824_v9, %v827_v33  ;;  %v884_v42 = vshrl.u32 %v7576_v38, %v883_v2  ;;  %v911_v15 = vsel %vm901_vm5, %v908_v63, %v910_v41 }
 0x143   :  { %v912_v10 = vsel %vm900_vm11, %v890_v58, %v893_v17  ;;  %v629_v29 = vshll.u32 %v4707_v37, %v4801_v30  ;;  %v913_v11 = vsel %vm903_vm12, %v899_v6, 1326507024  ;;  %v906_v5 = vsel %vm902_vm3, %v890_v58, %v905_v8 }
 0x144   :  { %v4861_v27 = vmul.u32.u64.low %v916_v20, %v911_v15  ;;  %v4862_v7 = vmul.u32.u64.high %v916_v20, %v911_v15, %v4861_v27  ;;  %v904_v56 = vsel %vm900_vm11, %v884_v42, %v887_v39  ;;  %v914_v9 = vsel %vm902_vm3, %v896_v57, %v913_v11 }
 0x145   :  { %vm983_vm6 = vcmp.gt.s32.totalorder %v982_v14, 0  ;;  %v4868_v2 = vor.u32 %v630_v26, %v629_v29  ;;  %v4870_v33 = vor.u32 4788187, %v634_v62  ;;  %v915_v17 = vsel %vm901_vm5, %v912_v10, %v914_v9 }
 0x146   :  { %v984_v63 = vsel %vm983_vm6, %v982_v14, 0  ;;  %v534_v37 = vcvt.s32.f32 %v4828_v50  ;;  %v4874_v30 = vadd.s32 4294967294, %v728_v0  ;;  %v830_v6 = vsub.s32 0, %v4854_v35 }
 0x147   :  { %v979_v39 = vand.u32 8388607, %v7566_v16  ;;  %v907_v58 = vsel %vm901_vm5, %v904_v56, %v906_v5  ;;  %v4880_v57 = vmul.u32.u64.low %v916_v20, %v915_v17  ;;  %v4881_v55 = vmul.u32.u64.high %v916_v20, %v915_v17, %v4880_v57 }
 0x148   :  { %v986_v26 = vand.u32 31, %v984_v63  ;;  %v432_v62 = vxor.u32 2147483648, %v4818_v59  ;;  %v4884_v8 = vmul.f32 %v534_v37, %v532_v28  ;;  %v642_v14 = vsub.s32 4, %v4677_v13 }
 0x149   :  { %v926_v50 = vadd.s32 1, %v4862_v7  ;;  %v636_v0 = vand.u32 2147483647, %v4870_v33  ;;  %v638_v41 = vcvt.s32.f32 %v4868_v2  ;;  %v746_v42 = vsub.s32 4, %v4764_v44 }
 0x14a   :  { %v987_v47 = vsub.s32 32, %v986_v26  ;;  %vm3848_vm7 = vcmp.lt.s32.totalorder %v4874_v30, 0  ;;  %v3850_v15 = vmin.u32 %v830_v6, %v4854_v35  ;;  %v923_v10 = vmul.u32 %v916_v20, %v907_v58 }
 0x14b   :  { %v980_v29 = vor.u32 8388608, %v979_v39  ;;  %vm925_vm8 = vc.u32 %v4881_v55, %v4861_v27  ;;  %v985_v28 = vshrl.u32 %v984_v63, 5  ;;  %v989_v11 = vshll.u32 %v7576_v38, %v986_v26 }
 0x14c   :  { %v990_v56 = vshrl.u32 %v7574_v40, %v987_v47  ;;  %v927_v5 = vsel %vm925_vm8, %v926_v50, %v4862_v7  ;;  %v992_v9 = vshll.u32 %v7574_v40, %v986_v26  ;;  %v993_v2 = vshrl.u32 %v7579_v43, %v987_v47 }
 0x14d   :  { %v995_v33 = vshll.u32 %v7579_v43, %v986_v26  ;;  %vm558_vm9 = vcmp.lt.s32.totalorder %v4524_v23, 0  ;;  %v996_v17 = vshrl.u32 %v7571_v46, %v987_v47  ;;  %v998_v37 = vshll.u32 %v7571_v46, %v986_v26 }
 0x14e   :  { %v991_v20 = vor.u32 %v990_v56, %v989_v11  ;;  %v999_v63 = vshrl.u32 %v7569_v49, %v987_v47  ;;  %v994_v6 = vor.u32 %v993_v2, %v992_v9  ;;  %v1001_v39 = vshll.u32 %v7569_v49, %v986_v26  ;;  %v4917_v2 = vpop.f32.mrf.mxu0 }
 0x14f   :  { %v1002_v7 = vshrl.u32 %v7567_v52, %v987_v47  ;;  %v1020_v58 = vshll.u32 %v980_v29, 8  ;;  %vm662_vm10 = vcmp.lt.s32.totalorder %v4597_v48, 0  ;;  %v4908_v57 = vadd.s32 %v927_v5, %v923_v10  ;;  %7728 = vst [vmem:[#allocation15_spill] sm:$0xff] %v4917_v2 }
 0x150   :  { %v997_v50 = vor.u32 %v996_v17, %v995_v33  ;;  %v1000_v16 = vor.u32 %v999_v63, %v998_v37  ;;  %vm1004_vm15 = vcmp.lt.s32.totalorder %v985_v28, 1  ;;  %vm4912_vm0 = vcmp.le.f32.partialorder %v556_v12, 0.7853982 }
 0x151   :  { %v832_v56 = vclz %v3850_v15  ;;  %v1003_v9 = vor.u32 %v1002_v7, %v1001_v39  ;;  %vm1007_vm2 = vcmp.lt.s32.totalorder %v985_v28, 4  ;;  %v1012_v26 = vsel %vm1004_vm15, %v991_v20, %v994_v6 }
 0x152   :  { %v988_v29 = vshrl.u32 %v7576_v38, %v987_v47  ;;  %vm1006_vm11 = vcmp.lt.s32.totalorder %v985_v28, 3  ;;  %v1009_v10 = vsel %vm1007_vm2, %v997_v50, 2102212464  ;;  %v1013_v5 = vsel %vm1007_vm2, %v1000_v16, 920167782 }
 0x153   :  { %v7729_v33 = vand.u32 2147483647, %v4597_v48  ;;  %vm1005_vm3 = vcmp.lt.s32.totalorder %v985_v28, 2  ;;  %v1014_v12 = vsel %vm1006_vm11, %v997_v50, %v1013_v5  ;;  %v1016_v15 = vsel %vm1004_vm15, %v994_v6, %v997_v50 }
 0x154   :  { %v1017_v37 = vsel %vm1007_vm2, %v1003_v9, 1326507024  ;;  %v929_v63 = vadd.s32 536870912, %v4908_v57  ;;  %v1008_v39 = vsel %vm1004_vm15, %v988_v29, %v991_v20  ;;  %v1015_v47 = vsel %vm1005_vm3, %v1012_v26, %v1014_v12 }
 0x155   :  { %vm4922_vm12 = vcmp.le.f32.partialorder %v7729_v33, 0.7853982  ;;  %v1079_v7 = vand.u32 2139095040, %v4917_v2  ;;  %v1010_v52 = vsel %vm1006_vm11, %v994_v6, %v1009_v10  ;;  %v1018_v49 = vsel %vm1006_vm11, %v1000_v16, %v1017_v37 }
 0x156   :  { %v4931_v46 = vmul.u32.u64.low %v1020_v58, %v1015_v47  ;;  %v4932_v33 = vmul.u32.u64.high %v1020_v58, %v1015_v47, %v4931_v46  ;;  %v433_v5 = vsel %vm350_vm1, %v432_v62, %v4818_v59  ;;  %v536_v50 = vxor.u32 2147483648, %v4884_v8 }
 0x157   :  { %v4942_v20 = vsel %vm3848_vm7, 0, %v4874_v30  ;;  %v1019_v9 = vsel %vm1005_vm3, %v1016_v15, %v1018_v49  ;;  %v639_v26 = vmul.f32 %v638_v41, %v636_v0  ;;  %v643_v16 = vsel %vm558_vm9, %v642_v14, %v4677_v13 }
 0x158   :  { %v4948_v6 = vmul.u32.u64.low %v1020_v58, %v1019_v9  ;;  %v4949_v29 = vmul.u32.u64.high %v1020_v58, %v1019_v9, %v4948_v6  ;;  %4128 = vcosq.f32 %v4816_v22  ;;  %v3851_v59 = vadd.s32 4294967294, %v832_v56 }
 0x159   :  { %v4952_v62 = vshrl.u32 %v929_v63, 30  ;;  %v1011_v10 = vsel %vm1005_vm3, %v1008_v39, %v1010_v52  ;;  %v736_v30 = vsub.s32 4294967266, %v4942_v20  ;;  %v747_v49 = vsel %vm662_vm10, %v746_v42, %v4764_v44 }
 0x15a   :  { %v1030_v13 = vadd.s32 1, %v4932_v33  ;;  %v1080_v14 = vshrl.u32 %v1079_v7, 23  ;;  %v436_v0 = vsel %vm4711_vm4, %v4382_v21, %v433_v5  ;;  %v537_v41 = vsel %vm454_vm13, %v536_v50, %v4884_v8  ;;  %v4990_v7 = vpop.f32.mrf.mxu0 }
 0x15b   :  { %v545_v52 = vadd.s32 3, %v541_v18  ;;  %v645_v28 = vsel %vm4912_vm0, 0, %v643_v16  ;;  %v640_v44 = vxor.u32 2147483648, %v639_v26  ;;  %v1027_v42 = vmul.u32 %v1020_v58, %v1011_v10  ;;  %7733 = vst [vmem:[#allocation17_spill] sm:$0xff] %v4990_v7 }
 0x15c   :  { %vm1029_vm1 = vc.u32 %v4949_v29, %v4931_v46  ;;  %v3861_v56 = vadd.s32 4294967169, %v1080_v14  ;;  %v749_v24 = vsel %vm4922_vm12, 0, %v747_v49  ;;  %vm3852_vm4 = vcmp.lt.s32.totalorder %v3851_v59, 0 }
 0x15d   :  { %v931_v8 = vshll.u32 %v4952_v62, 30  ;;  %v1031_v12 = vsel %vm1029_vm1, %v1030_v13, %v4932_v33  ;;  %4130 = vsinq.f32 %v4816_v22  ;;  %v737_v61 = vadd.s32 127, %v736_v30 }
 0x15e   :  { %v4981_v18 = vadd.s32 %v1031_v12, %v1027_v42  ;;  %v1086_v15 = vadd.s32 1, %v3861_v56  ;;  %4132 = vcosq.f32 %v436_v0  ;;  %v540_v58 = vsel %vm4778_vm14, %v4388_v32, %v537_v41 }
 0x15f   :  { %v4986_v37 = vand.u32 3, %v545_v52  ;;  %v649_v63 = vadd.s32 3, %v645_v28  ;;  %4134 = vsinq.f32 %v436_v0  ;;  %v753_v39 = vadd.s32 3, %v749_v24 }
 0x160   :  { %v4988_v47 = vsel %vm3852_vm4, 0, %v3851_v59  ;;  %vm1087_vm13 = vcmp.gt.s32.totalorder %v1086_v15, 0  ;;  %v641_v22 = vsel %vm558_vm9, %v640_v44, %v639_v26  ;;  %v4995_v33 = vsub.s32 %v4908_v57, %v931_v8 }
 0x161   :  { %7732 = vst [vmem:[#allocation16_spill] sm:$0xff] %v4986_v37  ;;  %v1033_v5 = vadd.s32 536870912, %v4981_v18  ;;  %v1088_v36 = vsel %vm1087_vm13, %v1086_v15, 0  ;;  %4136 = vcosq.f32 %v540_v58  ;;  %v732_v50 = vsub.s32 32, %v4942_v20 }
 0x162   :  { %v738_v9 = vshll.u32 %v737_v61, 23  ;;  %v1090_v16 = vand.u32 31, %v1088_v36  ;;  %4138 = vsinq.f32 %v540_v58  ;;  %v4999_v6 = vand.u32 3, %v649_v63 }
 0x163   :  { %v840_v59 = vsub.s32 4294967266, %v4988_v47  ;;  %v1183_v10 = vand.u32 2139095040, %v4990_v7  ;;  %v5006_v57 = vsel %vm4912_vm0, %v4524_v23, %v641_v22  ;;  %v716_v26 = vadd.s32 %v4691_v60, %v4701_v51 }
 0x164   :  { %7734 = vst [vmem:[#allocation18_spill] sm:$0xff] %v4999_v6  ;;  %v7573_v30 = vand.u32 2147483647, %v4917_v2  ;;  %v1091_v49 = vsub.s32 32, %v1090_v16  ;;  %v5011_v13 = vand.u32 3, %v753_v39  ;;  %v820_v14 = vadd.s32 %v4767_v34, %v4774_v53 }
 0x165   :  { %v934_v0 = vsub.s32 0, %v4995_v33  ;;  %v5016_v41 = vshrl.u32 %v1033_v5, 30  ;;  %v5018_v52 = vpop.eup %4128  ;;  %v733_v11 = vshll.u32 %v4804_v31, %v4942_v20  ;;  %v734_v28 = vshrl.u32 %v716_v26, %v732_v50 }
 0x166   :  { %7735 = vst [vmem:[#allocation19_spill] sm:$0xff] %v5011_v13  ;;  %7736 = vst [vmem:[#allocation20_spill] sm:$0xff] %v5018_v52  ;;  %v5022_v44 = vor.u32 4788187, %v738_v9  ;;  %v1094_v60 = vshrl.u32 %v7574_v40, %v1091_v49  ;;  %v836_v51 = vsub.s32 32, %v4988_v47  ;;  %v841_v42 = vadd.s32 127, %v840_v59 }
 0x167   :  { %v1097_v56 = vshrl.u32 %v7579_v43, %v1091_v49  ;;  %v1184_v34 = vshrl.u32 %v1183_v10, 23  ;;  %v1083_v53 = vand.u32 8388607, %v7573_v30  ;;  %v1093_v24 = vshll.u32 %v7576_v38, %v1090_v16 }
 0x168   :  { %v1096_v8 = vshll.u32 %v7574_v40, %v1090_v16  ;;  %v7737_v12 = vmov 2102212464   ;;  %v3854_v20 = vmin.u32 %v934_v0, %v4995_v33  ;;  %v1035_v61 = vshll.u32 %v5016_v41, 30 }
 0x169   :  { %v1100_v31 = vshrl.u32 %v7737_v12, %v1091_v49  ;;  %v1089_v15 = vshrl.u32 %v1088_v36, 5  ;;  %v1099_v58 = vshll.u32 %v7579_v43, %v1090_v16  ;;  %v1095_v63 = vor.u32 %v1094_v60, %v1093_v24 }
 0x16a   :  { %v1098_v39 = vor.u32 %v1097_v56, %v1096_v8  ;;  %v1102_v22 = vshll.u32 %v7737_v12, %v1090_v16  ;;  %v7738_v5 = vmov 920167782   ;;  %v5037_v9 = vpop.eup %4130  ;;  %v7740_v26 = vmov 1326507024  }
 0x16b   :  { %v1103_v50 = vshrl.u32 %v7738_v5, %v1091_v49  ;;  %7739 = vst [vmem:[#allocation21_spill] sm:$0xff] %v5037_v9  ;;  %v1101_v59 = vor.u32 %v1100_v31, %v1099_v58  ;;  %v1105_v10 = vshll.u32 %v7738_v5, %v1090_v16  ;;  %v1106_v30 = vshrl.u32 %v7740_v26, %v1091_v49  ;;  %v5041_v0 = vpop.eup %4132 }
 0x16c   :  { %v3865_v40 = vadd.s32 4294967169, %v1184_v34  ;;  %7741 = vst [vmem:[#allocation22_spill] sm:$0xff] %v5041_v0  ;;  %v838_v38 = vshrl.u32 %v820_v14, %v836_v51  ;;  %v842_v36 = vshll.u32 %v841_v42, 23  ;;  %v1084_v32 = vor.u32 8388608, %v1083_v53  ;;  %v5043_v60 = vpop.eup %4134 }
 0x16d   :  { %v1104_v43 = vor.u32 %v1103_v50, %v1102_v22  ;;  %7742 = vst [vmem:[#allocation23_spill] sm:$0xff] %v5043_v60  ;;  %v936_v56 = vclz %v3854_v20  ;;  %v1107_v24 = vor.u32 %v1106_v30, %v1105_v10  ;;  %vm1108_vm14 = vcmp.lt.s32.totalorder %v1089_v15, 1 }
 0x16e   :  { %vm1111_vm5 = vcmp.lt.s32.totalorder %v1089_v15, 4  ;;  %v5046_v8 = vsub.s32 %v4981_v18, %v1035_v61  ;;  %vm1110_vm6 = vcmp.lt.s32.totalorder %v1089_v15, 3  ;;  %v1116_v16 = vsel %vm1108_vm14, %v1095_v63, %v1098_v39  ;;  %v5049_v34 = vpop.eup %4136 }
 0x16f   :  { %v1117_v31 = vsel %vm1111_vm5, %v1104_v43, 920167782  ;;  %7743 = vst [vmem:[#allocation24_spill] sm:$0xff] %v5049_v34  ;;  %v7744_v58 = vmov 683565275   ;;  %vm1109_vm7 = vcmp.lt.s32.totalorder %v1089_v15, 2  ;;  %v5053_v53 = vpop.eup %4138  ;;  %v1120_v18 = vsel %vm1108_vm14, %v1098_v39, %v1101_v59 }
 0x170   :  { %v1092_v14 = vshrl.u32 %v7744_v58, %v1091_v49  ;;  %v1118_v51 = vsel %vm1110_vm6, %v1101_v59, %v1117_v31  ;;  %v1190_v42 = vadd.s32 1, %v3865_v40  ;;  %7745 = vst [vmem:[#allocation25_spill] sm:$0xff] %v5053_v53  ;;  %v1113_v30 = vsel %vm1111_vm5, %v1101_v59, 2102212464 }
 0x171   :  { %v1119_v20 = vsel %vm1109_vm7, %v1116_v16, %v1118_v51  ;;  %v1121_v61 = vsel %vm1111_vm5, %v1107_v24, 1326507024  ;;  %v735_v22 = vor.u32 %v734_v28, %v733_v11  ;;  %v740_v50 = vand.u32 2147483647, %v5022_v44 }
 0x172   :  { %v1122_v10 = vsel %vm1110_vm6, %v1104_v43, %v1121_v61  ;;  %v1124_v19 = vshll.u32 %v1084_v32, 8  ;;  %v837_v49 = vshll.u32 %v4854_v35, %v4988_v47  ;;  %v3855_v34 = vadd.s32 4294967294, %v936_v56 }
 0x173   :  { %v1038_v40 = vsub.s32 0, %v5046_v8  ;;  %v1112_v31 = vsel %vm1108_vm14, %v1092_v14, %v1095_v63  ;;  %v1114_v37 = vsel %vm1110_vm6, %v1098_v39, %v1113_v30  ;;  %v1123_v16 = vsel %vm1109_vm7, %v1120_v18, %v1122_v10  ;;  %v5076_v14 = vpop.f32.mrf.mxu0 }
 0x174   :  { %v5065_v59 = vmul.u32.u64.low %v1124_v19, %v1119_v20  ;;  %v5066_v24 = vmul.u32.u64.high %v1124_v19, %v1119_v20, %v5065_v59  ;;  %v839_v11 = vor.u32 %v838_v38, %v837_v49  ;;  %v843_v28 = vor.u32 4788187, %v842_v36  ;;  %7746 = vst [vmem:[#allocation26_spill] sm:$0xff] %v5076_v14 }
 0x175   :  { %v7584_v32 = vand.u32 2147483647, %v4990_v7  ;;  %vm1191_vm8 = vcmp.gt.s32.totalorder %v1190_v42, 0  ;;  %v742_v43 = vcvt.s32.f32 %v735_v22  ;;  %vm766_vm9 = vcmp.lt.s32.totalorder %v4645_v1, 0 }
 0x176   :  { %v5070_v35 = vmul.u32.u64.low %v1124_v19, %v1123_v16  ;;  %v5071_v47 = vmul.u32.u64.high %v1124_v19, %v1123_v16, %v5070_v35  ;;  %v1192_v44 = vsel %vm1191_vm8, %v1190_v42, 0  ;;  %vm3856_vm15 = vcmp.lt.s32.totalorder %v3855_v34, 0 }
 0x177   :  { %v3858_v63 = vmin.u32 %v1038_v40, %v5046_v8  ;;  %v1115_v39 = vsel %vm1109_vm7, %v1112_v31, %v1114_v37  ;;  %v1194_v56 = vand.u32 31, %v1192_v44  ;;  %4140 = vcosq.f32 %v5006_v57 }
 0x178   :  { %v5079_v38 = vmul.f32 %v742_v43, %v740_v50  ;;  %v850_v36 = vsub.s32 4, %v4842_v3  ;;  %v1134_v51 = vadd.s32 1, %v5066_v24  ;;  %v844_v30 = vand.u32 2147483647, %v843_v28 }
 0x179   :  { %v846_v42 = vcvt.s32.f32 %v839_v11  ;;  %v1187_v20 = vand.u32 8388607, %v7584_v32  ;;  %v1195_v18 = vsub.s32 32, %v1194_v56  ;;  %v5085_v61 = vsel %vm3856_vm15, 0, %v3855_v34 }
 0x17a   :  { %v1131_v37 = vmul.u32 %v1124_v19, %v1115_v39  ;;  %vm1133_vm0 = vc.u32 %v5071_v47, %v5065_v59  ;;  %v1287_v15 = vand.u32 2139095040, %v5076_v14  ;;  %v1040_v22 = vclz %v3858_v63 }
 0x17b   :  { %v1135_v50 = vsel %vm1133_vm0, %v1134_v51, %v5066_v24  ;;  %v1197_v10 = vshll.u32 %v7744_v58, %v1194_v56  ;;  %v7747_v49 = vmov 2475754826   ;;  %v7748_v11 = vmov 2131351028  }
 0x17c   :  { %v1198_v40 = vshrl.u32 %v7747_v49, %v1195_v18  ;;  %v1136_v31 = vadd.s32 %v1135_v50, %v1131_v37  ;;  %v1200_v16 = vshll.u32 %v7747_v49, %v1194_v56  ;;  %v1201_v28 = vshrl.u32 %v7748_v11, %v1195_v18 }
 0x17d   :  { %v1204_v34 = vshrl.u32 %v7737_v12, %v1195_v18  ;;  %v1193_v19 = vshrl.u32 %v1192_v44, 5  ;;  %v1203_v43 = vshll.u32 %v7748_v11, %v1194_v56  ;;  %v1206_v35 = vshll.u32 %v7737_v12, %v1194_v56 }
 0x17e   :  { %v1207_v63 = vshrl.u32 %v7738_v5, %v1195_v18  ;;  %v1137_v39 = vadd.s32 536870912, %v1136_v31  ;;  %v1199_v24 = vor.u32 %v1198_v40, %v1197_v10  ;;  %v1202_v51 = vor.u32 %v1201_v28, %v1200_v16 }
 0x17f   :  { %v1210_v32 = vshrl.u32 %v7740_v26, %v1195_v18  ;;  %4142 = vsinq.f32 %v5006_v57  ;;  %v1205_v37 = vor.u32 %v1204_v34, %v1203_v43  ;;  %v1209_v53 = vshll.u32 %v7738_v5, %v1194_v56 }
 0x180   :  { %v1208_v50 = vor.u32 %v1207_v63, %v1206_v35  ;;  %v744_v52 = vxor.u32 2147483648, %v5079_v38  ;;  %v5103_v44 = vmul.f32 %v846_v42, %v844_v30  ;;  %v851_v25 = vsel %vm766_vm9, %v850_v36, %v4842_v3 }
 0x181   :  { %v5108_v9 = vshrl.u32 %v1137_v39, 30  ;;  %v7749_v10 = vand.u32 2147483647, %v4645_v1  ;;  %v944_v57 = vsub.s32 4294967266, %v5085_v61  ;;  %v1188_v16 = vor.u32 8388608, %v1187_v20 }
 0x182   :  { %v1211_v56 = vor.u32 %v1210_v32, %v1209_v53  ;;  %vm1212_vm11 = vcmp.lt.s32.totalorder %v1193_v19, 1  ;;  %v3859_v28 = vadd.s32 4294967294, %v1040_v22  ;;  %vm1215_vm3 = vcmp.lt.s32.totalorder %v1193_v19, 4 }
 0x183   :  { %vm5112_vm2 = vcmp.le.f32.partialorder %v7749_v10, 0.7853982  ;;  %v1220_v30 = vsel %vm1212_vm11, %v1199_v24, %v1202_v51  ;;  %v1288_v42 = vshrl.u32 %v1287_v15, 23  ;;  %v1196_v3 = vshrl.u32 %v7744_v58, %v1195_v18 }
 0x184   :  { %vm1214_vm1 = vcmp.lt.s32.totalorder %v1193_v19, 3  ;;  %v1217_v36 = vsel %vm1215_vm3, %v1205_v37, 2102212464  ;;  %v1221_v34 = vsel %vm1215_vm3, %v1208_v50, 920167782  ;;  %v1139_v43 = vshll.u32 %v5108_v9, 30  ;;  %v5121_v39 = vpop.eup %4140 }
 0x185   :  { %vm1213_vm4 = vcmp.lt.s32.totalorder %v1193_v19, 2  ;;  %v1222_v35 = vsel %vm1214_vm1, %v1205_v37, %v1221_v34  ;;  %v1224_v63 = vsel %vm1212_vm11, %v1202_v51, %v1205_v37  ;;  %7752 = vst [vmem:[#allocation27_spill] sm:$0xff] %v5121_v39  ;;  %v945_v53 = vadd.s32 127, %v944_v57 }
 0x186   :  { %v1223_v32 = vsel %vm1213_vm4, %v1220_v30, %v1222_v35  ;;  %v1225_v20 = vsel %vm1215_vm3, %v1211_v56, 1326507024  ;;  %v1228_v22 = vshll.u32 %v1188_v16, 8  ;;  %v1216_v15 = vsel %vm1212_vm11, %v1196_v3, %v1199_v24 }
 0x187   :  { %v1218_v10 = vsel %vm1214_vm1, %v1202_v51, %v1217_v36  ;;  %v1226_v18 = vsel %vm1214_vm1, %v1208_v50, %v1225_v20  ;;  %v3869_v23 = vadd.s32 4294967169, %v1288_v42  ;;  %v745_v6 = vsel %vm662_vm10, %v744_v52, %v5079_v38 }
 0x188   :  { %vm870_vm13 = vcmp.lt.s32.totalorder %v4745_v54, 0  ;;  %v1227_v37 = vsel %vm1213_vm4, %v1224_v63, %v1226_v18  ;;  %v5130_v34 = vmul.u32.u64.low %v1228_v22, %v1223_v32  ;;  %v5131_v39 = vmul.u32.u64.high %v1228_v22, %v1223_v32, %v5130_v34 }
 0x189   :  { %vm3860_vm14 = vcmp.lt.s32.totalorder %v3859_v28, 0  ;;  %v5134_v57 = vsub.s32 %v1136_v31, %v1139_v43  ;;  %v5136_v16 = vmul.u32.u64.low %v1228_v22, %v1227_v37  ;;  %v5137_v24 = vmul.u32.u64.high %v1228_v22, %v1227_v37, %v5136_v16 }
 0x18a   :  { %v940_v51 = vsub.s32 32, %v5085_v61  ;;  %v946_v50 = vshll.u32 %v945_v53, 23  ;;  %v1219_v56 = vsel %vm1213_vm4, %v1216_v15, %v1218_v10  ;;  %v1294_v52 = vadd.s32 1, %v3869_v23 }
 0x18b   :  { %v748_v38 = vsel %vm4922_vm12, %v4597_v48, %v745_v6  ;;  %v848_v30 = vxor.u32 2147483648, %v5103_v44  ;;  %v853_v42 = vsel %vm5112_vm2, 0, %v851_v25  ;;  %v924_v31 = vadd.s32 %v4861_v27, %v4881_v55 }
 0x18c   :  { %v954_v3 = vsub.s32 4, %v4952_v62  ;;  %v5150_v36 = vsel %vm3860_vm14, 0, %v3859_v28  ;;  %v1238_v19 = vadd.s32 1, %v5131_v39  ;;  %vm1295_vm10 = vcmp.gt.s32.totalorder %v1294_v52, 0  ;;  %v5153_v23 = vpop.eup %4142 }
 0x18d   :  { %7753 = vst [vmem:[#allocation28_spill] sm:$0xff] %v5153_v23  ;;  %v1142_v17 = vsub.s32 0, %v5134_v57  ;;  %v1235_v6 = vmul.u32 %v1228_v22, %v1219_v56  ;;  %vm1237_vm12 = vc.u32 %v5137_v24, %v5130_v34  ;;  %v1296_v43 = vsel %vm1295_vm10, %v1294_v52, 0 }
 0x18e   :  { %v942_v25 = vshrl.u32 %v924_v31, %v940_v51  ;;  %v947_v35 = vor.u32 4788187, %v946_v50  ;;  %v1239_v27 = vsel %vm1237_vm12, %v1238_v19, %v5131_v39  ;;  %v1298_v55 = vand.u32 31, %v1296_v43  ;;  %v5180_v51 = vpop.f32.mrf.mxu0 }
 0x18f   :  { %4144 = vcosq.f32 %v748_v38  ;;  %v5159_v28 = vadd.s32 3, %v853_v42  ;;  %v1048_v63 = vsub.s32 4294967266, %v5150_v36  ;;  %v1240_v53 = vadd.s32 %v1239_v27, %v1235_v6  ;;  %7757 = vst [vmem:[#allocation29_spill] sm:$0xff] %v5180_v51 }
 0x190   :  { %4146 = vsinq.f32 %v748_v38  ;;  %v7754_v32 = vand.u32 2147483647, %v4745_v54  ;;  %v941_v22 = vshll.u32 %v4995_v33, %v5085_v61  ;;  %v7592_v15 = vand.u32 2147483647, %v5076_v14 }
 0x191   :  { %v1299_v39 = vsub.s32 32, %v1298_v55  ;;  %v849_v10 = vsel %vm766_vm9, %v848_v30, %v5103_v44  ;;  %v5177_v18 = vsel %vm870_vm13, %v954_v3, %v4952_v62  ;;  %v3862_v37 = vmin.u32 %v1142_v17, %v5134_v57 }
 0x192   :  { %vm5164_vm5 = vcmp.le.f32.partialorder %v7754_v32, 0.7853982  ;;  %v1241_v16 = vadd.s32 536870912, %v1240_v53  ;;  %v943_v50 = vor.u32 %v942_v25, %v941_v22  ;;  %v948_v56 = vand.u32 2147483647, %v947_v35 }
 0x193   :  { %v1028_v33 = vadd.s32 %v4931_v46, %v4949_v29  ;;  %v1044_v61 = vsub.s32 32, %v5150_v36  ;;  %v1049_v52 = vadd.s32 127, %v1048_v63  ;;  %v1302_v44 = vshrl.u32 %v7747_v49, %v1299_v39 }
 0x194   :  { %v5185_v38 = vshrl.u32 %v1241_v16, 30  ;;  %v1305_v62 = vshrl.u32 %v7748_v11, %v1299_v39  ;;  %v1291_v30 = vand.u32 8388607, %v7592_v15  ;;  %v1308_v42 = vshrl.u32 %v7737_v12, %v1299_v39 }
 0x195   :  { %v1311_v31 = vshrl.u32 %v7738_v5, %v1299_v39  ;;  %v1391_v3 = vand.u32 2139095040, %v5180_v51  ;;  %v1144_v19 = vclz %v3862_v37  ;;  %v1297_v46 = vshrl.u32 %v1296_v43, 5 }
 0x196   :  { %v1301_v29 = vshll.u32 %v7744_v58, %v1298_v55  ;;  %v1304_v17 = vshll.u32 %v7747_v49, %v1298_v55  ;;  %v1307_v6 = vshll.u32 %v7748_v11, %v1298_v55  ;;  %v1310_v25 = vshll.u32 %v7737_v12, %v1298_v55 }
 0x197   :  { %v1313_v35 = vshll.u32 %v7738_v5, %v1298_v55  ;;  %v1314_v27 = vshrl.u32 %v7740_v26, %v1299_v39  ;;  %v950_v63 = vcvt.s32.f32 %v943_v50  ;;  %v1243_v32 = vshll.u32 %v5185_v38, 30 }
 0x198   :  { %v1303_v22 = vor.u32 %v1302_v44, %v1301_v29  ;;  %v1306_v16 = vor.u32 %v1305_v62, %v1304_v17  ;;  %v1309_v15 = vor.u32 %v1308_v42, %v1307_v6  ;;  %v1312_v37 = vor.u32 %v1311_v31, %v1310_v25 }
 0x199   :  { %v1315_v43 = vor.u32 %v1314_v27, %v1313_v35  ;;  %v1392_v23 = vshrl.u32 %v1391_v3, 23  ;;  %v852_v0 = vsel %vm5112_vm2, %v4645_v1, %v849_v10  ;;  %v5204_v4 = vmul.f32 %v950_v63, %v948_v56 }
 0x19a   :  { %v957_v55 = vsel %vm5164_vm5, 0, %v5177_v18  ;;  %v1046_v60 = vshrl.u32 %v1028_v33, %v1044_v61  ;;  %v1050_v50 = vshll.u32 %v1049_v52, 23  ;;  %v3863_v21 = vadd.s32 4294967294, %v1144_v19 }
 0x19b   :  { %v1292_v13 = vor.u32 8388608, %v1291_v30  ;;  %vm1316_vm6 = vcmp.lt.s32.totalorder %v1297_v46, 1  ;;  %v5209_v44 = vsub.s32 %v1240_v53, %v1243_v32  ;;  %vm1318_vm7 = vcmp.lt.s32.totalorder %v1297_v46, 3 }
 0x19c   :  { %vm1319_vm8 = vcmp.lt.s32.totalorder %v1297_v46, 4  ;;  %v1324_v62 = vsel %vm1316_vm6, %v1303_v22, %v1306_v16  ;;  %v5212_v42 = vpop.eup %4144  ;;  %v1328_v10 = vsel %vm1316_vm6, %v1306_v16, %v1309_v15  ;;  %v3873_v31 = vadd.s32 4294967169, %v1392_v23 }
 0x19d   :  { %7758 = vst [vmem:[#allocation30_spill] sm:$0xff] %v5212_v42  ;;  %v1325_v40 = vsel %vm1319_vm8, %v1312_v37, 920167782  ;;  %v1329_v56 = vsel %vm1319_vm8, %v1315_v43, 1326507024  ;;  %v5215_v3 = vpop.eup %4146  ;;  %v1300_v18 = vshrl.u32 %v7744_v58, %v1299_v39  ;;  %vm1317_vm9 = vcmp.lt.s32.totalorder %v1297_v46, 2 }
 0x19e   :  { %7759 = vst [vmem:[#allocation31_spill] sm:$0xff] %v5215_v3  ;;  %v1321_v33 = vsel %vm1319_vm8, %v1309_v15, 2102212464  ;;  %v1326_v53 = vsel %vm1318_vm7, %v1309_v15, %v1325_v40  ;;  %v1330_v52 = vsel %vm1318_vm7, %v1312_v37, %v1329_v56  ;;  %v1332_v30 = vshll.u32 %v1292_v13, 8 }
 0x19f   :  { %v1327_v61 = vsel %vm1317_vm9, %v1324_v62, %v1326_v53  ;;  %v1398_v19 = vadd.s32 1, %v3873_v31  ;;  %v1045_v29 = vshll.u32 %v5046_v8, %v5150_v36  ;;  %v1246_v17 = vsub.s32 0, %v5209_v44 }
 0x1a0   :  { %v1320_v23 = vsel %vm1316_vm6, %v1300_v18, %v1303_v22  ;;  %v1331_v6 = vsel %vm1317_vm9, %v1328_v10, %v1330_v52  ;;  %v1322_v39 = vsel %vm1318_vm7, %v1306_v16, %v1321_v33  ;;  %vm3864_vm0 = vcmp.lt.s32.totalorder %v3863_v21, 0 }
 0x1a1   :  { %v5227_v25 = vmul.u32.u64.low %v1332_v30, %v1331_v6  ;;  %v5228_v35 = vmul.u32.u64.high %v1332_v30, %v1331_v6, %v5227_v25  ;;  %vm1399_vm15 = vcmp.gt.s32.totalorder %v1398_v19, 0  ;;  %v1047_v15 = vor.u32 %v1046_v60, %v1045_v29 }
 0x1a2   :  { %v5230_v27 = vmul.u32.u64.low %v1332_v30, %v1327_v61  ;;  %v5231_v13 = vmul.u32.u64.high %v1332_v30, %v1327_v61, %v5230_v27  ;;  %4148 = vcosq.f32 %v852_v0  ;;  %v1051_v8 = vor.u32 4788187, %v1050_v50 }
 0x1a3   :  { %v7600_v36 = vand.u32 2147483647, %v5180_v51  ;;  %v1400_v63 = vsel %vm1399_vm15, %v1398_v19, 0  ;;  %4150 = vsinq.f32 %v852_v0  ;;  %v5236_v32 = vand.u32 3, %v5159_v28 }
 0x1a4   :  { %v3866_v22 = vmin.u32 %v1246_v17, %v5209_v44  ;;  %v1323_v16 = vsel %vm1317_vm9, %v1320_v23, %v1322_v39  ;;  %v5240_v37 = vadd.s32 3, %v957_v55  ;;  %v5242_v60 = vsel %vm3864_vm0, 0, %v3863_v21  ;;  %v5261_v23 = vpop.f32.mrf.mxu0 }
 0x1a5   :  { %7760 = vst [vmem:[#allocation32_spill] sm:$0xff] %v5236_v32  ;;  %vm1341_vm2 = vc.u32 %v5228_v35, %v5230_v27  ;;  %v1402_v43 = vand.u32 31, %v1400_v63  ;;  %v1054_v62 = vcvt.s32.f32 %v1047_v15  ;;  %v1342_v28 = vadd.s32 1, %v5231_v13  ;;  %7761 = vst [vmem:[#allocation33_spill] sm:$0xff] %v5261_v23 }
 0x1a6   :  { %v1052_v40 = vand.u32 2147483647, %v1051_v8  ;;  %v1339_v10 = vmul.u32 %v1332_v30, %v1323_v16  ;;  %v1395_v46 = vand.u32 8388607, %v7600_v36  ;;  %v1152_v21 = vsub.s32 4294967266, %v5242_v60 }
 0x1a7   :  { %v1403_v55 = vsub.s32 32, %v1402_v43  ;;  %v1248_v56 = vclz %v3866_v22  ;;  %v1343_v31 = vsel %vm1341_vm2, %v1342_v28, %v5231_v13  ;;  %v1405_v18 = vshll.u32 %v7744_v58, %v1402_v43 }
 0x1a8   :  { %v1344_v33 = vadd.s32 %v1343_v31, %v1339_v10  ;;  %v1408_v61 = vshll.u32 %v7747_v49, %v1402_v43  ;;  %v1411_v30 = vshll.u32 %v7748_v11, %v1402_v43  ;;  %v1414_v29 = vshll.u32 %v7737_v12, %v1402_v43 }
 0x1a9   :  { %v1406_v53 = vshrl.u32 %v7747_v49, %v1403_v55  ;;  %v1409_v52 = vshrl.u32 %v7748_v11, %v1403_v55  ;;  %v1412_v19 = vshrl.u32 %v7737_v12, %v1403_v55  ;;  %v1415_v17 = vshrl.u32 %v7738_v5, %v1403_v55 }
 0x1aa   :  { %v1345_v6 = vadd.s32 536870912, %v1344_v33  ;;  %v1401_v39 = vshrl.u32 %v1400_v63, 5  ;;  %v1417_v22 = vshll.u32 %v7738_v5, %v1402_v43  ;;  %v1418_v16 = vshrl.u32 %v7740_v26, %v1403_v55 }
 0x1ab   :  { %v1407_v25 = vor.u32 %v1406_v53, %v1405_v18  ;;  %v1410_v15 = vor.u32 %v1409_v52, %v1408_v61  ;;  %v1413_v13 = vor.u32 %v1412_v19, %v1411_v30  ;;  %v1416_v8 = vor.u32 %v1415_v17, %v1414_v29 }
 0x1ac   :  { %vm974_vm11 = vcmp.lt.s32.totalorder %v4794_v45, 0  ;;  %v1132_v28 = vadd.s32 %v5065_v59, %v5071_v47  ;;  %v5268_v10 = vshrl.u32 %v1345_v6, 30  ;;  %v1396_v31 = vor.u32 8388608, %v1395_v46 }
 0x1ad   :  { %v1495_v36 = vand.u32 2139095040, %v5261_v23  ;;  %v1055_v0 = vmul.f32 %v1054_v62, %v1052_v40  ;;  %v1148_v63 = vsub.s32 32, %v5242_v60  ;;  %v3867_v18 = vadd.s32 4294967294, %v1248_v56 }
 0x1ae   :  { %v1419_v53 = vor.u32 %v1418_v16, %v1417_v22  ;;  %v1153_v61 = vadd.s32 127, %v1152_v21  ;;  %vm1420_vm3 = vcmp.lt.s32.totalorder %v1401_v39, 1  ;;  %vm1422_vm1 = vcmp.lt.s32.totalorder %v1401_v39, 3 }
 0x1af   :  { %vm1423_vm4 = vcmp.lt.s32.totalorder %v1401_v39, 4  ;;  %v5272_v43 = vpop.eup %4148  ;;  %v1347_v52 = vshll.u32 %v5268_v10, 30  ;;  %v1428_v59 = vsel %vm1420_vm3, %v1407_v25, %v1410_v15  ;;  %v1432_v46 = vsel %vm1420_vm3, %v1410_v15, %v1413_v13 }
 0x1b0   :  { %7762 = vst [vmem:[#allocation34_spill] sm:$0xff] %v5272_v43  ;;  %v1429_v47 = vsel %vm1423_vm4, %v1416_v8, 920167782  ;;  %v5277_v30 = vpop.eup %4150  ;;  %v7764_v62 = vand.u32 2147483647, %v4794_v45  ;;  %v1436_v19 = vshll.u32 %v1396_v31, 8  ;;  %v1404_v16 = vshrl.u32 %v7744_v58, %v1403_v55 }
 0x1b1   :  { %7763 = vst [vmem:[#allocation35_spill] sm:$0xff] %v5277_v30  ;;  %v1430_v21 = vsel %vm1422_vm1, %v1413_v13, %v1429_v47  ;;  %v1433_v56 = vsel %vm1423_vm4, %v1419_v53, 1326507024  ;;  %v1496_v29 = vshrl.u32 %v1495_v36, 23  ;;  %vm3868_vm10 = vcmp.lt.s32.totalorder %v3867_v18, 0 }
 0x1b2   :  { %vm5281_vm14 = vcmp.le.f32.partialorder %v7764_v62, 0.7853982  ;;  %vm1421_vm12 = vcmp.lt.s32.totalorder %v1401_v39, 2  ;;  %v1425_v17 = vsel %vm1423_vm4, %v1413_v13, 2102212464  ;;  %v1434_v6 = vsel %vm1422_vm1, %v1416_v8, %v1433_v56 }
 0x1b3   :  { %v1154_v22 = vshll.u32 %v1153_v61, 23  ;;  %v1431_v50 = vsel %vm1421_vm12, %v1428_v59, %v1430_v21  ;;  %v1435_v62 = vsel %vm1421_vm12, %v1432_v46, %v1434_v6  ;;  %v1150_v42 = vshrl.u32 %v1132_v28, %v1148_v63 }
 0x1b4   :  { %v5290_v3 = vsub.s32 %v1344_v33, %v1347_v52  ;;  %v5292_v48 = vmul.u32.u64.low %v1436_v19, %v1435_v62  ;;  %v5293_v47 = vmul.u32.u64.high %v1436_v19, %v1435_v62, %v5292_v48  ;;  %v5295_v31 = vsel %vm3868_vm10, 0, %v3867_v18 }
 0x1b5   :  { %v1424_v36 = vsel %vm1420_vm3, %v1404_v16, %v1407_v25  ;;  %v1426_v13 = vsel %vm1422_vm1, %v1410_v15, %v1425_v17  ;;  %v3877_v8 = vadd.s32 4294967169, %v1496_v29  ;;  %v7767_v55 = vxor.u32 2147483648, %v5204_v4  ;;  %v5332_v17 = vpop.f32.mrf.mxu0 }
 0x1b6   :  { %v7768_v33 = vsub.s32 4, %v5016_v41  ;;  %v5309_v48 = vmul.u32.u64.low %v1436_v19, %v1431_v50  ;;  %v5310_v63 = vmul.u32.u64.high %v1436_v19, %v1431_v50, %v5309_v48  ;;  %v1056_v25 = vxor.u32 2147483648, %v1055_v0  ;;  %7770 = vst [vmem:[#allocation37_spill] sm:$0xff] %v5332_v17 }
 0x1b7   :  { %v953_v53 = vsel %vm870_vm13, %v7767_v55, %v5204_v4  ;;  %v1149_v15 = vshll.u32 %v5134_v57, %v5242_v60  ;;  %v1155_v18 = vor.u32 4788187, %v1154_v22  ;;  %v1502_v61 = vadd.s32 1, %v3877_v8 }
 0x1b8   :  { %v1059_v28 = vsel %vm974_vm11, %v7768_v33, %v5016_v41  ;;  %v5316_v52 = vand.u32 3, %v5240_v37  ;;  %v1256_v4 = vsub.s32 4294967266, %v5295_v31  ;;  %v1350_v59 = vsub.s32 0, %v5290_v3 }
 0x1b9   :  { %v1427_v46 = vsel %vm1421_vm12, %v1424_v36, %v1426_v13  ;;  %v956_v41 = vsel %vm5164_vm5, %v4745_v54, %v953_v53  ;;  %v1151_v50 = vor.u32 %v1150_v42, %v1149_v15  ;;  %vm1445_vm13 = vc.u32 %v5293_v47, %v5309_v48 }
 0x1ba   :  { %7769 = vst [vmem:[#allocation36_spill] sm:$0xff] %v5316_v52  ;;  %vm1503_vm6 = vcmp.gt.s32.totalorder %v1502_v61, 0  ;;  %v1061_v57 = vsel %vm5281_vm14, 0, %v1059_v28  ;;  %v1446_v37 = vadd.s32 1, %v5310_v63  ;;  %v7605_v60 = vand.u32 2147483647, %v5261_v23 }
 0x1bb   :  { %v1504_v21 = vsel %vm1503_vm6, %v1502_v61, 0  ;;  %v1057_v39 = vsel %vm974_vm11, %v1056_v25, %v1055_v0  ;;  %v1156_v56 = vand.u32 2147483647, %v1155_v18  ;;  %v1443_v29 = vmul.u32 %v1436_v19, %v1427_v46 }
 0x1bc   :  { %v1506_v20 = vand.u32 31, %v1504_v21  ;;  %4152 = vcosq.f32 %v956_v41  ;;  %v1257_v42 = vadd.s32 127, %v1256_v4  ;;  %v3870_v6 = vmin.u32 %v1350_v59, %v5290_v3 }
 0x1bd   :  { %v1447_v22 = vsel %vm1445_vm13, %v1446_v37, %v5310_v63  ;;  %4154 = vsinq.f32 %v956_v41  ;;  %v5336_v16 = vadd.s32 3, %v1061_v57  ;;  %v1158_v62 = vcvt.s32.f32 %v1151_v50 }
 0x1be   :  { %v1448_v36 = vadd.s32 %v1447_v22, %v1443_v29  ;;  %v5341_v0 = vsel %vm5281_vm14, %v4794_v45, %v1057_v39  ;;  %v1499_v19 = vand.u32 8388607, %v7605_v60  ;;  %v1507_v13 = vsub.s32 32, %v1506_v20 }
 0x1bf   :  { %v1599_v8 = vand.u32 2139095040, %v5332_v17  ;;  %v5346_v55 = vmul.f32 %v1158_v62, %v1156_v56  ;;  %v1236_v53 = vadd.s32 %v5130_v34, %v5137_v24  ;;  %v1252_v33 = vsub.s32 32, %v5295_v31 }
 0x1c0   :  { %v1449_v28 = vadd.s32 536870912, %v1448_v36  ;;  %v1258_v63 = vshll.u32 %v1257_v42, 23  ;;  %v1352_v25 = vclz %v3870_v6  ;;  %v1510_v40 = vshrl.u32 %v7747_v49, %v1507_v13 }
 0x1c1   :  { %v1513_v15 = vshrl.u32 %v7748_v11, %v1507_v13  ;;  %v1509_v61 = vshll.u32 %v7744_v58, %v1506_v20  ;;  %v1516_v4 = vshrl.u32 %v7737_v12, %v1507_v13  ;;  %v1519_v59 = vshrl.u32 %v7738_v5, %v1507_v13 }
 0x1c2   :  { %v5353_v18 = vshrl.u32 %v1449_v28, 30  ;;  %v1500_v46 = vor.u32 8388608, %v1499_v19  ;;  %v1512_v34 = vshll.u32 %v7747_v49, %v1506_v20  ;;  %v1518_v24 = vshll.u32 %v7737_v12, %v1506_v20 }
 0x1c3   :  { %v1600_v41 = vshrl.u32 %v1599_v8, 23  ;;  %v1505_v57 = vshrl.u32 %v1504_v21, 5  ;;  %v1511_v37 = vor.u32 %v1510_v40, %v1509_v61  ;;  %v1515_v39 = vshll.u32 %v7748_v11, %v1506_v20 }
 0x1c4   :  { %v1451_v50 = vshll.u32 %v5353_v18, 30  ;;  %v1514_v56 = vor.u32 %v1513_v15, %v1512_v34  ;;  %v1520_v29 = vor.u32 %v1519_v59, %v1518_v24  ;;  %v1521_v42 = vshll.u32 %v7738_v5, %v1506_v20 }
 0x1c5   :  { %v1522_v6 = vshrl.u32 %v7740_v26, %v1507_v13  ;;  %vm1078_vm5 = vcmp.lt.s32.totalorder %v4917_v2, 0  ;;  %v1160_v22 = vxor.u32 2147483648, %v5346_v55  ;;  %v1162_v62 = vsub.s32 4, %v5108_v9 }
 0x1c6   :  { %v1266_v19 = vsub.s32 4, %v5185_v38  ;;  %v1517_v8 = vor.u32 %v1516_v4, %v1515_v39  ;;  %v1253_v21 = vshll.u32 %v5209_v44, %v5295_v31  ;;  %v1254_v28 = vshrl.u32 %v1236_v53, %v1252_v33 }
 0x1c7   :  { %v1523_v40 = vor.u32 %v1522_v6, %v1521_v42  ;;  %v3881_v15 = vadd.s32 4294967169, %v1600_v41  ;;  %v1259_v61 = vor.u32 4788187, %v1258_v63  ;;  %v5370_v59 = vsub.s32 %v1448_v36, %v1451_v50 }
 0x1c8   :  { %vm1524_vm7 = vcmp.lt.s32.totalorder %v1505_v57, 1  ;;  %vm1527_vm8 = vcmp.lt.s32.totalorder %v1505_v57, 4  ;;  %v7771_v20 = vand.u32 2147483647, %v4917_v2  ;;  %vm1182_vm15 = vcmp.lt.s32.totalorder %v4990_v7, 0 }
 0x1c9   :  { %v3871_v4 = vadd.s32 4294967294, %v1352_v25  ;;  %v1532_v24 = vsel %vm1524_vm7, %v1511_v37, %v1514_v56  ;;  %v1533_v44 = vsel %vm1527_vm8, %v1520_v29, 920167782  ;;  %v1540_v31 = vshll.u32 %v1500_v46, 8  ;;  %v5380_v53 = vpop.eup %4152 }
 0x1ca   :  { %vm5374_vm9 = vcmp.le.f32.partialorder %v7771_v20, 0.7853982  ;;  %7774 = vst [vmem:[#allocation38_spill] sm:$0xff] %v5380_v53  ;;  %v1508_v36 = vshrl.u32 %v7744_v58, %v1507_v13  ;;  %vm1526_vm0 = vcmp.lt.s32.totalorder %v1505_v57, 3  ;;  %v1529_v33 = vsel %vm1527_vm8, %v1517_v8, 2102212464  ;;  %v5384_v41 = vpop.eup %4154 }
 0x1cb   :  { %v1536_v63 = vsel %vm1524_vm7, %v1514_v56, %v1517_v8  ;;  %7775 = vst [vmem:[#allocation39_spill] sm:$0xff] %v5384_v41  ;;  %vm1525_vm2 = vcmp.lt.s32.totalorder %v1505_v57, 2  ;;  %v1534_v50 = vsel %vm1526_vm0, %v1517_v8, %v1533_v44  ;;  %v1537_v39 = vsel %vm1527_vm8, %v1523_v40, 1326507024 }
 0x1cc   :  { %v1606_v42 = vadd.s32 1, %v3881_v15  ;;  %v1454_v25 = vsub.s32 0, %v5370_v59  ;;  %v1528_v6 = vsel %vm1524_vm7, %v1508_v36, %v1511_v37  ;;  %v1535_v46 = vsel %vm1525_vm2, %v1532_v24, %v1534_v50 }
 0x1cd   :  { %v1538_v20 = vsel %vm1526_vm0, %v1520_v29, %v1537_v39  ;;  %v1530_v60 = vsel %vm1526_vm0, %v1514_v56, %v1529_v33  ;;  %v5390_v53 = vmul.u32.u64.low %v1540_v31, %v1535_v46  ;;  %v5391_v52 = vmul.u32.u64.high %v1540_v31, %v1535_v46, %v5390_v53 }
 0x1ce   :  { %v1539_v13 = vsel %vm1525_vm2, %v1536_v63, %v1538_v20  ;;  %v1255_v45 = vor.u32 %v1254_v28, %v1253_v21  ;;  %vm3872_vm11 = vcmp.lt.s32.totalorder %v3871_v4, 0  ;;  %4156 = vcosq.f32 %v5341_v0 }
 0x1cf   :  { %v5394_v41 = vmul.u32.u64.low %v1540_v31, %v1539_v13  ;;  %v5395_v8 = vmul.u32.u64.high %v1540_v31, %v1539_v13, %v5394_v41  ;;  %v5399_v40 = vand.u32 3, %v5336_v16  ;;  %v5404_v37 = vsel %vm1078_vm5, %v1162_v62, %v5108_v9 }
 0x1d0   :  { %vm1607_vm3 = vcmp.gt.s32.totalorder %v1606_v42, 0  ;;  %v1260_v56 = vand.u32 2147483647, %v1259_v61  ;;  %v1531_v29 = vsel %vm1525_vm2, %v1528_v6, %v1530_v60  ;;  %v7611_v21 = vand.u32 2147483647, %v5332_v17 }
 0x1d1   :  { %7776 = vst [vmem:[#allocation40_spill] sm:$0xff] %v5399_v40  ;;  %v1608_v28 = vsel %vm1607_vm3, %v1606_v42, 0  ;;  %v5408_v15 = vsel %vm3872_vm11, 0, %v3871_v4  ;;  %v3874_v24 = vmin.u32 %v1454_v25, %v5370_v59  ;;  %v1550_v44 = vadd.s32 1, %v5391_v52 }
 0x1d2   :  { %v1610_v16 = vand.u32 31, %v1608_v28  ;;  %v5415_v36 = vsel %vm1078_vm5, %v1160_v22, %v5346_v55  ;;  %v1262_v60 = vcvt.s32.f32 %v1255_v45  ;;  %v5423_v57 = vsel %vm1182_vm15, %v1266_v19, %v5185_v38 }
 0x1d3   :  { %v1340_v62 = vadd.s32 %v5230_v27, %v5228_v35  ;;  %v1547_v61 = vmul.u32 %v1540_v31, %v1531_v29  ;;  %vm1549_vm1 = vc.u32 %v5395_v8, %v5390_v53  ;;  %v1360_v22 = vsub.s32 4294967266, %v5408_v15 }
 0x1d4   :  { %v1611_v4 = vsub.s32 32, %v1610_v16  ;;  %v5429_v55 = vmul.f32 %v1262_v60, %v1260_v56  ;;  %v1551_v33 = vsel %vm1549_vm1, %v1550_v44, %v5391_v52  ;;  %v1603_v45 = vand.u32 8388607, %v7611_v21 }
 0x1d5   :  { %v1456_v63 = vclz %v3874_v24  ;;  %v1552_v38 = vadd.s32 %v1551_v33, %v1547_v61  ;;  %v1613_v27 = vshll.u32 %v7744_v58, %v1610_v16  ;;  %v1616_v31 = vshll.u32 %v7747_v49, %v1610_v16 }
 0x1d6   :  { %v1614_v19 = vshrl.u32 %v7747_v49, %v1611_v4  ;;  %v1617_v35 = vshrl.u32 %v7748_v11, %v1611_v4  ;;  %v1619_v41 = vshll.u32 %v7748_v11, %v1610_v16  ;;  %v1620_v50 = vshrl.u32 %v7737_v12, %v1611_v4 }
 0x1d7   :  { %v1553_v39 = vadd.s32 536870912, %v1552_v38  ;;  %v1609_v42 = vshrl.u32 %v1608_v28, 5  ;;  %v1622_v52 = vshll.u32 %v7737_v12, %v1610_v16  ;;  %v1623_v25 = vshrl.u32 %v7738_v5, %v1611_v4 }
 0x1d8   :  { %v1370_v6 = vsub.s32 4, %v5268_v10  ;;  %v1615_v46 = vor.u32 %v1614_v19, %v1613_v27  ;;  %v1618_v20 = vor.u32 %v1617_v35, %v1616_v31  ;;  %v1621_v13 = vor.u32 %v1620_v50, %v1619_v41 }
 0x1d9   :  { %v5444_v56 = vshrl.u32 %v1553_v39, 30  ;;  %v1624_v29 = vor.u32 %v1623_v25, %v1622_v52  ;;  %v1625_v24 = vshll.u32 %v7738_v5, %v1610_v16  ;;  %v1626_v44 = vshrl.u32 %v7740_v26, %v1611_v4 }
 0x1da   :  { %v1356_v60 = vsub.s32 32, %v5408_v15  ;;  %v1361_v61 = vadd.s32 127, %v1360_v22  ;;  %v3875_v28 = vadd.s32 4294967294, %v1456_v63  ;;  %v1604_v33 = vor.u32 8388608, %v1603_v45 }
 0x1db   :  { %v7777_v21 = vand.u32 2147483647, %v4990_v7  ;;  %v1555_v19 = vshll.u32 %v5444_v56, 30  ;;  %v1627_v35 = vor.u32 %v1626_v44, %v1625_v24  ;;  %vm1628_vm14 = vcmp.lt.s32.totalorder %v1609_v42, 1  ;;  %v5456_v27 = vpop.eup %4156 }
 0x1dc   :  { %vm1631_vm10 = vcmp.lt.s32.totalorder %v1609_v42, 4  ;;  %7780 = vst [vmem:[#allocation41_spill] sm:$0xff] %v5456_v27  ;;  %vm1286_vm12 = vcmp.lt.s32.totalorder %v5076_v14, 0  ;;  %v1612_v16 = vshrl.u32 %v7744_v58, %v1611_v4  ;;  %vm1630_vm13 = vcmp.lt.s32.totalorder %v1609_v42, 3 }
 0x1dd   :  { %vm5451_vm4 = vcmp.le.f32.partialorder %v7777_v21, 0.7853982  ;;  %v1636_v22 = vsel %vm1628_vm14, %v1615_v46, %v1618_v20  ;;  %v1637_v45 = vsel %vm1631_vm10, %v1624_v29, 920167782  ;;  %v5462_v21 = vpop.f32.mrf.mxu0  ;;  %v5464_v63 = vsub.s32 %v1552_v38, %v1555_v19 }
 0x1de   :  { %7781 = vst [vmem:[#allocation42_spill] sm:$0xff] %v5462_v21  ;;  %vm1629_vm6 = vcmp.lt.s32.totalorder %v1609_v42, 2  ;;  %v1633_v31 = vsel %vm1631_vm10, %v1621_v13, 2102212464  ;;  %v1638_v41 = vsel %vm1630_vm13, %v1621_v13, %v1637_v45  ;;  %v1358_v50 = vshrl.u32 %v1340_v62, %v1356_v60 }
 0x1df   :  { %v1362_v39 = vshll.u32 %v1361_v61, 23  ;;  %v1639_v52 = vsel %vm1629_vm6, %v1636_v22, %v1638_v41  ;;  %v1644_v25 = vshll.u32 %v1604_v33, 8  ;;  %v1632_v4 = vsel %vm1628_vm14, %v1612_v16, %v1615_v46 }
 0x1e0   :  { %v1640_v24 = vsel %vm1628_vm14, %v1618_v20, %v1621_v13  ;;  %v1641_v44 = vsel %vm1631_vm10, %v1627_v35, 1326507024  ;;  %v1703_v27 = vand.u32 2139095040, %v5462_v21  ;;  %v7782_v38 = vand.u32 2147483647, %v5076_v14 }
 0x1e1   :  { %v1634_v62 = vsel %vm1630_vm13, %v1618_v20, %v1633_v31  ;;  %v1642_v60 = vsel %vm1630_vm13, %v1624_v29, %v1641_v44  ;;  %v5481_v61 = vmul.u32.u64.low %v1644_v25, %v1639_v52  ;;  %v5482_v33 = vmul.u32.u64.high %v1644_v25, %v1639_v52, %v5481_v61 }
 0x1e2   :  { %vm5475_vm5 = vcmp.le.f32.partialorder %v7782_v38, 0.7853982  ;;  %v1264_v46 = vxor.u32 2147483648, %v5429_v55  ;;  %vm3876_vm7 = vcmp.lt.s32.totalorder %v3875_v28, 0  ;;  %v1558_v13 = vsub.s32 0, %v5464_v63 }
 0x1e3   :  { %v1643_v35 = vsel %vm1629_vm6, %v1640_v24, %v1642_v60  ;;  %v1357_v16 = vshll.u32 %v5290_v3, %v5408_v15  ;;  %v1363_v22 = vor.u32 4788187, %v1362_v39  ;;  %4158 = vsinq.f32 %v5341_v0 }
 0x1e4   :  { %v5490_v45 = vmul.u32.u64.low %v1644_v25, %v1643_v35  ;;  %v5491_v41 = vmul.u32.u64.high %v1644_v25, %v1643_v35, %v5490_v45  ;;  %v7785_v20 = vsel %vm5374_vm9, 0, %v5404_v37  ;;  %v1635_v31 = vsel %vm1629_vm6, %v1632_v4, %v1634_v62 }
 0x1e5   :  { %v1169_v29 = vadd.s32 3, %v7785_v20  ;;  %v1704_v52 = vshrl.u32 %v1703_v27, 23  ;;  %v1269_v24 = vsel %vm5451_vm4, 0, %v5423_v57  ;;  %v1359_v44 = vor.u32 %v1358_v50, %v1357_v16 }
 0x1e6   :  { %v5502_v3 = vsel %vm3876_vm7, 0, %v3875_v28  ;;  %v1654_v15 = vadd.s32 1, %v5482_v33  ;;  %v1164_v0 = vsel %vm5374_vm9, %v4917_v2, %v5415_v36  ;;  %v1371_v37 = vsel %vm1286_vm12, %v1370_v6, %v5268_v10  ;;  %v5522_v10 = vpop.f32.mrf.mxu0 }
 0x1e7   :  { %v3878_v42 = vmin.u32 %v1558_v13, %v5464_v63  ;;  %v3885_v27 = vadd.s32 4294967169, %v1704_v52  ;;  %v1265_v57 = vsel %vm1182_vm15, %v1264_v46, %v5429_v55  ;;  %v1364_v28 = vand.u32 2147483647, %v1363_v22  ;;  %7787 = vst [vmem:[#allocation44_spill] sm:$0xff] %v5522_v10 }
 0x1e8   :  { %v1651_v50 = vmul.u32 %v1644_v25, %v1635_v31  ;;  %vm1653_vm8 = vc.u32 %v5491_v41, %v5481_v61  ;;  %v5518_v39 = vand.u32 3, %v1169_v29  ;;  %v1464_v34 = vsub.s32 4294967266, %v5502_v3 }
 0x1e9   :  { %v1655_v36 = vsel %vm1653_vm8, %v1654_v15, %v5482_v33  ;;  %v1710_v4 = vadd.s32 1, %v3885_v27  ;;  %4160 = vcosq.f32 %v1164_v0  ;;  %v1273_v6 = vadd.s32 3, %v1269_v24 }
 0x1ea   :  { %7786 = vst [vmem:[#allocation43_spill] sm:$0xff] %v5518_v39  ;;  %v1366_v38 = vcvt.s32.f32 %v1359_v44  ;;  %v1656_v62 = vadd.s32 %v1655_v36, %v1651_v50  ;;  %v1268_v55 = vsel %vm5451_vm4, %v4990_v7, %v1265_v57  ;;  %v1373_v25 = vsel %vm5475_vm5, 0, %v1371_v37 }
 0x1eb   :  { %v1560_v60 = vclz %v3878_v42  ;;  %vm1711_vm9 = vcmp.gt.s32.totalorder %v1710_v4, 0  ;;  %v1807_v35 = vand.u32 2139095040, %v5522_v10  ;;  %4162 = vsinq.f32 %v1164_v0 }
 0x1ec   :  { %v5529_v46 = vmul.f32 %v1366_v38, %v1364_v28  ;;  %v1657_v13 = vadd.s32 536870912, %v1656_v62  ;;  %v1712_v33 = vsel %vm1711_vm9, %v1710_v4, 0  ;;  %v1465_v16 = vadd.s32 127, %v1464_v34 }
 0x1ed   :  { %v7613_v22 = vand.u32 2147483647, %v5462_v21  ;;  %v1714_v45 = vand.u32 31, %v1712_v33  ;;  %4164 = vcosq.f32 %v1268_v55  ;;  %v5533_v20 = vand.u32 3, %v1273_v6 }
 0x1ee   :  { %v5535_v9 = vadd.s32 3, %v1373_v25  ;;  %v5537_v29 = vshrl.u32 %v1657_v13, 30  ;;  %4166 = vsinq.f32 %v1268_v55  ;;  %v1444_v31 = vadd.s32 %v5309_v48, %v5293_v47 }
 0x1ef   :  { %7788 = vst [vmem:[#allocation45_spill] sm:$0xff] %v5533_v20  ;;  %v3879_v52 = vadd.s32 4294967294, %v1560_v60  ;;  %v1715_v24 = vsub.s32 32, %v1714_v45  ;;  %v1808_v37 = vshrl.u32 %v1807_v35, 23  ;;  %v1460_v42 = vsub.s32 32, %v5502_v3 }
 0x1f0   :  { %v1659_v0 = vshll.u32 %v5537_v29, 30  ;;  %v1466_v27 = vshll.u32 %v1465_v16, 23  ;;  %v1707_v57 = vand.u32 8388607, %v7613_v22  ;;  %v5548_v50 = vpop.eup %4158  ;;  %v1717_v47 = vshll.u32 %v7744_v58, %v1714_v45 }
 0x1f1   :  { %v1718_v28 = vshrl.u32 %v7747_v49, %v1715_v24  ;;  %7789 = vst [vmem:[#allocation46_spill] sm:$0xff] %v5548_v50  ;;  %v1720_v48 = vshll.u32 %v7747_v49, %v1714_v45  ;;  %v1721_v34 = vshrl.u32 %v7748_v11, %v1715_v24  ;;  %v1724_v36 = vshrl.u32 %v7737_v12, %v1715_v24 }
 0x1f2   :  { %v1461_v4 = vshll.u32 %v5370_v59, %v5502_v3  ;;  %vm3880_vm15 = vcmp.lt.s32.totalorder %v3879_v52, 0  ;;  %v5556_v6 = vsub.s32 %v1656_v62, %v1659_v0  ;;  %v1713_v38 = vshrl.u32 %v1712_v33, 5 }
 0x1f3   :  { %v1719_v55 = vor.u32 %v1718_v28, %v1717_v47  ;;  %v1722_v25 = vor.u32 %v1721_v34, %v1720_v48  ;;  %v1723_v60 = vshll.u32 %v7748_v11, %v1714_v45  ;;  %v3889_v13 = vadd.s32 4294967169, %v1808_v37 }
 0x1f4   :  { %vm1390_vm0 = vcmp.lt.s32.totalorder %v5180_v51, 0  ;;  %v1726_v35 = vshll.u32 %v7737_v12, %v1714_v45  ;;  %v1727_v16 = vshrl.u32 %v7738_v5, %v1715_v24  ;;  %v1729_v22 = vshll.u32 %v7738_v5, %v1714_v45 }
 0x1f5   :  { %v1730_v44 = vshrl.u32 %v7740_v26, %v1715_v24  ;;  %v1462_v59 = vshrl.u32 %v1444_v31, %v1460_v42  ;;  %v1467_v3 = vor.u32 4788187, %v1466_v27  ;;  %v1708_v62 = vor.u32 8388608, %v1707_v57 }
 0x1f6   :  { %v1725_v0 = vor.u32 %v1724_v36, %v1723_v60  ;;  %v5564_v33 = vpop.eup %4160  ;;  %v1662_v28 = vsub.s32 0, %v5556_v6  ;;  %v1728_v47 = vor.u32 %v1727_v16, %v1726_v35  ;;  %vm1732_vm2 = vcmp.lt.s32.totalorder %v1713_v38, 1 }
 0x1f7   :  { %7790 = vst [vmem:[#allocation47_spill] sm:$0xff] %v5564_v33  ;;  %v1731_v37 = vor.u32 %v1730_v44, %v1729_v22  ;;  %v7791_v48 = vand.u32 2147483647, %v5180_v51  ;;  %v5574_v45 = vsel %vm3880_vm15, 0, %v3879_v52  ;;  %vm1735_vm3 = vcmp.lt.s32.totalorder %v1713_v38, 4 }
 0x1f8   :  { %v1740_v31 = vsel %vm1732_vm2, %v1719_v55, %v1722_v25  ;;  %v1716_v27 = vshrl.u32 %v7744_v58, %v1715_v24  ;;  %vm1734_vm1 = vcmp.lt.s32.totalorder %v1713_v38, 3  ;;  %v1741_v57 = vsel %vm1735_vm3, %v1728_v47, 920167782  ;;  %v5579_v44 = vpop.eup %4162 }
 0x1f9   :  { %vm5569_vm11 = vcmp.le.f32.partialorder %v7791_v48, 0.7853982  ;;  %v1814_v22 = vadd.s32 1, %v3889_v13  ;;  %7794 = vst [vmem:[#allocation48_spill] sm:$0xff] %v5579_v44  ;;  %vm1733_vm4 = vcmp.lt.s32.totalorder %v1713_v38, 2  ;;  %v1742_v60 = vsel %vm1734_vm1, %v1725_v0, %v1741_v57 }
 0x1fa   :  { %v1737_v36 = vsel %vm1735_vm3, %v1725_v0, 2102212464  ;;  %v1744_v35 = vsel %vm1732_vm2, %v1722_v25, %v1725_v0  ;;  %v5583_v52 = vpop.eup %4164  ;;  %v3882_v16 = vmin.u32 %v1662_v28, %v5556_v6  ;;  %v1743_v48 = vsel %vm1733_vm4, %v1740_v31, %v1742_v60 }
 0x1fb   :  { %7795 = vst [vmem:[#allocation49_spill] sm:$0xff] %v5583_v52  ;;  %v1745_v42 = vsel %vm1735_vm3, %v1731_v37, 1326507024  ;;  %v1748_v15 = vshll.u32 %v1708_v62, 8  ;;  %v5587_v24 = vpop.eup %4166  ;;  %v1463_v40 = vor.u32 %v1462_v59, %v1461_v4  ;;  %v1568_v13 = vsub.s32 4294967266, %v5574_v45 }
 0x1fc   :  { %7796 = vst [vmem:[#allocation50_spill] sm:$0xff] %v5587_v24  ;;  %v1736_v54 = vsel %vm1732_vm2, %v1716_v27, %v1719_v55  ;;  %v1746_v50 = vsel %vm1734_vm1, %v1728_v47, %v1745_v42  ;;  %v1738_v57 = vsel %vm1734_vm1, %v1722_v25, %v1737_v36  ;;  %v1468_v28 = vand.u32 2147483647, %v1467_v3 }
 0x1fd   :  { %v1747_v0 = vsel %vm1733_vm4, %v1744_v35, %v1746_v50  ;;  %v5594_v43 = vmul.u32.u64.low %v1748_v15, %v1743_v48  ;;  %v5595_v32 = vmul.u32.u64.high %v1748_v15, %v1743_v48, %v5594_v43  ;;  %v7797_v62 = vsub.s32 4, %v5353_v18 }
 0x1fe   :  { %v7798_v55 = vand.u32 2147483647, %v5522_v10  ;;  %vm1815_vm14 = vcmp.gt.s32.totalorder %v1814_v22, 0  ;;  %v1664_v47 = vclz %v3882_v16  ;;  %v1470_v31 = vcvt.s32.f32 %v1463_v40 }
 0x1ff   :  { %v5603_v4 = vsel %vm1390_vm0, %v7797_v62, %v5353_v18  ;;  %v5607_v25 = vmul.u32.u64.low %v1748_v15, %v1747_v0  ;;  %v5608_v37 = vmul.u32.u64.high %v1748_v15, %v1747_v0, %v5607_v25  ;;  %v1816_v50 = vsel %vm1815_vm14, %v1814_v22, 0 }
 0x200   :  { %v1811_v59 = vand.u32 8388607, %v7798_v55  ;;  %vm1494_vm10 = vcmp.lt.s32.totalorder %v5261_v23, 0  ;;  %v1569_v3 = vadd.s32 127, %v1568_v13  ;;  %v1739_v42 = vsel %vm1733_vm4, %v1736_v54, %v1738_v57 }
 0x201   :  { %v1818_v27 = vand.u32 31, %v1816_v50  ;;  %v7799_v18 = vxor.u32 2147483648, %v5529_v46  ;;  %v1548_v40 = vadd.s32 %v5390_v53, %v5395_v8  ;;  %v1758_v22 = vadd.s32 1, %v5595_v32 }
 0x202   :  { %v5625_v35 = vmul.f32 %v1470_v31, %v1468_v28  ;;  %v1578_v54 = vsub.s32 4, %v5444_v56  ;;  %v1812_v38 = vor.u32 8388608, %v1811_v59  ;;  %v1564_v48 = vsub.s32 32, %v5574_v45 }
 0x203   :  { %v5617_v36 = vsel %vm1286_vm12, %v7799_v18, %v5529_v46  ;;  %v1819_v16 = vsub.s32 32, %v1818_v27  ;;  %v3883_v13 = vadd.s32 4294967294, %v1664_v47  ;;  %v1755_v46 = vmul.u32 %v1748_v15, %v1739_v42 }
 0x204   :  { %vm1757_vm12 = vc.u32 %v5608_v37, %v5594_v43  ;;  %v1570_v57 = vshll.u32 %v1569_v3, 23  ;;  %v1821_v53 = vshll.u32 %v7744_v58, %v1818_v27  ;;  %v1824_v8 = vshll.u32 %v7747_v49, %v1818_v27 }
 0x205   :  { %v1759_v0 = vsel %vm1757_vm12, %v1758_v22, %v5595_v32  ;;  %v1822_v62 = vshrl.u32 %v7747_v49, %v1819_v16  ;;  %v1825_v55 = vshrl.u32 %v7748_v11, %v1819_v16  ;;  %v1828_v59 = vshrl.u32 %v7737_v12, %v1819_v16 }
 0x206   :  { %v1760_v28 = vadd.s32 %v1759_v0, %v1755_v46  ;;  %v1817_v25 = vshrl.u32 %v1816_v50, 5  ;;  %v1827_v15 = vshll.u32 %v7748_v11, %v1818_v27  ;;  %v1830_v47 = vshll.u32 %v7737_v12, %v1818_v27 }
 0x207   :  { %v1831_v31 = vshrl.u32 %v7738_v5, %v1819_v16  ;;  %vm3884_vm13 = vcmp.lt.s32.totalorder %v3883_v13, 0  ;;  %v1823_v3 = vor.u32 %v1822_v62, %v1821_v53  ;;  %v1826_v42 = vor.u32 %v1825_v55, %v1824_v8 }
 0x208   :  { %v1761_v32 = vadd.s32 536870912, %v1760_v28  ;;  %v1829_v18 = vor.u32 %v1828_v59, %v1827_v15  ;;  %v1833_v46 = vshll.u32 %v7738_v5, %v1818_v27  ;;  %v1834_v0 = vshrl.u32 %v7740_v26, %v1819_v16 }
 0x209   :  { %v1832_v22 = vor.u32 %v1831_v31, %v1830_v47  ;;  %v1565_v60 = vshll.u32 %v5464_v63, %v5574_v45  ;;  %v5647_v50 = vsel %vm1494_vm10, %v1578_v54, %v5444_v56  ;;  %v1852_v1 = vshll.u32 %v1812_v38, 8  ;;  %v5662_v54 = vpop.f32.mrf.mxu0 }
 0x20a   :  { %v5649_v30 = vshrl.u32 %v1761_v32, 30  ;;  %v7800_v53 = vand.u32 2147483647, %v5261_v23  ;;  %v1566_v27 = vshrl.u32 %v1548_v40, %v1564_v48  ;;  %v1571_v62 = vor.u32 4788187, %v1570_v57  ;;  %7803 = vst [vmem:[#allocation51_spill] sm:$0xff] %v5662_v54 }
 0x20b   :  { %v1835_v55 = vor.u32 %v1834_v0, %v1833_v46  ;;  %vm1836_vm7 = vcmp.lt.s32.totalorder %v1817_v25, 1  ;;  %v5658_v63 = vsel %vm3884_vm13, 0, %v3883_v13  ;;  %vm1839_vm8 = vcmp.lt.s32.totalorder %v1817_v25, 4 }
 0x20c   :  { %vm5653_vm6 = vcmp.le.f32.partialorder %v7800_v53, 0.7853982  ;;  %v1763_v45 = vshll.u32 %v5649_v30, 30  ;;  %v1844_v56 = vsel %vm1836_vm7, %v1823_v3, %v1826_v42  ;;  %vm1598_vm9 = vcmp.lt.s32.totalorder %v5332_v17, 0 }
 0x20d   :  { %v1820_v38 = vshrl.u32 %v7744_v58, %v1819_v16  ;;  %vm1838_vm15 = vcmp.lt.s32.totalorder %v1817_v25, 3  ;;  %v1841_v59 = vsel %vm1839_vm8, %v1829_v18, 2102212464  ;;  %v1845_v40 = vsel %vm1839_vm8, %v1832_v22, 920167782 }
 0x20e   :  { %v5666_v48 = vsub.s32 %v1760_v28, %v1763_v45  ;;  %vm1837_vm2 = vcmp.lt.s32.totalorder %v1817_v25, 2  ;;  %v1846_v57 = vsel %vm1838_vm15, %v1829_v18, %v1845_v40  ;;  %v1848_v13 = vsel %vm1836_vm7, %v1826_v42, %v1829_v18 }
 0x20f   :  { %v1672_v15 = vsub.s32 4294967266, %v5658_v63  ;;  %v1847_v47 = vsel %vm1837_vm2, %v1844_v56, %v1846_v57  ;;  %v1849_v31 = vsel %vm1839_vm8, %v1835_v55, 1326507024  ;;  %v1911_v32 = vand.u32 2139095040, %v5662_v54 }
 0x210   :  { %v1766_v46 = vsub.s32 0, %v5666_v48  ;;  %v1840_v16 = vsel %vm1836_vm7, %v1820_v38, %v1823_v3  ;;  %v1842_v0 = vsel %vm1838_vm15, %v1826_v42, %v1841_v59  ;;  %v1850_v53 = vsel %vm1838_vm15, %v1832_v22, %v1849_v31 }
 0x211   :  { %v1567_v33 = vor.u32 %v1566_v27, %v1565_v60  ;;  %v1851_v28 = vsel %vm1837_vm2, %v1848_v13, %v1850_v53  ;;  %v5675_v45 = vmul.u32.u64.low %v1852_v1, %v1847_v47  ;;  %v5676_v40 = vmul.u32.u64.high %v1852_v1, %v1847_v47, %v5675_v45 }
 0x212   :  { %v1472_v18 = vxor.u32 2147483648, %v5625_v35  ;;  %v7804_v56 = vand.u32 2147483647, %v5332_v17  ;;  %v1682_v57 = vsub.s32 4, %v5537_v29  ;;  %v1572_v60 = vand.u32 2147483647, %v1571_v62 }
 0x213   :  { %v5687_v3 = vmul.u32.u64.low %v1852_v1, %v1851_v28  ;;  %v5688_v42 = vmul.u32.u64.high %v1852_v1, %v1851_v28, %v5687_v3  ;;  %v1668_v22 = vsub.s32 32, %v5658_v63  ;;  %v1843_v27 = vsel %vm1837_vm2, %v1840_v16, %v1842_v0 }
 0x214   :  { %vm5682_vm3 = vcmp.le.f32.partialorder %v7804_v56, 0.7853982  ;;  %v1912_v38 = vshrl.u32 %v1911_v32, 23  ;;  %v1372_v59 = vsel %vm5475_vm5, %v5076_v14, %v5617_v36  ;;  %v1581_v13 = vsel %vm5653_vm6, 0, %v5647_v50  ;;  %v5703_v32 = vpop.f32.mrf.mxu0 }
 0x215   :  { %v1673_v47 = vadd.s32 127, %v1672_v15  ;;  %v3886_v31 = vmin.u32 %v1766_v46, %v5666_v48  ;;  %v1574_v53 = vcvt.s32.f32 %v1567_v33  ;;  %v1652_v62 = vadd.s32 %v5481_v61, %v5491_v41  ;;  %7807 = vst [vmem:[#allocation52_spill] sm:$0xff] %v5703_v32 }
 0x216   :  { %v1862_v25 = vadd.s32 1, %v5676_v40  ;;  %v3893_v16 = vadd.s32 4294967169, %v1912_v38  ;;  %v1473_v19 = vsel %vm1390_vm0, %v1472_v18, %v5625_v35  ;;  %v1683_v36 = vsel %vm1598_vm9, %v1682_v57, %v5537_v29 }
 0x217   :  { %v1859_v50 = vmul.u32 %v1852_v1, %v1843_v27  ;;  %vm1861_vm5 = vc.u32 %v5688_v42, %v5675_v45  ;;  %v1575_v33 = vmul.f32 %v1574_v53, %v1572_v60  ;;  %v1670_v15 = vshrl.u32 %v1652_v62, %v1668_v22 }
 0x218   :  { %v1863_v61 = vsel %vm1861_vm5, %v1862_v25, %v5676_v40  ;;  %v1918_v41 = vadd.s32 1, %v3893_v16  ;;  %v1674_v46 = vshll.u32 %v1673_v47, 23  ;;  %v1768_v0 = vclz %v3886_v31 }
 0x219   :  { %v1864_v28 = vadd.s32 %v1863_v61, %v1859_v50  ;;  %v2015_v56 = vand.u32 2139095040, %v5703_v32  ;;  %4168 = vcosq.f32 %v1372_v59  ;;  %v7808_v35 = vsel %vm5569_vm11, 0, %v5603_v4 }
 0x21a   :  { %v1481_v29 = vadd.s32 3, %v7808_v35  ;;  %v1669_v1 = vshll.u32 %v5556_v6, %v5658_v63  ;;  %vm1919_vm0 = vcmp.gt.s32.totalorder %v1918_v41, 0  ;;  %v1476_v40 = vsel %vm5569_vm11, %v5180_v51, %v1473_v19 }
 0x21b   :  { %v1585_v18 = vadd.s32 3, %v1581_v13  ;;  %v1865_v57 = vadd.s32 536870912, %v1864_v28  ;;  %v7624_v3 = vand.u32 2147483647, %v5662_v54  ;;  %v1576_v60 = vxor.u32 2147483648, %v1575_v33 }
 0x21c   :  { %v1671_v22 = vor.u32 %v1670_v15, %v1669_v1  ;;  %v1685_v27 = vsel %vm5682_vm3, 0, %v1683_v36  ;;  %v1920_v38 = vsel %vm1919_vm0, %v1918_v41, 0  ;;  %v1675_v4 = vor.u32 4788187, %v1674_v46 }
 0x21d   :  { %v3887_v47 = vadd.s32 4294967294, %v1768_v0  ;;  %v5727_v31 = vshrl.u32 %v1865_v57, 30  ;;  %v2016_v6 = vshrl.u32 %v2015_v56, 23  ;;  %4170 = vsinq.f32 %v1372_v59 }
 0x21e   :  { %v5730_v63 = vand.u32 3, %v5535_v9  ;;  %v5732_v34 = vand.u32 3, %v1481_v29  ;;  %v1922_v13 = vand.u32 31, %v1920_v38  ;;  %4172 = vcosq.f32 %v1476_v40 }
 0x21f   :  { %v5734_v53 = vand.u32 3, %v1585_v18  ;;  %v1689_v62 = vadd.s32 3, %v1685_v27  ;;  %v1867_v25 = vshll.u32 %v5727_v31, 30  ;;  %v1577_v16 = vsel %vm1494_vm10, %v1576_v60, %v1575_v33 }
 0x220   :  { %7809 = vst [vmem:[#allocation53_spill] sm:$0xff] %v5730_v63  ;;  %7810 = vst [vmem:[#allocation54_spill] sm:$0xff] %v5732_v34  ;;  %v1678_v19 = vcvt.s32.f32 %v1671_v22  ;;  %v1915_v36 = vand.u32 8388607, %v7624_v3  ;;  %v1923_v59 = vsub.s32 32, %v1922_v13  ;;  %vm3888_vm11 = vcmp.lt.s32.totalorder %v3887_v47, 0 }
 0x221   :  { %7811 = vst [vmem:[#allocation55_spill] sm:$0xff] %v5734_v53  ;;  %v1676_v50 = vand.u32 2147483647, %v1675_v4  ;;  %v5741_v9 = vsub.s32 %v1864_v28, %v1867_v25  ;;  %v3897_v15 = vadd.s32 4294967169, %v2016_v6  ;;  %v1925_v61 = vshll.u32 %v7744_v58, %v1922_v13 }
 0x222   :  { %v1926_v41 = vshrl.u32 %v7747_v49, %v1923_v59  ;;  %v1928_v46 = vshll.u32 %v7747_v49, %v1922_v13  ;;  %v1929_v0 = vshrl.u32 %v7748_v11, %v1923_v59  ;;  %v1921_v56 = vshrl.u32 %v1920_v38, 5 }
 0x223   :  { %v1870_v33 = vsub.s32 0, %v5741_v9  ;;  %v1931_v35 = vshll.u32 %v7748_v11, %v1922_v13  ;;  %v1932_v29 = vshrl.u32 %v7737_v12, %v1923_v59  ;;  %v1934_v28 = vshll.u32 %v7737_v12, %v1922_v13 }
 0x224   :  { %v1927_v1 = vor.u32 %v1926_v41, %v1925_v61  ;;  %v1930_v18 = vor.u32 %v1929_v0, %v1928_v46  ;;  %v1935_v57 = vshrl.u32 %v7738_v5, %v1923_v59  ;;  %4174 = vsinq.f32 %v1476_v40  ;;  %v5761_v61 = vpop.f32.mrf.mxu0 }
 0x225   :  { %v5755_v60 = vsel %vm5653_vm6, %v5261_v23, %v1577_v16  ;;  %v1679_v22 = vmul.f32 %v1678_v19, %v1676_v50  ;;  %v5757_v27 = vand.u32 3, %v1689_v62  ;;  %v1933_v38 = vor.u32 %v1932_v29, %v1931_v35  ;;  %7813 = vst [vmem:[#allocation57_spill] sm:$0xff] %v5761_v61 }
 0x226   :  { %v1936_v4 = vor.u32 %v1935_v57, %v1934_v28  ;;  %v1937_v6 = vshll.u32 %v7738_v5, %v1922_v13  ;;  %v1938_v25 = vshrl.u32 %v7740_v26, %v1923_v59  ;;  %v5763_v41 = vpop.eup %4168  ;;  %v5766_v40 = vsel %vm3888_vm11, 0, %v3887_v47 }
 0x227   :  { %7812 = vst [vmem:[#allocation56_spill] sm:$0xff] %v5757_v27  ;;  %7814 = vst [vmem:[#allocation58_spill] sm:$0xff] %v5763_v41  ;;  %v1916_v46 = vor.u32 8388608, %v1915_v36  ;;  %vm1940_vm1 = vcmp.lt.s32.totalorder %v1921_v56, 1  ;;  %v2022_v8 = vadd.s32 1, %v3897_v15  ;;  %v3890_v16 = vmin.u32 %v1870_v33, %v5741_v9 }
 0x228   :  { %v1939_v62 = vor.u32 %v1938_v25, %v1937_v6  ;;  %vm1943_vm4 = vcmp.lt.s32.totalorder %v1921_v56, 4  ;;  %v1948_v19 = vsel %vm1940_vm1, %v1927_v1, %v1930_v18  ;;  %vm1942_vm14 = vcmp.lt.s32.totalorder %v1921_v56, 3 }
 0x229   :  { %v1949_v13 = vsel %vm1943_vm4, %v1936_v4, 920167782  ;;  %v2119_v0 = vand.u32 2139095040, %v5761_v61  ;;  %v1776_v35 = vsub.s32 4294967266, %v5766_v40  ;;  %vm1941_vm10 = vcmp.lt.s32.totalorder %v1921_v56, 2 }
 0x22a   :  { %v1945_v47 = vsel %vm1943_vm4, %v1933_v38, 2102212464  ;;  %v1950_v36 = vsel %vm1942_vm14, %v1933_v38, %v1949_v13  ;;  %v5776_v15 = vpop.eup %4170  ;;  %v1924_v33 = vshrl.u32 %v7744_v58, %v1923_v59  ;;  %v1952_v28 = vsel %vm1940_vm1, %v1930_v18, %v1933_v38 }
 0x22b   :  { %7815 = vst [vmem:[#allocation59_spill] sm:$0xff] %v5776_v15  ;;  %v1951_v29 = vsel %vm1941_vm10, %v1948_v19, %v1950_v36  ;;  %vm2023_vm12 = vcmp.gt.s32.totalorder %v2022_v8, 0  ;;  %v5781_v57 = vpop.eup %4172  ;;  %v1680_v6 = vxor.u32 2147483648, %v1679_v22  ;;  %v1872_v25 = vclz %v3890_v16 }
 0x22c   :  { %7816 = vst [vmem:[#allocation60_spill] sm:$0xff] %v5781_v57  ;;  %v1953_v3 = vsel %vm1943_vm4, %v1939_v62, 1326507024  ;;  %v1956_v50 = vshll.u32 %v1916_v46, 8  ;;  %v1944_v41 = vsel %vm1940_vm1, %v1924_v33, %v1927_v1  ;;  %v1946_v13 = vsel %vm1942_vm14, %v1930_v18, %v1945_v47 }
 0x22d   :  { %v1954_v63 = vsel %vm1942_vm14, %v1936_v4, %v1953_v3  ;;  %v7817_v59 = vand.u32 2147483647, %v5703_v32  ;;  %v2024_v39 = vsel %vm2023_vm12, %v2022_v8, 0  ;;  %v1777_v16 = vadd.s32 127, %v1776_v35 }
 0x22e   :  { %v1955_v19 = vsel %vm1941_vm10, %v1952_v28, %v1954_v63  ;;  %v5790_v38 = vmul.u32.u64.low %v1956_v50, %v1951_v29  ;;  %v5791_v36 = vmul.u32.u64.high %v1956_v50, %v1951_v29, %v5790_v38  ;;  %v2120_v46 = vshrl.u32 %v2119_v0, 23 }
 0x22f   :  { %v2019_v15 = vand.u32 8388607, %v7817_v59  ;;  %v5794_v44 = vmul.u32.u64.low %v1956_v50, %v1955_v19  ;;  %v5795_v62 = vmul.u32.u64.high %v1956_v50, %v1955_v19, %v5794_v44  ;;  %4176 = vcosq.f32 %v5755_v60 }
 0x230   :  { %v3891_v1 = vadd.s32 4294967294, %v1872_v25  ;;  %v1947_v3 = vsel %vm1941_vm10, %v1944_v41, %v1946_v13  ;;  %v2026_v18 = vand.u32 31, %v2024_v39  ;;  %v5801_v4 = vsel %vm1598_vm9, %v1680_v6, %v1679_v22 }
 0x231   :  { %v1756_v63 = vadd.s32 %v5594_v43, %v5608_v37  ;;  %v5807_v47 = vpop.eup %4174  ;;  %v1772_v44 = vsub.s32 32, %v5766_v40  ;;  %v1966_v0 = vadd.s32 1, %v5791_v36  ;;  %v2020_v56 = vor.u32 8388608, %v2019_v15 }
 0x232   :  { %7818 = vst [vmem:[#allocation61_spill] sm:$0xff] %v5807_v47  ;;  %v2027_v41 = vsub.s32 32, %v2026_v18  ;;  %v1778_v33 = vshll.u32 %v1777_v16, 23  ;;  %v1963_v29 = vmul.u32 %v1956_v50, %v1947_v3  ;;  %vm1965_vm13 = vc.u32 %v5795_v62, %v5790_v38 }
 0x233   :  { %v3901_v22 = vadd.s32 4294967169, %v2120_v46  ;;  %vm3892_vm6 = vcmp.lt.s32.totalorder %v3891_v1, 0  ;;  %v1967_v43 = vsel %vm1965_vm13, %v1966_v0, %v5791_v36  ;;  %v2029_v25 = vshll.u32 %v7744_v58, %v2026_v18 }
 0x234   :  { %v2030_v37 = vshrl.u32 %v7747_v49, %v2027_v41  ;;  %v2033_v28 = vshrl.u32 %v7748_v11, %v2027_v41  ;;  %v1968_v6 = vadd.s32 %v1967_v43, %v1963_v29  ;;  %v2032_v13 = vshll.u32 %v7747_v49, %v2026_v18 }
 0x235   :  { %v2036_v15 = vshrl.u32 %v7737_v12, %v2027_v41  ;;  %v2025_v59 = vshrl.u32 %v2024_v39, 5  ;;  %v2035_v50 = vshll.u32 %v7748_v11, %v2026_v18  ;;  %v2038_v19 = vshll.u32 %v7737_v12, %v2026_v18 }
 0x236   :  { %v2039_v16 = vshrl.u32 %v7738_v5, %v2027_v41  ;;  %v5822_v46 = vsel %vm3892_vm6, 0, %v3891_v1  ;;  %v1969_v36 = vadd.s32 536870912, %v1968_v6  ;;  %v2031_v3 = vor.u32 %v2030_v37, %v2029_v25 }
 0x237   :  { %v2034_v0 = vor.u32 %v2033_v28, %v2032_v13  ;;  %v2037_v8 = vor.u32 %v2036_v15, %v2035_v50  ;;  %v2041_v43 = vshll.u32 %v7738_v5, %v2026_v18  ;;  %v2042_v35 = vshrl.u32 %v7740_v26, %v2027_v41 }
 0x238   :  { %v2040_v29 = vor.u32 %v2039_v16, %v2038_v19  ;;  %v1773_v39 = vshll.u32 %v5666_v48, %v5766_v40  ;;  %v1774_v51 = vshrl.u32 %v1756_v63, %v1772_v44  ;;  %v5828_v2 = vshrl.u32 %v1969_v36, 30 }
 0x239   :  { %v2060_v57 = vshll.u32 %v2020_v56, 8  ;;  %vm1702_vm7 = vcmp.lt.s32.totalorder %v5462_v21, 0  ;;  %v1779_v1 = vor.u32 4788187, %v1778_v33  ;;  %v1880_v34 = vsub.s32 4294967266, %v5822_v46 }
 0x23a   :  { %v2043_v37 = vor.u32 %v2042_v35, %v2041_v43  ;;  %vm2044_vm8 = vcmp.lt.s32.totalorder %v2025_v59, 1  ;;  %v1971_v28 = vshll.u32 %v5828_v2, 30  ;;  %vm2047_vm9 = vcmp.lt.s32.totalorder %v2025_v59, 4 }
 0x23b   :  { %v2052_v18 = vsel %vm2044_vm8, %v2031_v3, %v2034_v0  ;;  %v2126_v25 = vadd.s32 1, %v3901_v22  ;;  %v2028_v13 = vshrl.u32 %v7744_v58, %v2027_v41  ;;  %vm2046_vm15 = vcmp.lt.s32.totalorder %v2025_v59, 3 }
 0x23c   :  { %v2049_v48 = vsel %vm2047_vm9, %v2037_v8, 2102212464  ;;  %v2053_v40 = vsel %vm2047_vm9, %v2040_v29, 920167782  ;;  %v5835_v63 = vpop.eup %4176  ;;  %v5837_v44 = vsub.s32 %v1968_v6, %v1971_v28  ;;  %vm2045_vm2 = vcmp.lt.s32.totalorder %v2025_v59, 2 }
 0x23d   :  { %7819 = vst [vmem:[#allocation62_spill] sm:$0xff] %v5835_v63  ;;  %v2054_v56 = vsel %vm2046_vm15, %v2037_v8, %v2053_v40  ;;  %v2056_v35 = vsel %vm2044_vm8, %v2034_v0, %v2037_v8  ;;  %v1876_v33 = vsub.s32 32, %v5822_v46  ;;  %v1881_v15 = vadd.s32 127, %v1880_v34 }
 0x23e   :  { %v2055_v50 = vsel %vm2045_vm2, %v2052_v18, %v2054_v56  ;;  %v2057_v19 = vsel %vm2047_vm9, %v2043_v37, 1326507024  ;;  %v1974_v22 = vsub.s32 0, %v5837_v44  ;;  %v2048_v41 = vsel %vm2044_vm8, %v2028_v13, %v2031_v3 }
 0x23f   :  { %v2050_v16 = vsel %vm2046_vm15, %v2034_v0, %v2049_v48  ;;  %v2058_v36 = vsel %vm2046_vm15, %v2040_v29, %v2057_v19  ;;  %v5845_v6 = vmul.u32.u64.low %v2060_v57, %v2055_v50  ;;  %v5846_v28 = vmul.u32.u64.high %v2060_v57, %v2055_v50, %v5845_v6 }
 0x240   :  { %v2059_v43 = vsel %vm2045_vm2, %v2056_v35, %v2058_v36  ;;  %vm2127_vm5 = vcmp.gt.s32.totalorder %v2126_v25, 0  ;;  %v5853_v34 = vsel %vm5682_vm3, %v5332_v17, %v5801_v4  ;;  %v1860_v8 = vadd.s32 %v5675_v45, %v5688_v42 }
 0x241   :  { %v5857_v37 = vmul.u32.u64.low %v2060_v57, %v2059_v43  ;;  %v5858_v3 = vmul.u32.u64.high %v2060_v57, %v2059_v43, %v5857_v37  ;;  %v1775_v0 = vor.u32 %v1774_v51, %v1773_v39  ;;  %v2051_v29 = vsel %vm2045_vm2, %v2048_v41, %v2050_v16 }
 0x242   :  { %v7820_v18 = vand.u32 2147483647, %v5761_v61  ;;  %v2128_v48 = vsel %vm2127_vm5, %v2126_v25, 0  ;;  %4178 = vsinq.f32 %v5755_v60  ;;  %v7821_v55 = vsub.s32 4, %v5649_v30 }
 0x243   :  { %v3894_v45 = vmin.u32 %v1974_v22, %v5837_v44  ;;  %v2130_v42 = vand.u32 31, %v2128_v48  ;;  %v7822_v51 = vand.u32 2147483647, %v5462_v21  ;;  %v1780_v39 = vand.u32 2147483647, %v1779_v1  ;;  %v5886_v22 = vpop.f32.mrf.mxu0 }
 0x244   :  { %v2123_v13 = vand.u32 8388607, %v7820_v18  ;;  %v5869_v4 = vsel %vm1702_vm7, %v7821_v55, %v5649_v30  ;;  %vm1806_vm0 = vcmp.lt.s32.totalorder %v5522_v10, 0  ;;  %v1878_v60 = vshrl.u32 %v1860_v8, %v1876_v33  ;;  %7825 = vst [vmem:[#allocation63_spill] sm:$0xff] %v5886_v22 }
 0x245   :  { %vm5874_vm3 = vcmp.le.f32.partialorder %v7822_v51, 0.7853982  ;;  %v1882_v25 = vshll.u32 %v1881_v15, 23  ;;  %v2070_v40 = vadd.s32 1, %v5846_v28  ;;  %4180 = vcosq.f32 %v5853_v34 }
 0x246   :  { %v2067_v30 = vmul.u32 %v2060_v57, %v2051_v29  ;;  %vm2069_vm11 = vc.u32 %v5858_v3, %v5845_v6  ;;  %v2131_v56 = vsub.s32 32, %v2130_v42  ;;  %v1782_v35 = vcvt.s32.f32 %v1775_v0 }
 0x247   :  { %v1877_v50 = vshll.u32 %v5741_v9, %v5822_v46  ;;  %v2071_v19 = vsel %vm2069_vm11, %v2070_v40, %v5846_v28  ;;  %v2124_v1 = vor.u32 8388608, %v2123_v13  ;;  %v1890_v33 = vsub.s32 4, %v5727_v31 }
 0x248   :  { %v1976_v15 = vclz %v3894_v45  ;;  %v2072_v41 = vadd.s32 %v2071_v19, %v2067_v30  ;;  %v2134_v16 = vshrl.u32 %v7747_v49, %v2131_v56  ;;  %v5890_v57 = vmul.f32 %v1782_v35, %v1780_v39 }
 0x249   :  { %v1879_v36 = vor.u32 %v1878_v60, %v1877_v50  ;;  %v1883_v43 = vor.u32 4788187, %v1882_v25  ;;  %v2137_v8 = vshrl.u32 %v7748_v11, %v2131_v56  ;;  %v2133_v9 = vshll.u32 %v7744_v58, %v2130_v42 }
 0x24a   :  { %v2073_v37 = vadd.s32 536870912, %v2072_v41  ;;  %v2140_v46 = vshrl.u32 %v7737_v12, %v2131_v56  ;;  %v2223_v28 = vand.u32 2139095040, %v5886_v22  ;;  %v2129_v0 = vshrl.u32 %v2128_v48, 5 }
 0x24b   :  { %v2136_v29 = vshll.u32 %v7747_v49, %v2130_v42  ;;  %v2142_v18 = vshll.u32 %v7737_v12, %v2130_v42  ;;  %v2143_v13 = vshrl.u32 %v7738_v5, %v2131_v56  ;;  %v3895_v55 = vadd.s32 4294967294, %v1976_v15 }
 0x24c   :  { %v5899_v45 = vshrl.u32 %v2073_v37, 30  ;;  %v2135_v51 = vor.u32 %v2134_v16, %v2133_v9  ;;  %v2139_v39 = vshll.u32 %v7748_v11, %v2130_v42  ;;  %v2145_v40 = vshll.u32 %v7738_v5, %v2130_v42 }
 0x24d   :  { %v2138_v60 = vor.u32 %v2137_v8, %v2136_v29  ;;  %v2144_v25 = vor.u32 %v2143_v13, %v2142_v18  ;;  %v2146_v30 = vshrl.u32 %v7740_v26, %v2131_v56  ;;  %v1789_v48 = vsel %vm5874_vm3, 0, %v5869_v4 }
 0x24e   :  { %v7826_v35 = vand.u32 2147483647, %v5522_v10  ;;  %v1891_v19 = vsel %vm1806_vm0, %v1890_v33, %v5727_v31  ;;  %v2075_v15 = vshll.u32 %v5899_v45, 30  ;;  %v2141_v16 = vor.u32 %v2140_v46, %v2139_v39 }
 0x24f   :  { %v1784_v42 = vxor.u32 2147483648, %v5890_v57  ;;  %v1886_v8 = vcvt.s32.f32 %v1879_v36  ;;  %v2147_v37 = vor.u32 %v2146_v30, %v2145_v40  ;;  %v2164_v9 = vshll.u32 %v2124_v1, 8  ;;  %v5920_v18 = vpop.eup %4178 }
 0x250   :  { %vm5909_vm1 = vcmp.le.f32.partialorder %v7826_v35, 0.7853982  ;;  %v1884_v29 = vand.u32 2147483647, %v1883_v43  ;;  %v5918_v4 = vsub.s32 %v2072_v41, %v2075_v15  ;;  %vm2148_vm4 = vcmp.lt.s32.totalorder %v2129_v0, 1  ;;  %7829 = vst [vmem:[#allocation64_spill] sm:$0xff] %v5920_v18 }
 0x251   :  { %vm2151_vm14 = vcmp.lt.s32.totalorder %v2129_v0, 4  ;;  %vm3896_vm10 = vcmp.lt.s32.totalorder %v3895_v55, 0  ;;  %v2156_v13 = vsel %vm2148_vm4, %v2135_v51, %v2138_v60  ;;  %v2224_v31 = vshrl.u32 %v2223_v28, 23 }
 0x252   :  { %v2157_v35 = vsel %vm2151_vm14, %v2144_v25, 920167782  ;;  %v2078_v33 = vsub.s32 0, %v5918_v4  ;;  %v2132_v46 = vshrl.u32 %v7744_v58, %v2131_v56  ;;  %vm2150_vm12 = vcmp.lt.s32.totalorder %v2129_v0, 3  ;;  %v5925_v39 = vpop.eup %4180 }
 0x253   :  { %v2153_v36 = vsel %vm2151_vm14, %v2141_v16, 2102212464  ;;  %7830 = vst [vmem:[#allocation65_spill] sm:$0xff] %v5925_v39  ;;  %vm1910_vm13 = vcmp.lt.s32.totalorder %v5662_v54, 0  ;;  %vm2149_vm6 = vcmp.lt.s32.totalorder %v2129_v0, 2  ;;  %v2158_v1 = vsel %vm2150_vm12, %v2141_v16, %v2157_v35 }
 0x254   :  { %v2160_v41 = vsel %vm2148_vm4, %v2138_v60, %v2141_v16  ;;  %v2161_v43 = vsel %vm2151_vm14, %v2147_v37, 1326507024  ;;  %v1887_v40 = vmul.f32 %v1886_v8, %v1884_v29  ;;  %v3898_v30 = vmin.u32 %v2078_v33, %v5918_v4 }
 0x255   :  { %v2152_v28 = vsel %vm2148_vm4, %v2132_v46, %v2135_v51  ;;  %v2159_v15 = vsel %vm2149_vm6, %v2156_v13, %v2158_v1  ;;  %v2154_v14 = vsel %vm2150_vm12, %v2138_v60, %v2153_v36  ;;  %v2162_v56 = vsel %vm2150_vm12, %v2144_v25, %v2161_v43 }
 0x256   :  { %v5932_v47 = vmul.u32.u64.low %v2164_v9, %v2159_v15  ;;  %v5933_v52 = vmul.u32.u64.high %v2164_v9, %v2159_v15, %v5932_v47  ;;  %v1793_v20 = vadd.s32 3, %v1789_v48  ;;  %v5937_v24 = vsel %vm3896_vm10, 0, %v3895_v55  ;;  %v5951_v48 = vpop.f32.mrf.mxu0 }
 0x257   :  { %v2163_v16 = vsel %vm2149_vm6, %v2160_v41, %v2162_v56  ;;  %v3905_v37 = vadd.s32 4294967169, %v2224_v31  ;;  %v1893_v8 = vsel %vm5909_vm1, 0, %v1891_v19  ;;  %v7831_v51 = vand.u32 2147483647, %v5662_v54  ;;  %7834 = vst [vmem:[#allocation66_spill] sm:$0xff] %v5951_v48 }
 0x258   :  { %v2080_v60 = vclz %v3898_v30  ;;  %v5948_v25 = vmul.u32.u64.low %v2164_v9, %v2163_v16  ;;  %v5949_v13 = vmul.u32.u64.high %v2164_v9, %v2163_v16, %v5948_v25  ;;  %v1888_v55 = vxor.u32 2147483648, %v1887_v40 }
 0x259   :  { %vm5944_vm8 = vcmp.le.f32.partialorder %v7831_v51, 0.7853982  ;;  %v1994_v35 = vsub.s32 4, %v5828_v2  ;;  %v2155_v31 = vsel %vm2149_vm6, %v2152_v28, %v2154_v14  ;;  %v2230_v33 = vadd.s32 1, %v3905_v37 }
 0x25a   :  { %4182 = vsinq.f32 %v5853_v34  ;;  %v1785_v19 = vsel %vm1702_vm7, %v1784_v42, %v5890_v57  ;;  %v1984_v46 = vsub.s32 4294967266, %v5937_v24  ;;  %v2174_v36 = vadd.s32 1, %v5933_v52 }
 0x25b   :  { %v1897_v1 = vadd.s32 3, %v1893_v8  ;;  %v7641_v41 = vand.u32 2147483647, %v5886_v22  ;;  %vm2231_vm9 = vcmp.gt.s32.totalorder %v2230_v33, 0  ;;  %v2327_v43 = vand.u32 2139095040, %v5951_v48 }
 0x25c   :  { %v5963_v30 = vand.u32 3, %v1793_v20  ;;  %v3899_v14 = vadd.s32 4294967294, %v2080_v60  ;;  %v2171_v0 = vmul.u32 %v2164_v9, %v2155_v31  ;;  %vm2173_vm15 = vc.u32 %v5949_v13, %v5932_v47 }
 0x25d   :  { %v5970_v34 = vsel %vm5874_vm3, %v5462_v21, %v1785_v19  ;;  %v1889_v57 = vsel %vm1806_vm0, %v1888_v55, %v1887_v40  ;;  %v5977_v42 = vsel %vm1910_vm13, %v1994_v35, %v5828_v2  ;;  %v2175_v20 = vsel %vm2173_vm15, %v2174_v36, %v5933_v52  ;;  %v6112_v21 = vpop.f32.mrf.mxu0 }
 0x25e   :  { %7835 = vst [vmem:[#allocation67_spill] sm:$0xff] %v5963_v30  ;;  %v1980_v9 = vsub.s32 32, %v5937_v24  ;;  %v1985_v28 = vadd.s32 127, %v1984_v46  ;;  %v2176_v15 = vadd.s32 %v2175_v20, %v2171_v0  ;;  %v2232_v56 = vsel %vm2231_vm9, %v2230_v33, 0  ;;  %7849 = vst [vmem:[#allocation73_spill] sm:$0xff] %v6112_v21 }
 0x25f   :  { %v5981_v16 = vand.u32 3, %v1897_v1  ;;  %v2227_v59 = vand.u32 8388607, %v7641_v41  ;;  %v2234_v37 = vand.u32 31, %v2232_v56  ;;  %v2328_v8 = vshrl.u32 %v2327_v43, 23 }
 0x260   :  { %4184 = vcosq.f32 %v5970_v34  ;;  %v1964_v2 = vadd.s32 %v5790_v38, %v5795_v62  ;;  %vm3900_vm7 = vcmp.lt.s32.totalorder %v3899_v14, 0  ;;  %v2177_v40 = vadd.s32 536870912, %v2176_v15 }
 0x261   :  { %7836 = vst [vmem:[#allocation68_spill] sm:$0xff] %v5981_v16  ;;  %v5991_v52 = vsel %vm5909_vm1, %v5522_v10, %v1889_v57  ;;  %v2235_v60 = vsub.s32 32, %v2234_v37  ;;  %v1981_v55 = vshll.u32 %v5837_v44, %v5937_v24  ;;  %v1986_v31 = vshll.u32 %v1985_v28, 23 }
 0x262   :  { %v1982_v35 = vshrl.u32 %v1964_v2, %v1980_v9  ;;  %v5999_v38 = vshrl.u32 %v2177_v40, 30  ;;  %v6001_v62 = vsel %vm3900_vm7, 0, %v3899_v14  ;;  %v2228_v33 = vor.u32 8388608, %v2227_v59 }
 0x263   :  { %v2238_v50 = vshrl.u32 %v7747_v49, %v2235_v60  ;;  %v3909_v19 = vadd.s32 4294967169, %v2328_v8  ;;  %v2237_v36 = vshll.u32 %v7744_v58, %v2234_v37  ;;  %v2241_v1 = vshrl.u32 %v7748_v11, %v2235_v60 }
 0x264   :  { %v2179_v46 = vshll.u32 %v5999_v38, 30  ;;  %v2244_v43 = vshrl.u32 %v7737_v12, %v2235_v60  ;;  %v2240_v24 = vshll.u32 %v7747_v49, %v2234_v37  ;;  %v2243_v44 = vshll.u32 %v7748_v11, %v2234_v37 }
 0x265   :  { %v2246_v0 = vshll.u32 %v7737_v12, %v2234_v37  ;;  %v2247_v14 = vshrl.u32 %v7738_v5, %v2235_v60  ;;  %v2233_v20 = vshrl.u32 %v2232_v56, 5  ;;  %v2239_v9 = vor.u32 %v2238_v50, %v2237_v36 }
 0x266   :  { %v6012_v57 = vsub.s32 %v2176_v15, %v2179_v46  ;;  %v2249_v28 = vshll.u32 %v7738_v5, %v2234_v37  ;;  %v2242_v8 = vor.u32 %v2241_v1, %v2240_v24  ;;  %v2245_v2 = vor.u32 %v2244_v43, %v2243_v44 }
 0x267   :  { %v6015_v59 = vpop.eup %4182  ;;  %v2248_v40 = vor.u32 %v2247_v14, %v2246_v0  ;;  %v2250_v41 = vshrl.u32 %v7740_v26, %v2235_v60  ;;  %v1983_v51 = vor.u32 %v1982_v35, %v1981_v55  ;;  %v1987_v25 = vor.u32 4788187, %v1986_v31 }
 0x268   :  { %7837 = vst [vmem:[#allocation69_spill] sm:$0xff] %v6015_v59  ;;  %v2068_v7 = vadd.s32 %v5845_v6, %v5858_v3  ;;  %v2182_v30 = vsub.s32 0, %v6012_v57  ;;  %v2084_v15 = vsub.s32 32, %v6001_v62  ;;  %v2088_v56 = vsub.s32 4294967266, %v6001_v62 }
 0x269   :  { %v2251_v50 = vor.u32 %v2250_v41, %v2249_v28  ;;  %v2268_v37 = vshll.u32 %v2228_v33, 8  ;;  %vm2252_vm2 = vcmp.lt.s32.totalorder %v2233_v20, 1  ;;  %vm2255_vm5 = vcmp.lt.s32.totalorder %v2233_v20, 4 }
 0x26a   :  { %v3902_v46 = vmin.u32 %v2182_v30, %v6012_v57  ;;  %v2334_v36 = vadd.s32 1, %v3909_v19  ;;  %vm2254_vm3 = vcmp.lt.s32.totalorder %v2233_v20, 3  ;;  %v2257_v1 = vsel %vm2255_vm5, %v2245_v2, 2102212464 }
 0x26b   :  { %v2260_v55 = vsel %vm2252_vm2, %v2239_v9, %v2242_v8  ;;  %v2261_v35 = vsel %vm2255_vm5, %v2248_v40, 920167782  ;;  %v2236_v6 = vshrl.u32 %v7744_v58, %v2235_v60  ;;  %vm2253_vm0 = vcmp.lt.s32.totalorder %v2233_v20, 2 }
 0x26c   :  { %v2184_v31 = vclz %v3902_v46  ;;  %v2262_v3 = vsel %vm2254_vm3, %v2245_v2, %v2261_v35  ;;  %v2089_v41 = vadd.s32 127, %v2088_v56  ;;  %v2264_v30 = vsel %vm2252_vm2, %v2242_v8, %v2245_v2 }
 0x26d   :  { %v6027_v43 = vpop.eup %4184  ;;  %v2263_v33 = vsel %vm2253_vm0, %v2260_v55, %v2262_v3  ;;  %v2265_v24 = vsel %vm2255_vm5, %v2251_v50, 1326507024  ;;  %v2256_v44 = vsel %vm2252_vm2, %v2236_v6, %v2239_v9  ;;  %v2258_v0 = vsel %vm2254_vm3, %v2242_v8, %v2257_v1 }
 0x26e   :  { %7838 = vst [vmem:[#allocation70_spill] sm:$0xff] %v6027_v43  ;;  %v3903_v19 = vadd.s32 4294967294, %v2184_v31  ;;  %v2266_v14 = vsel %vm2254_vm3, %v2248_v40, %v2265_v24  ;;  %v6035_v28 = vmul.u32.u64.low %v2268_v37, %v2263_v33  ;;  %v6036_v46 = vmul.u32.u64.high %v2268_v37, %v2263_v33, %v6035_v28 }
 0x26f   :  { %v2267_v60 = vsel %vm2253_vm0, %v2264_v30, %v2266_v14  ;;  %vm2335_vm11 = vcmp.gt.s32.totalorder %v2334_v36, 0  ;;  %v1988_v56 = vand.u32 2147483647, %v1987_v25  ;;  %4186 = vsinq.f32 %v5970_v34 }
 0x270   :  { %v6039_v35 = vmul.u32.u64.low %v2268_v37, %v2267_v60  ;;  %v6040_v55 = vmul.u32.u64.high %v2268_v37, %v2267_v60, %v6039_v35  ;;  %v2336_v2 = vsel %vm2335_vm11, %v2334_v36, 0  ;;  %v2259_v9 = vsel %vm2253_vm0, %v2256_v44, %v2258_v0 }
 0x271   :  { %v7839_v8 = vand.u32 2147483647, %v5951_v48  ;;  %v2338_v40 = vand.u32 31, %v2336_v2  ;;  %4188 = vcosq.f32 %v5991_v52  ;;  %v1990_v1 = vcvt.s32.f32 %v1983_v51 }
 0x272   :  { %v2086_v31 = vshrl.u32 %v2068_v7, %v2084_v15  ;;  %v2090_v6 = vshll.u32 %v2089_v41, 23  ;;  %v7840_v25 = vsel %vm5944_vm8, 0, %v5977_v42  ;;  %vm3904_vm1 = vcmp.lt.s32.totalorder %v3903_v19, 0 }
 0x273   :  { %v2331_v50 = vand.u32 8388607, %v7839_v8  ;;  %v6051_v3 = vadd.s32 3, %v7840_v25  ;;  %v2278_v34 = vadd.s32 1, %v6036_v46  ;;  %v2339_v20 = vsub.s32 32, %v2338_v40 }
 0x274   :  { %v6054_v36 = vmul.f32 %v1990_v1, %v1988_v56  ;;  %v2085_v33 = vshll.u32 %v5918_v4, %v6001_v62  ;;  %v2275_v30 = vmul.u32 %v2268_v37, %v2259_v9  ;;  %vm2277_vm4 = vc.u32 %v6040_v55, %v6035_v28 }
 0x275   :  { %v2279_v7 = vsel %vm2277_vm4, %v2278_v34, %v6036_v46  ;;  %v2332_v51 = vor.u32 8388608, %v2331_v50  ;;  %v2342_v42 = vshrl.u32 %v7747_v49, %v2339_v20  ;;  %v2345_v15 = vshrl.u32 %v7748_v11, %v2339_v20 }
 0x276   :  { %v2087_v41 = vor.u32 %v2086_v31, %v2085_v33  ;;  %v2091_v24 = vor.u32 4788187, %v2090_v6  ;;  %v6063_v44 = vsel %vm3904_vm1, 0, %v3903_v19  ;;  %v2280_v0 = vadd.s32 %v2279_v7, %v2275_v30 }
 0x277   :  { %v2337_v14 = vshrl.u32 %v2336_v2, 5  ;;  %v2341_v60 = vshll.u32 %v7744_v58, %v2338_v40  ;;  %v2344_v4 = vshll.u32 %v7747_v49, %v2338_v40  ;;  %v2348_v62 = vshrl.u32 %v7737_v12, %v2339_v20 }
 0x278   :  { %v2281_v37 = vadd.s32 536870912, %v2280_v0  ;;  %v2347_v46 = vshll.u32 %v7748_v11, %v2338_v40  ;;  %v2350_v56 = vshll.u32 %v7737_v12, %v2338_v40  ;;  %v2351_v35 = vshrl.u32 %v7738_v5, %v2339_v20 }
 0x279   :  { %vm2014_vm14 = vcmp.lt.s32.totalorder %v5703_v32, 0  ;;  %v2343_v9 = vor.u32 %v2342_v42, %v2341_v60  ;;  %v2346_v19 = vor.u32 %v2345_v15, %v2344_v4  ;;  %v2353_v8 = vshll.u32 %v7738_v5, %v2338_v40 }
 0x27a   :  { %v2354_v2 = vshrl.u32 %v7740_v26, %v2339_v20  ;;  %v2098_v50 = vsub.s32 4, %v5899_v45  ;;  %v6075_v1 = vshrl.u32 %v2281_v37, 30  ;;  %v2349_v31 = vor.u32 %v2348_v62, %v2347_v46 }
 0x27b   :  { %v2352_v6 = vor.u32 %v2351_v35, %v2350_v56  ;;  %v1992_v25 = vxor.u32 2147483648, %v6054_v36  ;;  %v2092_v34 = vand.u32 2147483647, %v2091_v24  ;;  %vm2118_vm10 = vcmp.lt.s32.totalorder %v5761_v61, 0 }
 0x27c   :  { %v2355_v33 = vor.u32 %v2354_v2, %v2353_v8  ;;  %v2372_v30 = vshll.u32 %v2332_v51, 8  ;;  %v2192_v7 = vsub.s32 4294967266, %v6063_v44  ;;  %v2283_v42 = vshll.u32 %v6075_v1, 30  ;;  %v6090_v51 = vpop.eup %4186 }
 0x27d   :  { %vm2356_vm12 = vcmp.lt.s32.totalorder %v2337_v14, 1  ;;  %vm2359_vm6 = vcmp.lt.s32.totalorder %v2337_v14, 4  ;;  %v7841_v40 = vand.u32 2147483647, %v5703_v32  ;;  %v2094_v60 = vcvt.s32.f32 %v2087_v41  ;;  %7844 = vst [vmem:[#allocation71_spill] sm:$0xff] %v6090_v51 }
 0x27e   :  { %v2202_v4 = vsub.s32 4, %v5999_v38  ;;  %v2364_v24 = vsel %vm2356_vm12, %v2343_v9, %v2346_v19  ;;  %v2365_v62 = vsel %vm2359_vm6, %v2352_v6, 920167782  ;;  %v7845_v37 = vand.u32 2147483647, %v5761_v61  ;;  %v6102_v8 = vpop.eup %4188 }
 0x27f   :  { %vm6083_vm9 = vcmp.le.f32.partialorder %v7841_v40, 0.7853982  ;;  %v6098_v56 = vsub.s32 %v2280_v0, %v2283_v42  ;;  %v2340_v35 = vshrl.u32 %v7744_v58, %v2339_v20  ;;  %vm2358_vm7 = vcmp.lt.s32.totalorder %v2337_v14, 3  ;;  %7848 = vst [vmem:[#allocation72_spill] sm:$0xff] %v6102_v8 }
 0x280   :  { %vm6094_vm15 = vcmp.le.f32.partialorder %v7845_v37, 0.7853982  ;;  %v2361_v41 = vsel %vm2359_vm6, %v2349_v31, 2102212464  ;;  %vm2357_vm2 = vcmp.lt.s32.totalorder %v2337_v14, 2  ;;  %v2366_v2 = vsel %vm2358_vm7, %v2349_v31, %v2365_v62 }
 0x281   :  { %v2368_v40 = vsel %vm2356_vm12, %v2346_v19, %v2349_v31  ;;  %v2369_v43 = vsel %vm2359_vm6, %v2355_v33, 1326507024  ;;  %v2095_v51 = vmul.f32 %v2094_v60, %v2092_v34  ;;  %v2193_v37 = vadd.s32 127, %v2192_v7 }
 0x282   :  { %v2360_v63 = vsel %vm2356_vm12, %v2340_v35, %v2343_v9  ;;  %v2367_v0 = vsel %vm2357_vm2, %v2364_v24, %v2366_v2  ;;  %v2362_v42 = vsel %vm2358_vm7, %v2346_v19, %v2361_v41  ;;  %v2370_v53 = vsel %vm2358_vm7, %v2352_v6, %v2369_v43 }
 0x283   :  { %v6108_v20 = vmul.u32.u64.low %v2372_v30, %v2367_v0  ;;  %v6109_v18 = vmul.u32.u64.high %v2372_v30, %v2367_v0, %v6108_v20  ;;  %v2099_v31 = vsel %vm2014_vm14, %v2098_v50, %v5899_v45  ;;  %v2188_v33 = vsub.s32 32, %v6063_v44 }
 0x284   :  { %v2286_v34 = vsub.s32 0, %v6098_v56  ;;  %v2371_v9 = vsel %vm2357_vm2, %v2368_v40, %v2370_v53  ;;  %v1993_v43 = vsel %vm1910_vm13, %v1992_v25, %v6054_v36  ;;  %v2172_v19 = vadd.s32 %v5932_v47, %v5949_v13 }
 0x285   :  { %v6125_v6 = vmul.u32.u64.low %v2372_v30, %v2371_v9  ;;  %v6126_v7 = vmul.u32.u64.high %v2372_v30, %v2371_v9, %v6125_v6  ;;  %v2194_v60 = vshll.u32 %v2193_v37, 23  ;;  %v2203_v45 = vsel %vm2118_vm10, %v2202_v4, %v5999_v38  ;;  %v6141_v38 = vpop.f32.mrf.mxu0 }
 0x286   :  { %v2363_v50 = vsel %vm2357_vm2, %v2360_v63, %v2362_v42  ;;  %v2431_v24 = vand.u32 2139095040, %v6112_v21  ;;  %4190 = vsinq.f32 %v5991_v52  ;;  %v6135_v53 = vand.u32 3, %v6051_v3  ;;  %7851 = vst [vmem:[#allocation75_spill] sm:$0xff] %v6141_v38 }
 0x287   :  { %v2096_v36 = vxor.u32 2147483648, %v2095_v51  ;;  %v2382_v47 = vadd.s32 1, %v6109_v18  ;;  %v2101_v13 = vsel %vm6083_vm9, 0, %v2099_v31  ;;  %v2190_v25 = vshrl.u32 %v2172_v19, %v2188_v33 }
 0x288   :  { %7850 = vst [vmem:[#allocation74_spill] sm:$0xff] %v6135_v53  ;;  %v3906_v62 = vmin.u32 %v2286_v34, %v6098_v56  ;;  %v2432_v35 = vshrl.u32 %v2431_v24, 23  ;;  %v1996_v63 = vsel %vm5944_vm8, %v5662_v54, %v1993_v43  ;;  %v2205_v52 = vsel %vm6094_vm15, 0, %v2203_v45 }
 0x289   :  { %v2379_v3 = vmul.u32 %v2372_v30, %v2363_v50  ;;  %vm2381_vm13 = vc.u32 %v6126_v7, %v6108_v20  ;;  %v2189_v14 = vshll.u32 %v6012_v57, %v6063_v44  ;;  %v2195_v4 = vor.u32 4788187, %v2194_v60 }
 0x28a   :  { %v2383_v41 = vsel %vm2381_vm13, %v2382_v47, %v6109_v18  ;;  %v3913_v2 = vadd.s32 4294967169, %v2432_v35  ;;  %v2097_v40 = vsel %vm2014_vm14, %v2096_v36, %v2095_v51  ;;  %v7653_v29 = vand.u32 2147483647, %v6112_v21 }
 0x28b   :  { %v2384_v37 = vadd.s32 %v2383_v41, %v2379_v3  ;;  %v2535_v0 = vand.u32 2139095040, %v6141_v38  ;;  %4192 = vcosq.f32 %v1996_v63  ;;  %v2191_v30 = vor.u32 %v2190_v25, %v2189_v14 }
 0x28c   :  { %v2288_v42 = vclz %v3906_v62  ;;  %v2438_v31 = vadd.s32 1, %v3913_v2  ;;  %4194 = vsinq.f32 %v1996_v63  ;;  %v2105_v33 = vadd.s32 3, %v2101_v13 }
 0x28d   :  { %v2209_v34 = vadd.s32 3, %v2205_v52  ;;  %v2385_v57 = vadd.s32 536870912, %v2384_v37  ;;  %v2100_v18 = vsel %vm6083_vm9, %v5703_v32, %v2097_v40  ;;  %v2196_v44 = vand.u32 2147483647, %v2195_v4 }
 0x28e   :  { %v2306_v51 = vsub.s32 4, %v6075_v1  ;;  %vm2439_vm8 = vcmp.gt.s32.totalorder %v2438_v31, 0  ;;  %v2435_v43 = vand.u32 8388607, %v7653_v29  ;;  %v2536_v6 = vshrl.u32 %v2535_v0, 23 }
 0x28f   :  { %v6161_v9 = vshrl.u32 %v2385_v57, 30  ;;  %v2440_v19 = vsel %vm2439_vm8, %v2438_v31, 0  ;;  %v2198_v60 = vcvt.s32.f32 %v2191_v30  ;;  %v7852_v45 = vand.u32 2147483647, %v5886_v22 }
 0x290   :  { %v3907_v15 = vadd.s32 4294967294, %v2288_v42  ;;  %v2442_v24 = vand.u32 31, %v2440_v19  ;;  %v7652_v36 = vand.u32 2147483647, %v6141_v38  ;;  %4196 = vcosq.f32 %v2100_v18 }
 0x291   :  { %vm6167_vm5 = vcmp.le.f32.partialorder %v7852_v45, 0.7853982  ;;  %v6172_v47 = vand.u32 3, %v2105_v33  ;;  %vm2222_vm3 = vcmp.lt.s32.totalorder %v5886_v22, 0  ;;  %v2387_v13 = vshll.u32 %v6161_v9, 30 }
 0x292   :  { %4198 = vsinq.f32 %v2100_v18  ;;  %v6176_v25 = vmul.f32 %v2198_v60, %v2196_v44  ;;  %v6178_v62 = vand.u32 3, %v2209_v34  ;;  %v2443_v35 = vsub.s32 32, %v2442_v24 }
 0x293   :  { %7855 = vst [vmem:[#allocation76_spill] sm:$0xff] %v6172_v47  ;;  %v6183_v63 = vsel %vm2222_vm3, %v2306_v51, %v6075_v1  ;;  %v6185_v52 = vsub.s32 %v2384_v37, %v2387_v13  ;;  %v2436_v3 = vor.u32 8388608, %v2435_v43  ;;  %v3917_v14 = vadd.s32 4294967169, %v2536_v6  ;;  %v6187_v4 = vpop.eup %4190 }
 0x294   :  { %7856 = vst [vmem:[#allocation77_spill] sm:$0xff] %v6178_v62  ;;  %7857 = vst [vmem:[#allocation78_spill] sm:$0xff] %v6187_v4  ;;  %vm3908_vm0 = vcmp.lt.s32.totalorder %v3907_v15, 0  ;;  %v2445_v41 = vshll.u32 %v7744_v58, %v2442_v24  ;;  %v2446_v2 = vshrl.u32 %v7747_v49, %v2443_v35  ;;  %v6193_v40 = vand.u32 8388607, %v7652_v36 }
 0x295   :  { %v2390_v0 = vsub.s32 0, %v6185_v52  ;;  %v2448_v1 = vshll.u32 %v7747_v49, %v2442_v24  ;;  %v2449_v37 = vshrl.u32 %v7748_v11, %v2443_v35  ;;  %v2452_v30 = vshrl.u32 %v7737_v12, %v2443_v35 }
 0x296   :  { %v2441_v42 = vshrl.u32 %v2440_v19, 5  ;;  %v2451_v31 = vshll.u32 %v7748_v11, %v2442_v24  ;;  %v2454_v33 = vshll.u32 %v7737_v12, %v2442_v24  ;;  %v2455_v34 = vshrl.u32 %v7738_v5, %v2443_v35 }
 0x297   :  { %v3910_v57 = vmin.u32 %v2390_v0, %v6185_v52  ;;  %v2447_v18 = vor.u32 %v2446_v2, %v2445_v41  ;;  %v2450_v44 = vor.u32 %v2449_v37, %v2448_v1  ;;  %v2542_v51 = vadd.s32 1, %v3917_v14 }
 0x298   :  { %v2453_v43 = vor.u32 %v2452_v30, %v2451_v31  ;;  %v2456_v6 = vor.u32 %v2455_v34, %v2454_v33  ;;  %v2457_v60 = vshll.u32 %v7738_v5, %v2442_v24  ;;  %v2458_v45 = vshrl.u32 %v7740_v26, %v2443_v35  ;;  %v6205_v13 = vpop.eup %4192 }
 0x299   :  { %7858 = vst [vmem:[#allocation79_spill] sm:$0xff] %v6205_v13  ;;  %v2200_v19 = vxor.u32 2147483648, %v6176_v25  ;;  %v2309_v36 = vsel %vm6167_vm5, 0, %v6183_v63  ;;  %v2392_v29 = vclz %v3910_v57  ;;  %v2476_v10 = vshll.u32 %v2436_v3, 8  ;;  %v6211_v0 = vpop.eup %4194 }
 0x29a   :  { %7859 = vst [vmem:[#allocation80_spill] sm:$0xff] %v6211_v0  ;;  %v6214_v14 = vsel %vm3908_vm0, 0, %v3907_v15  ;;  %v2459_v41 = vor.u32 %v2458_v45, %v2457_v60  ;;  %vm2460_vm11 = vcmp.lt.s32.totalorder %v2441_v42, 1  ;;  %v2540_v24 = vor.u32 8388608, %v6193_v40 }
 0x29b   :  { %v3911_v2 = vadd.s32 4294967294, %v2392_v29  ;;  %vm2463_vm1 = vcmp.lt.s32.totalorder %v2441_v42, 4  ;;  %v2468_v1 = vsel %vm2460_vm11, %v2447_v18, %v2450_v44  ;;  %vm2543_vm4 = vcmp.gt.s32.totalorder %v2542_v51, 0 }
 0x29c   :  { %v2444_v37 = vshrl.u32 %v7744_v58, %v2443_v35  ;;  %vm2462_vm14 = vcmp.lt.s32.totalorder %v2441_v42, 3  ;;  %v2465_v63 = vsel %vm2463_vm1, %v2453_v43, 2102212464  ;;  %v2469_v30 = vsel %vm2463_vm1, %v2456_v6, 920167782 }
 0x29d   :  { %vm3912_vm12 = vcmp.lt.s32.totalorder %v3911_v2, 0  ;;  %vm2461_vm6 = vcmp.lt.s32.totalorder %v2441_v42, 2  ;;  %v2470_v3 = vsel %vm2462_vm14, %v2453_v43, %v2469_v30  ;;  %v2472_v15 = vsel %vm2460_vm11, %v2450_v44, %v2453_v43  ;;  %v6220_v31 = vpop.eup %4196 }
 0x29e   :  { %7860 = vst [vmem:[#allocation81_spill] sm:$0xff] %v6220_v31  ;;  %v2292_v33 = vsub.s32 32, %v6214_v14  ;;  %v2296_v29 = vsub.s32 4294967266, %v6214_v14  ;;  %v2471_v40 = vsel %vm2461_vm6, %v2468_v1, %v2470_v3  ;;  %v2473_v34 = vsel %vm2463_vm1, %v2459_v41, 1326507024 }
 0x29f   :  { %v6225_v57 = vpop.eup %4198  ;;  %v2464_v35 = vsel %vm2460_vm11, %v2444_v37, %v2447_v18  ;;  %v2466_v60 = vsel %vm2462_vm14, %v2450_v44, %v2465_v63  ;;  %v2474_v45 = vsel %vm2462_vm14, %v2456_v6, %v2473_v34  ;;  %v2544_v23 = vsel %vm2543_vm4, %v2542_v51, 0  ;;  %v6246_v51 = vpop.f32.mrf.mxu0 }
 0x2a0   :  { %7861 = vst [vmem:[#allocation82_spill] sm:$0xff] %v6225_v57  ;;  %v6229_v30 = vsel %vm3912_vm12, 0, %v3911_v2  ;;  %v2475_v43 = vsel %vm2461_vm6, %v2472_v15, %v2474_v45  ;;  %v6232_v8 = vmul.u32.u64.low %v2476_v10, %v2471_v40  ;;  %v6233_v16 = vmul.u32.u64.high %v2476_v10, %v2471_v40, %v6232_v8  ;;  %7862 = vst [vmem:[#allocation83_spill] sm:$0xff] %v6246_v51 }
 0x2a1   :  { %v6239_v41 = vsel %vm2118_vm10, %v2200_v19, %v6176_v25  ;;  %v2276_v18 = vadd.s32 %v6035_v28, %v6040_v55  ;;  %v6243_v44 = vmul.u32.u64.low %v2476_v10, %v2475_v43  ;;  %v6244_v6 = vmul.u32.u64.high %v2476_v10, %v2475_v43, %v6243_v44 }
 0x2a2   :  { %v6248_v2 = vadd.s32 3, %v2309_v36  ;;  %v2380_v1 = vadd.s32 %v6108_v20, %v6126_v7  ;;  %v2467_v37 = vsel %vm2461_vm6, %v2464_v35, %v2466_v60  ;;  %v2546_v63 = vand.u32 31, %v2544_v23 }
 0x2a3   :  { %v2293_v25 = vshll.u32 %v6098_v56, %v6214_v14  ;;  %v2294_v19 = vshrl.u32 %v2276_v18, %v2292_v33  ;;  %v2400_v3 = vsub.s32 4294967266, %v6229_v30  ;;  %v6256_v28 = vshll.u32 %v2540_v24, 8 }
 0x2a4   :  { %v2297_v55 = vadd.s32 127, %v2296_v29  ;;  %v2486_v15 = vadd.s32 1, %v6233_v16  ;;  %v2547_v40 = vsub.s32 32, %v2546_v63  ;;  %v2639_v36 = vand.u32 2139095040, %v6246_v51 }
 0x2a5   :  { %v2483_v34 = vmul.u32 %v2476_v10, %v2467_v37  ;;  %vm2485_vm10 = vc.u32 %v6244_v6, %v6232_v8  ;;  %v2545_v20 = vshrl.u32 %v2544_v23, 5  ;;  %v2549_v7 = vshll.u32 %v7744_v58, %v2546_v63 }
 0x2a6   :  { %v2487_v56 = vsel %vm2485_vm10, %v2486_v15, %v6233_v16  ;;  %v2550_v42 = vshrl.u32 %v7747_v49, %v2547_v40  ;;  %v2552_v14 = vshll.u32 %v7747_v49, %v2546_v63  ;;  %v2553_v24 = vshrl.u32 %v7748_v11, %v2547_v40 }
 0x2a7   :  { %v2401_v33 = vadd.s32 127, %v2400_v3  ;;  %v2488_v29 = vadd.s32 %v2487_v56, %v2483_v34  ;;  %v2555_v35 = vshll.u32 %v7748_v11, %v2546_v63  ;;  %v2556_v10 = vshrl.u32 %v7737_v12, %v2547_v40 }
 0x2a8   :  { %v2551_v60 = vor.u32 %v2550_v42, %v2549_v7  ;;  %v2554_v45 = vor.u32 %v2553_v24, %v2552_v14  ;;  %v2558_v23 = vshll.u32 %v7737_v12, %v2546_v63  ;;  %v2559_v43 = vshrl.u32 %v7738_v5, %v2547_v40 }
 0x2a9   :  { %v2298_v18 = vshll.u32 %v2297_v55, 23  ;;  %v2396_v16 = vsub.s32 32, %v6229_v30  ;;  %v2489_v44 = vadd.s32 536870912, %v2488_v29  ;;  %v2640_v37 = vshrl.u32 %v2639_v36, 23 }
 0x2aa   :  { %v2557_v15 = vor.u32 %v2556_v10, %v2555_v35  ;;  %v2560_v4 = vor.u32 %v2559_v43, %v2558_v23  ;;  %v2561_v3 = vshll.u32 %v7738_v5, %v2546_v63  ;;  %v2562_v34 = vshrl.u32 %v7740_v26, %v2547_v40 }
 0x2ab   :  { %v6274_v56 = vshrl.u32 %v2489_v44, 30  ;;  %vm2564_vm9 = vcmp.lt.s32.totalorder %v2545_v20, 1  ;;  %vm2565_vm7 = vcmp.lt.s32.totalorder %v2545_v20, 2  ;;  %vm2567_vm2 = vcmp.lt.s32.totalorder %v2545_v20, 4 }
 0x2ac   :  { %v2402_v7 = vshll.u32 %v2401_v33, 23  ;;  %v2563_v42 = vor.u32 %v2562_v34, %v2561_v3  ;;  %v2572_v14 = vsel %vm2564_vm9, %v2551_v60, %v2554_v45  ;;  %v2573_v55 = vsel %vm2567_vm2, %v2560_v4, 920167782 }
 0x2ad   :  { %v2491_v24 = vshll.u32 %v6274_v56, 30  ;;  %v2548_v36 = vshrl.u32 %v7744_v58, %v2547_v40  ;;  %vm2566_vm13 = vcmp.lt.s32.totalorder %v2545_v20, 3  ;;  %v3921_v35 = vadd.s32 4294967169, %v2640_v37 }
 0x2ae   :  { %v2569_v10 = vsel %vm2567_vm2, %v2557_v15, 2102212464  ;;  %v2574_v63 = vsel %vm2566_vm13, %v2557_v15, %v2573_v55  ;;  %v2576_v23 = vsel %vm2564_vm9, %v2554_v45, %v2557_v15  ;;  %v2577_v43 = vsel %vm2567_vm2, %v2563_v42, 1326507024 }
 0x2af   :  { %v2295_v44 = vor.u32 %v2294_v19, %v2293_v25  ;;  %v2299_v39 = vor.u32 4788187, %v2298_v18  ;;  %vm2326_vm8 = vcmp.lt.s32.totalorder %v5951_v48, 0  ;;  %v6282_v33 = vsub.s32 %v2488_v29, %v2491_v24 }
 0x2b0   :  { %v2575_v3 = vsel %vm2565_vm7, %v2572_v14, %v2574_v63  ;;  %v2398_v34 = vshrl.u32 %v2380_v1, %v2396_v16  ;;  %v2403_v27 = vor.u32 4788187, %v2402_v7  ;;  %v2568_v40 = vsel %vm2564_vm9, %v2548_v36, %v2551_v60 }
 0x2b1   :  { %v2578_v37 = vsel %vm2566_vm13, %v2560_v4, %v2577_v43  ;;  %v2494_v17 = vsub.s32 0, %v6282_v33  ;;  %v2570_v55 = vsel %vm2566_vm13, %v2554_v45, %v2569_v10  ;;  %v2646_v25 = vadd.s32 1, %v3921_v35 }
 0x2b2   :  { %v2579_v15 = vsel %vm2565_vm7, %v2576_v23, %v2578_v37  ;;  %v6295_v29 = vmul.u32.u64.low %v6256_v28, %v2575_v3  ;;  %v6296_v42 = vmul.u32.u64.high %v6256_v28, %v2575_v3, %v6295_v29  ;;  %v2397_v1 = vshll.u32 %v6185_v52, %v6229_v30 }
 0x2b3   :  { %v6291_v19 = vmul.u32.u64.low %v6256_v28, %v2579_v15  ;;  %v6292_v18 = vmul.u32.u64.high %v6256_v28, %v2579_v15, %v6291_v19  ;;  %v3914_v4 = vmin.u32 %v2494_v17, %v6282_v33  ;;  %v7664_v60 = vand.u32 2147483647, %v6246_v51 }
 0x2b4   :  { %vm2647_vm0 = vcmp.gt.s32.totalorder %v2646_v25, 0  ;;  %v2300_v45 = vand.u32 2147483647, %v2299_v39  ;;  %v2410_v16 = vsub.s32 4, %v6161_v9  ;;  %v2571_v7 = vsel %vm2565_vm7, %v2568_v40, %v2570_v55 }
 0x2b5   :  { %v2648_v14 = vsel %vm2647_vm0, %v2646_v25, 0  ;;  %v6309_v24 = vsel %vm6094_vm15, %v5761_v61, %v6239_v41  ;;  %v2399_v36 = vor.u32 %v2398_v34, %v2397_v1  ;;  %v2496_v35 = vclz %v3914_v4 }
 0x2b6   :  { %v2650_v52 = vand.u32 31, %v2648_v14  ;;  %v2302_v30 = vcvt.s32.f32 %v2295_v44  ;;  %v2404_v17 = vand.u32 2147483647, %v2403_v27  ;;  %vm2589_vm11 = vc.u32 %v6292_v18, %v6295_v29 }
 0x2b7   :  { %v2590_v39 = vadd.s32 1, %v6296_v42  ;;  %v3915_v10 = vadd.s32 4294967294, %v2496_v35  ;;  %v2587_v20 = vmul.u32 %v6256_v28, %v2571_v7  ;;  %v2643_v63 = vand.u32 8388607, %v7664_v60  ;;  %v6341_v35 = vpop.f32.mrf.mxu0 }
 0x2b8   :  { %v2651_v23 = vsub.s32 32, %v2650_v52  ;;  %4200 = vcosq.f32 %v6309_v24  ;;  %v2303_v46 = vmul.f32 %v2302_v30, %v2300_v45  ;;  %v6321_v41 = vsel %vm2326_vm8, %v2410_v16, %v6161_v9 }
 0x2b9   :  { %v2591_v27 = vsel %vm2589_vm11, %v2590_v39, %v6296_v42  ;;  %v2406_v43 = vcvt.s32.f32 %v2399_v36  ;;  %vm3916_vm15 = vcmp.lt.s32.totalorder %v3915_v10, 0  ;;  %v2644_v25 = vor.u32 8388608, %v2643_v63 }
 0x2ba   :  { %v2592_v44 = vadd.s32 %v2591_v27, %v2587_v20  ;;  %v2654_v3 = vshrl.u32 %v7747_v49, %v2651_v23  ;;  %v6325_v28 = vsel %vm3916_vm15, 0, %v3915_v10  ;;  %v2657_v34 = vshrl.u32 %v7748_v11, %v2651_v23 }
 0x2bb   :  { %v2660_v40 = vshrl.u32 %v7737_v12, %v2651_v23  ;;  %v2663_v37 = vshrl.u32 %v7738_v5, %v2651_v23  ;;  %v6330_v55 = vmul.f32 %v2406_v43, %v2404_v17  ;;  %v2504_v9 = vsub.s32 4294967266, %v6325_v28 }
 0x2bc   :  { %v2593_v15 = vadd.s32 536870912, %v2592_v44  ;;  %v2653_v19 = vshll.u32 %v7744_v58, %v2650_v52  ;;  %v2656_v42 = vshll.u32 %v7747_v49, %v2650_v52  ;;  %v2659_v1 = vshll.u32 %v7748_v11, %v2650_v52 }
 0x2bd   :  { %v2662_v4 = vshll.u32 %v7737_v12, %v2650_v52  ;;  %v2649_v16 = vshrl.u32 %v2648_v14, 5  ;;  %v2665_v7 = vshll.u32 %v7738_v5, %v2650_v52  ;;  %v2666_v36 = vshrl.u32 %v7740_v26, %v2651_v23 }
 0x2be   :  { %v6337_v45 = vshrl.u32 %v2593_v15, 30  ;;  %v2655_v30 = vor.u32 %v2654_v3, %v2653_v19  ;;  %v2658_v17 = vor.u32 %v2657_v34, %v2656_v42  ;;  %v2661_v39 = vor.u32 %v2660_v40, %v2659_v1 }
 0x2bf   :  { %v2664_v10 = vor.u32 %v2663_v37, %v2662_v4  ;;  %v2304_v20 = vxor.u32 2147483648, %v2303_v46  ;;  %v2484_v63 = vadd.s32 %v6232_v8, %v6244_v6  ;;  %v2505_v27 = vadd.s32 127, %v2504_v9 }
 0x2c0   :  { %v2595_v43 = vshll.u32 %v6337_v45, 30  ;;  %v2408_v15 = vxor.u32 2147483648, %v6330_v55  ;;  %v2667_v14 = vor.u32 %v2666_v36, %v2665_v7  ;;  %v2684_v60 = vshll.u32 %v2644_v25, 8 }
 0x2c1   :  { %v2743_v52 = vand.u32 2139095040, %v6341_v35  ;;  %v2652_v3 = vshrl.u32 %v7744_v58, %v2651_v23  ;;  %vm2668_vm1 = vcmp.lt.s32.totalorder %v2649_v16, 1  ;;  %vm2671_vm4 = vcmp.lt.s32.totalorder %v2649_v16, 4 }
 0x2c2   :  { %v6348_v59 = vsub.s32 %v2592_v44, %v2595_v43  ;;  %v2500_v34 = vsub.s32 32, %v6325_v28  ;;  %v2673_v40 = vsel %vm2671_vm4, %v2661_v39, 2102212464  ;;  %v2676_v8 = vsel %vm2668_vm1, %v2655_v30, %v2658_v17 }
 0x2c3   :  { %v2677_v6 = vsel %vm2671_vm4, %v2664_v10, 920167782  ;;  %v7863_v37 = vand.u32 2147483647, %v5951_v48  ;;  %v2506_v25 = vshll.u32 %v2505_v27, 23  ;;  %vm2669_vm12 = vcmp.lt.s32.totalorder %v2649_v16, 2 }
 0x2c4   :  { %v2598_v44 = vsub.s32 0, %v6348_v59  ;;  %vm2670_vm6 = vcmp.lt.s32.totalorder %v2649_v16, 3  ;;  %v2680_v19 = vsel %vm2668_vm1, %v2658_v17, %v2661_v39  ;;  %v2681_v42 = vsel %vm2671_vm4, %v2667_v14, 1326507024 }
 0x2c5   :  { %vm6355_vm14 = vcmp.le.f32.partialorder %v7863_v37, 0.7853982  ;;  %v2678_v23 = vsel %vm2670_vm6, %v2661_v39, %v2677_v6  ;;  %v2744_v1 = vshrl.u32 %v2743_v52, 23  ;;  %v6361_v4 = vpop.eup %4200  ;;  %v2672_v36 = vsel %vm2668_vm1, %v2652_v3, %v2655_v30 }
 0x2c6   :  { %7866 = vst [vmem:[#allocation84_spill] sm:$0xff] %v6361_v4  ;;  %v3918_v7 = vmin.u32 %v2598_v44, %v6348_v59  ;;  %v2674_v43 = vsel %vm2670_vm6, %v2658_v17, %v2673_v40  ;;  %v2679_v37 = vsel %vm2669_vm12, %v2676_v8, %v2678_v23  ;;  %v2682_v62 = vsel %vm2670_vm6, %v2664_v10, %v2681_v42 }
 0x2c7   :  { %v6366_v27 = vmul.u32.u64.low %v2684_v60, %v2679_v37  ;;  %v6367_v13 = vmul.u32.u64.high %v2684_v60, %v2679_v37, %v6366_v27  ;;  %v3925_v53 = vadd.s32 4294967169, %v2744_v1  ;;  %v2305_v39 = vsel %vm2222_vm3, %v2304_v20, %v2303_v46 }
 0x2c8   :  { %v2502_v14 = vshrl.u32 %v2484_v63, %v2500_v34  ;;  %v2600_v52 = vclz %v3918_v7  ;;  %v2683_v6 = vsel %vm2669_vm12, %v2680_v19, %v2682_v62  ;;  %v7670_v30 = vand.u32 2147483647, %v6341_v35 }
 0x2c9   :  { %v6373_v4 = vmul.u32.u64.low %v2684_v60, %v2683_v6  ;;  %v6374_v44 = vmul.u32.u64.high %v2684_v60, %v2683_v6, %v6373_v4  ;;  %v2750_v17 = vadd.s32 1, %v3925_v53  ;;  %v2501_v10 = vshll.u32 %v6282_v33, %v6325_v28 }
 0x2ca   :  { %v2507_v3 = vor.u32 4788187, %v2506_v25  ;;  %v3919_v40 = vadd.s32 4294967294, %v2600_v52  ;;  %v2675_v8 = vsel %vm2669_vm12, %v2672_v36, %v2674_v43  ;;  %4202 = vsinq.f32 %v6309_v24 }
 0x2cb   :  { %v2409_v46 = vsel %vm2326_vm8, %v2408_v15, %v6330_v55  ;;  %v2694_v62 = vadd.s32 1, %v6367_v13  ;;  %vm2751_vm3 = vcmp.gt.s32.totalorder %v2750_v17, 0  ;;  %v2308_v53 = vsel %vm6167_vm5, %v5886_v22, %v2305_v39 }
 0x2cc   :  { %v2503_v20 = vor.u32 %v2502_v14, %v2501_v10  ;;  %vm3920_vm10 = vcmp.lt.s32.totalorder %v3919_v40, 0  ;;  %v2752_v33 = vsel %vm2751_vm3, %v2750_v17, 0  ;;  %v2413_v28 = vsel %vm6355_vm14, 0, %v6321_v41 }
 0x2cd   :  { %v2514_v24 = vsub.s32 4, %v6274_v56  ;;  %v2691_v16 = vmul.u32 %v2684_v60, %v2675_v8  ;;  %vm2693_vm9 = vc.u32 %v6374_v44, %v6366_v27  ;;  %v6397_v55 = vsel %vm6355_vm14, %v5951_v48, %v2409_v46 }
 0x2ce   :  { %v2508_v50 = vand.u32 2147483647, %v2507_v3  ;;  %v2695_v63 = vsel %vm2693_vm9, %v2694_v62, %v6367_v13  ;;  %v2747_v15 = vand.u32 8388607, %v7670_v30  ;;  %4204 = vcosq.f32 %v2308_v53 }
 0x2cf   :  { %v6402_v34 = vsel %vm3920_vm10, 0, %v3919_v40  ;;  %v2696_v41 = vadd.s32 %v2695_v63, %v2691_v16  ;;  %v2754_v25 = vand.u32 31, %v2752_v33  ;;  %4206 = vsinq.f32 %v2308_v53 }
 0x2d0   :  { %v6405_v60 = vand.u32 3, %v6248_v2  ;;  %vm2430_vm5 = vcmp.lt.s32.totalorder %v6112_v21, 0  ;;  %v2510_v9 = vcvt.s32.f32 %v2503_v20  ;;  %4208 = vcosq.f32 %v6397_v55 }
 0x2d1   :  { %v6409_v23 = vadd.s32 3, %v2413_v28  ;;  %v2697_v13 = vadd.s32 536870912, %v2696_v41  ;;  %v2755_v19 = vsub.s32 32, %v2754_v25  ;;  %v6416_v1 = vsel %vm2430_vm5, %v2514_v24, %v6274_v56 }
 0x2d2   :  { %7867 = vst [vmem:[#allocation85_spill] sm:$0xff] %v6405_v60  ;;  %v6411_v42 = vmul.f32 %v2510_v9, %v2508_v50  ;;  %v2608_v4 = vsub.s32 4294967266, %v6402_v34  ;;  %v2748_v2 = vor.u32 8388608, %v2747_v15  ;;  %v2757_v36 = vshll.u32 %v7744_v58, %v2754_v25  ;;  %v6444_v50 = vpop.f32.mrf.mxu0 }
 0x2d3   :  { %v6419_v7 = vshrl.u32 %v2697_v13, 30  ;;  %v2758_v43 = vshrl.u32 %v7747_v49, %v2755_v19  ;;  %v2761_v37 = vshrl.u32 %v7748_v11, %v2755_v19  ;;  %v2760_v39 = vshll.u32 %v7747_v49, %v2754_v25 }
 0x2d4   :  { %v2763_v14 = vshll.u32 %v7748_v11, %v2754_v25  ;;  %v2764_v52 = vshrl.u32 %v7737_v12, %v2755_v19  ;;  %v2767_v56 = vshrl.u32 %v7738_v5, %v2755_v19  ;;  %v2604_v6 = vsub.s32 32, %v6402_v34 }
 0x2d5   :  { %v2699_v17 = vshll.u32 %v6419_v7, 30  ;;  %v2753_v10 = vshrl.u32 %v2752_v33, 5  ;;  %v2766_v3 = vshll.u32 %v7737_v12, %v2754_v25  ;;  %v7868_v40 = vand.u32 2147483647, %v6112_v21 }
 0x2d6   :  { %vm2534_vm2 = vcmp.lt.s32.totalorder %v6141_v38, 0  ;;  %v2588_v46 = vadd.s32 %v6295_v29, %v6292_v18  ;;  %v2759_v62 = vor.u32 %v2758_v43, %v2757_v36  ;;  %v2762_v53 = vor.u32 %v2761_v37, %v2760_v39 }
 0x2d7   :  { %vm6433_vm7 = vcmp.le.f32.partialorder %v7868_v40, 0.7853982  ;;  %v2765_v20 = vor.u32 %v2764_v52, %v2763_v14  ;;  %v6440_v28 = vsub.s32 %v2696_v41, %v2699_v17  ;;  %v2768_v24 = vor.u32 %v2767_v56, %v2766_v3  ;;  %v6446_v63 = vpop.eup %4202 }
 0x2d8   :  { %v2769_v33 = vshll.u32 %v7738_v5, %v2754_v25  ;;  %v2770_v16 = vshrl.u32 %v7740_v26, %v2755_v19  ;;  %7871 = vst [vmem:[#allocation86_spill] sm:$0xff] %v6446_v63  ;;  %v2512_v15 = vxor.u32 2147483648, %v6411_v42  ;;  %v2609_v9 = vadd.s32 127, %v2608_v4 }
 0x2d9   :  { %v2618_v13 = vsub.s32 4, %v6337_v45  ;;  %v2788_v18 = vshll.u32 %v2748_v2, 8  ;;  %v2606_v29 = vshrl.u32 %v2588_v46, %v2604_v6  ;;  %v2702_v36 = vsub.s32 0, %v6440_v28 }
 0x2da   :  { %v2771_v41 = vor.u32 %v2770_v16, %v2769_v33  ;;  %vm2772_vm13 = vcmp.lt.s32.totalorder %v2753_v10, 1  ;;  %v2756_v43 = vshrl.u32 %v7744_v58, %v2755_v19  ;;  %vm2775_vm8 = vcmp.lt.s32.totalorder %v2753_v10, 4 }
 0x2db   :  { %v2780_v25 = vsel %vm2772_vm13, %v2759_v62, %v2762_v53  ;;  %v2847_v37 = vand.u32 2139095040, %v6444_v50  ;;  %v3922_v39 = vmin.u32 %v2702_v36, %v6440_v28  ;;  %vm2774_vm0 = vcmp.lt.s32.totalorder %v2753_v10, 3  ;;  %v6457_v2 = vpop.eup %4204 }
 0x2dc   :  { %v2777_v4 = vsel %vm2775_vm8, %v2765_v20, 2102212464  ;;  %v2781_v14 = vsel %vm2775_vm8, %v2768_v24, 920167782  ;;  %7872 = vst [vmem:[#allocation87_spill] sm:$0xff] %v6457_v2  ;;  %v2610_v19 = vshll.u32 %v2609_v9, 23  ;;  %v2784_v17 = vsel %vm2772_vm13, %v2762_v53, %v2765_v20  ;;  %v6467_v3 = vpop.eup %4206 }
 0x2dd   :  { %v7873_v52 = vand.u32 2147483647, %v6141_v38  ;;  %vm2773_vm15 = vcmp.lt.s32.totalorder %v2753_v10, 2  ;;  %v2782_v6 = vsel %vm2774_vm0, %v2765_v20, %v2781_v14  ;;  %7876 = vst [vmem:[#allocation88_spill] sm:$0xff] %v6467_v3  ;;  %v2704_v40 = vclz %v3922_v39  ;;  %v6472_v36 = vpop.eup %4208 }
 0x2de   :  { %v2776_v46 = vsel %vm2772_vm13, %v2756_v43, %v2759_v62  ;;  %v2783_v33 = vsel %vm2773_vm15, %v2780_v25, %v2782_v6  ;;  %v2785_v16 = vsel %vm2775_vm8, %v2771_v41, 1326507024  ;;  %7877 = vst [vmem:[#allocation89_spill] sm:$0xff] %v6472_v36  ;;  %v2517_v20 = vsel %vm6433_vm7, 0, %v6416_v1 }
 0x2df   :  { %vm6461_vm11 = vcmp.le.f32.partialorder %v7873_v52, 0.7853982  ;;  %v2778_v52 = vsel %vm2774_vm0, %v2762_v53, %v2777_v4  ;;  %v2786_v9 = vsel %vm2774_vm0, %v2768_v24, %v2785_v16  ;;  %v2619_v62 = vsel %vm2534_vm2, %v2618_v13, %v6337_v45  ;;  %v6492_v4 = vpop.f32.mrf.mxu0 }
 0x2e0   :  { %v6476_v30 = vmul.u32.u64.low %v2788_v18, %v2783_v33  ;;  %v6477_v63 = vmul.u32.u64.high %v2788_v18, %v2783_v33, %v6476_v30  ;;  %v3923_v43 = vadd.s32 4294967294, %v2704_v40  ;;  %v2787_v41 = vsel %vm2773_vm15, %v2784_v17, %v2786_v9 }
 0x2e1   :  { %v2605_v53 = vshll.u32 %v6348_v59, %v6402_v34  ;;  %v6489_v25 = vmul.u32.u64.low %v2788_v18, %v2787_v41  ;;  %v6490_v24 = vmul.u32.u64.high %v2788_v18, %v2787_v41, %v6489_v25  ;;  %v2848_v39 = vshrl.u32 %v2847_v37, 23 }
 0x2e2   :  { %v2513_v1 = vsel %vm2430_vm5, %v2512_v15, %v6411_v42  ;;  %v2611_v14 = vor.u32 4788187, %v2610_v19  ;;  %vm3924_vm1 = vcmp.lt.s32.totalorder %v3923_v43, 0  ;;  %v2779_v45 = vsel %vm2773_vm15, %v2776_v46, %v2778_v52 }
 0x2e3   :  { %v2607_v13 = vor.u32 %v2606_v29, %v2605_v53  ;;  %v2798_v6 = vadd.s32 1, %v6477_v63  ;;  %v7672_v17 = vand.u32 2147483647, %v6444_v50  ;;  %v3929_v59 = vadd.s32 4294967169, %v2848_v39 }
 0x2e4   :  { %4210 = vsinq.f32 %v6397_v55  ;;  %v6502_v34 = vand.u32 3, %v6409_v23  ;;  %v2521_v37 = vadd.s32 3, %v2517_v20  ;;  %v2951_v40 = vand.u32 2139095040, %v6492_v4 }
 0x2e5   :  { %v2707_v33 = vsel %vm3924_vm1, 0, %v3923_v43  ;;  %v2795_v42 = vmul.u32 %v2788_v18, %v2779_v45  ;;  %vm2797_vm4 = vc.u32 %v6490_v24, %v6476_v30  ;;  %v2854_v10 = vadd.s32 1, %v3929_v59 }
 0x2e6   :  { %7878 = vst [vmem:[#allocation90_spill] sm:$0xff] %v6502_v34  ;;  %v6510_v15 = vsel %vm6433_vm7, %v6112_v21, %v2513_v1  ;;  %v2612_v29 = vand.u32 2147483647, %v2611_v14  ;;  %v2621_v55 = vsel %vm6461_vm11, 0, %v2619_v62  ;;  %v2799_v23 = vsel %vm2797_vm4, %v2798_v6, %v6477_v63 }
 0x2e7   :  { %v2614_v19 = vcvt.s32.f32 %v2607_v13  ;;  %v2800_v46 = vadd.s32 %v2799_v23, %v2795_v42  ;;  %v2851_v18 = vand.u32 8388607, %v7672_v17  ;;  %vm2855_vm14 = vcmp.gt.s32.totalorder %v2854_v10, 0 }
 0x2e8   :  { %vm2638_vm12 = vcmp.lt.s32.totalorder %v6246_v51, 0  ;;  %v2708_v16 = vsub.s32 32, %v2707_v33  ;;  %v2712_v52 = vsub.s32 4294967266, %v2707_v33  ;;  %v2856_v9 = vsel %vm2855_vm14, %v2854_v10, 0 }
 0x2e9   :  { %v2952_v8 = vshrl.u32 %v2951_v40, 23  ;;  %v6518_v20 = vand.u32 3, %v2521_v37  ;;  %v6520_v43 = vadd.s32 3, %v2621_v55  ;;  %v2801_v41 = vadd.s32 536870912, %v2800_v46 }
 0x2ea   :  { %v2858_v62 = vand.u32 31, %v2856_v9  ;;  %4212 = vcosq.f32 %v6510_v15  ;;  %v6523_v63 = vmul.f32 %v2614_v19, %v2612_v29  ;;  %v2692_v53 = vadd.s32 %v6366_v27, %v6374_v44 }
 0x2eb   :  { %7879 = vst [vmem:[#allocation91_spill] sm:$0xff] %v6518_v20  ;;  %v2722_v25 = vsub.s32 4, %v6419_v7  ;;  %v6528_v39 = vshrl.u32 %v2801_v41, 30  ;;  %v2852_v1 = vor.u32 8388608, %v2851_v18  ;;  %v2709_v13 = vshll.u32 %v6440_v28, %v2707_v33 }
 0x2ec   :  { %v2859_v14 = vsub.s32 32, %v2858_v62  ;;  %v2710_v6 = vshrl.u32 %v2692_v53, %v2708_v16  ;;  %v2713_v59 = vadd.s32 127, %v2712_v52  ;;  %v3933_v37 = vadd.s32 4294967169, %v2952_v8 }
 0x2ed   :  { %v2803_v40 = vshll.u32 %v6528_v39, 30  ;;  %v2861_v42 = vshll.u32 %v7744_v58, %v2858_v62  ;;  %v2864_v27 = vshll.u32 %v7747_v49, %v2858_v62  ;;  %v2867_v29 = vshll.u32 %v7748_v11, %v2858_v62 }
 0x2ee   :  { %v2862_v10 = vshrl.u32 %v7747_v49, %v2859_v14  ;;  %v2865_v44 = vshrl.u32 %v7748_v11, %v2859_v14  ;;  %v2868_v55 = vshrl.u32 %v7737_v12, %v2859_v14  ;;  %v2871_v23 = vshrl.u32 %v7738_v5, %v2859_v14 }
 0x2ef   :  { %v6540_v28 = vsub.s32 %v2800_v46, %v2803_v40  ;;  %v2857_v33 = vshrl.u32 %v2856_v9, 5  ;;  %v2870_v19 = vshll.u32 %v7737_v12, %v2858_v62  ;;  %v2874_v18 = vshrl.u32 %v7740_v26, %v2859_v14 }
 0x2f0   :  { %v2863_v16 = vor.u32 %v2862_v10, %v2861_v42  ;;  %v2866_v52 = vor.u32 %v2865_v44, %v2864_v27  ;;  %v2869_v8 = vor.u32 %v2868_v55, %v2867_v29  ;;  %v2873_v41 = vshll.u32 %v7738_v5, %v2858_v62 }
 0x2f1   :  { %v6545_v53 = vpop.eup %4210  ;;  %v2616_v17 = vxor.u32 2147483648, %v6523_v63  ;;  %v6551_v45 = vsel %vm2638_vm12, %v2722_v25, %v6419_v7  ;;  %v2806_v46 = vsub.s32 0, %v6540_v28  ;;  %v2872_v9 = vor.u32 %v2871_v23, %v2870_v19 }
 0x2f2   :  { %7880 = vst [vmem:[#allocation92_spill] sm:$0xff] %v6545_v53  ;;  %v7881_v40 = vand.u32 2147483647, %v6246_v51  ;;  %v6560_v10 = vor.u32 %v2710_v6, %v2709_v13  ;;  %v2875_v62 = vor.u32 %v2874_v18, %v2873_v41  ;;  %v2892_v27 = vshll.u32 %v2852_v1, 8 }
 0x2f3   :  { %v7884_v44 = vand.u32 2147483647, %v6492_v4  ;;  %v2714_v55 = vshll.u32 %v2713_v59, 23  ;;  %v3926_v7 = vmin.u32 %v2806_v46, %v6540_v28  ;;  %vm2876_vm3 = vcmp.lt.s32.totalorder %v2857_v33, 1 }
 0x2f4   :  { %vm6556_vm6 = vcmp.le.f32.partialorder %v7881_v40, 0.7853982  ;;  %vm2879_vm10 = vcmp.lt.s32.totalorder %v2857_v33, 4  ;;  %v2860_v25 = vshrl.u32 %v7744_v58, %v2859_v14  ;;  %v2884_v19 = vsel %vm2876_vm3, %v2863_v16, %v2866_v52 }
 0x2f5   :  { %v6564_v29 = vand.u32 8388607, %v7884_v44  ;;  %v2881_v23 = vsel %vm2879_vm10, %v2869_v8, 2102212464  ;;  %v2958_v40 = vadd.s32 1, %v3933_v37  ;;  %v2808_v0 = vclz %v3926_v7 }
 0x2f6   :  { %vm2877_vm9 = vcmp.lt.s32.totalorder %v2857_v33, 2  ;;  %vm2878_vm5 = vcmp.lt.s32.totalorder %v2857_v33, 3  ;;  %v2885_v13 = vsel %vm2879_vm10, %v2872_v9, 920167782  ;;  %v2880_v6 = vsel %vm2876_vm3, %v2860_v25, %v2863_v16 }
 0x2f7   :  { %v2886_v1 = vsel %vm2878_vm5, %v2869_v8, %v2885_v13  ;;  %v2888_v18 = vsel %vm2876_vm3, %v2866_v52, %v2869_v8  ;;  %v2889_v41 = vsel %vm2879_vm10, %v2875_v62, 1326507024  ;;  %v6568_v44 = vpop.eup %4212  ;;  %v3927_v59 = vadd.s32 4294967294, %v2808_v0 }
 0x2f8   :  { %7885 = vst [vmem:[#allocation93_spill] sm:$0xff] %v6568_v44  ;;  %v2882_v61 = vsel %vm2878_vm5, %v2866_v52, %v2881_v23  ;;  %v2887_v46 = vsel %vm2877_vm9, %v2884_v19, %v2886_v1  ;;  %v2890_v2 = vsel %vm2878_vm5, %v2872_v9, %v2889_v41  ;;  %vm2959_vm7 = vcmp.gt.s32.totalorder %v2958_v40, 0 }
 0x2f9   :  { %v2891_v14 = vsel %vm2877_vm9, %v2888_v18, %v2890_v2  ;;  %v6572_v60 = vmul.u32.u64.low %v2892_v27, %v2887_v46  ;;  %v6573_v3 = vmul.u32.u64.high %v2892_v27, %v2887_v46, %v6572_v60  ;;  %vm3928_vm13 = vcmp.lt.s32.totalorder %v3927_v59, 0 }
 0x2fa   :  { %v6576_v37 = vmul.u32.u64.low %v2892_v27, %v2891_v14  ;;  %v6577_v16 = vmul.u32.u64.high %v2892_v27, %v2891_v14, %v6576_v37  ;;  %v2960_v8 = vsel %vm2959_vm7, %v2958_v40, 0  ;;  %v2715_v62 = vor.u32 4788187, %v2714_v55 }
 0x2fb   :  { %v6579_v7 = vsel %vm3928_vm13, 0, %v3927_v59  ;;  %v2883_v0 = vsel %vm2877_vm9, %v2880_v6, %v2882_v61  ;;  %v2962_v52 = vand.u32 31, %v2960_v8  ;;  %4214 = vsinq.f32 %v6510_v15 }
 0x2fc   :  { %v6584_v2 = vand.u32 3, %v6520_v43  ;;  %vm2742_vm8 = vcmp.lt.s32.totalorder %v6341_v35, 0  ;;  %v2816_v25 = vsub.s32 4294967266, %v6579_v7  ;;  %v6594_v55 = vsel %vm2534_vm2, %v2616_v17, %v6523_v63 }
 0x2fd   :  { %v2796_v61 = vadd.s32 %v6476_v30, %v6490_v24  ;;  %v2902_v15 = vadd.s32 1, %v6573_v3  ;;  %v2963_v43 = vsub.s32 32, %v2962_v52  ;;  %v2718_v33 = vcvt.s32.f32 %v6560_v10 }
 0x2fe   :  { %7886 = vst [vmem:[#allocation94_spill] sm:$0xff] %v6584_v2  ;;  %v2899_v23 = vmul.u32 %v2892_v27, %v2883_v0  ;;  %vm2901_vm0 = vc.u32 %v6577_v16, %v6572_v60  ;;  %v2956_v19 = vor.u32 8388608, %v6564_v29  ;;  %v2716_v40 = vand.u32 2147483647, %v2715_v62 }
 0x2ff   :  { %v2903_v13 = vsel %vm2901_vm0, %v2902_v15, %v6573_v3  ;;  %v2966_v17 = vshrl.u32 %v7747_v49, %v2963_v43  ;;  %v2969_v63 = vshrl.u32 %v7748_v11, %v2963_v43  ;;  %v2817_v6 = vadd.s32 127, %v2816_v25 }
 0x300   :  { %v2826_v30 = vsub.s32 4, %v6528_v39  ;;  %v2904_v24 = vadd.s32 %v2903_v13, %v2899_v23  ;;  %v2961_v1 = vshrl.u32 %v2960_v8, 5  ;;  %v2812_v10 = vsub.s32 32, %v6579_v7 }
 0x301   :  { %v2965_v27 = vshll.u32 %v7744_v58, %v2962_v52  ;;  %v2968_v18 = vshll.u32 %v7747_v49, %v2962_v52  ;;  %v2972_v29 = vshrl.u32 %v7737_v12, %v2963_v43  ;;  %v2971_v3 = vshll.u32 %v7748_v11, %v2962_v52 }
 0x302   :  { %v2905_v41 = vadd.s32 536870912, %v2904_v24  ;;  %v2974_v59 = vshll.u32 %v7737_v12, %v2962_v52  ;;  %v2975_v46 = vshrl.u32 %v7738_v5, %v2963_v43  ;;  %v2977_v62 = vshll.u32 %v7738_v5, %v2962_v52 }
 0x303   :  { %v2967_v14 = vor.u32 %v2966_v17, %v2965_v27  ;;  %v2970_v37 = vor.u32 %v2969_v63, %v2968_v18  ;;  %v2978_v8 = vshrl.u32 %v7740_v26, %v2963_v43  ;;  %v2818_v0 = vshll.u32 %v2817_v6, 23 }
 0x304   :  { %v6616_v25 = vshrl.u32 %v2905_v41, 30  ;;  %v2973_v15 = vor.u32 %v2972_v29, %v2971_v3  ;;  %v2976_v23 = vor.u32 %v2975_v46, %v2974_v59  ;;  %v2719_v13 = vmul.f32 %v2718_v33, %v2716_v40  ;;  %v6636_v29 = vpop.f32.mrf.mxu0 }
 0x305   :  { %v6621_v9 = vsel %vm2742_vm8, %v2826_v30, %v6528_v39  ;;  %v2979_v22 = vor.u32 %v2978_v8, %v2977_v62  ;;  %v2996_v54 = vshll.u32 %v2956_v19, 8  ;;  %v7887_v17 = vand.u32 2147483647, %v6341_v35 }
 0x306   :  { %v2814_v52 = vshrl.u32 %v2796_v61, %v2812_v10  ;;  %v2907_v6 = vshll.u32 %v6616_v25, 30  ;;  %vm2980_vm15 = vcmp.lt.s32.totalorder %v2961_v1, 1  ;;  %vm2983_vm1 = vcmp.lt.s32.totalorder %v2961_v1, 4 }
 0x307   :  { %vm6625_vm2 = vcmp.le.f32.partialorder %v7887_v17, 0.7853982  ;;  %v2813_v33 = vshll.u32 %v6540_v28, %v6579_v7  ;;  %v2964_v40 = vshrl.u32 %v7744_v58, %v2963_v43  ;;  %v2988_v39 = vsel %vm2980_vm15, %v2967_v14, %v2970_v37 }
 0x308   :  { %v2989_v30 = vsel %vm2983_vm1, %v2976_v23, 920167782  ;;  %v2819_v19 = vor.u32 4788187, %v2818_v0  ;;  %v6634_v27 = vsub.s32 %v2904_v24, %v2907_v6  ;;  %vm2982_vm4 = vcmp.lt.s32.totalorder %v2961_v1, 3  ;;  %v6638_v61 = vpop.eup %4214 }
 0x309   :  { %v2985_v18 = vsel %vm2983_vm1, %v2973_v15, 2102212464  ;;  %vm2981_vm14 = vcmp.lt.s32.totalorder %v2961_v1, 2  ;;  %v2990_v10 = vsel %vm2982_vm4, %v2973_v15, %v2989_v30  ;;  %v2992_v41 = vsel %vm2980_vm15, %v2970_v37, %v2973_v15 }
 0x30a   :  { %v2993_v3 = vsel %vm2983_vm1, %v2979_v22, 1326507024  ;;  %v2815_v28 = vor.u32 %v2814_v52, %v2813_v33  ;;  %v2910_v7 = vsub.s32 0, %v6634_v27  ;;  %v2984_v43 = vsel %vm2980_vm15, %v2964_v40, %v2967_v14  ;;  %v6651_v52 = vpop.f32.mrf.mxu0 }
 0x30b   :  { %v2991_v59 = vsel %vm2981_vm14, %v2988_v39, %v2990_v10  ;;  %v2986_v24 = vsel %vm2982_vm4, %v2970_v37, %v2985_v18  ;;  %v2994_v46 = vsel %vm2982_vm4, %v2976_v23, %v2993_v3  ;;  %v2720_v0 = vxor.u32 2147483648, %v2719_v13 }
 0x30c   :  { %v6644_v62 = vmul.u32.u64.low %v2996_v54, %v2991_v59  ;;  %v6645_v8 = vmul.u32.u64.high %v2996_v54, %v2991_v59, %v6644_v62  ;;  %v2820_v17 = vand.u32 2147483647, %v2819_v19  ;;  %vm2846_vm3 = vcmp.lt.s32.totalorder %v6444_v50, 0 }
 0x30d   :  { %v3930_v15 = vmin.u32 %v2910_v7, %v6634_v27  ;;  %v2995_v22 = vsel %vm2981_vm14, %v2992_v41, %v2994_v46  ;;  %v7890_v14 = vsel %vm6556_vm6, 0, %v6551_v45  ;;  %v3055_v33 = vand.u32 2139095040, %v6636_v29 }
 0x30e   :  { %v2729_v37 = vadd.s32 3, %v7890_v14  ;;  %v6657_v23 = vmul.u32.u64.low %v2996_v54, %v2995_v22  ;;  %v6658_v6 = vmul.u32.u64.high %v2996_v54, %v2995_v22, %v6657_v23  ;;  %v2620_v40 = vsel %vm6461_vm11, %v6141_v38, %v6594_v55 }
 0x30f   :  { %v2822_v39 = vcvt.s32.f32 %v2815_v28  ;;  %v2912_v30 = vclz %v3930_v15  ;;  %v2987_v19 = vsel %vm2981_vm14, %v2984_v43, %v2986_v24  ;;  %v2829_v18 = vsel %vm6625_vm2, 0, %v6621_v9 }
 0x310   :  { %v7891_v45 = vand.u32 2147483647, %v6444_v50  ;;  %v3006_v41 = vadd.s32 1, %v6645_v8  ;;  %v3056_v3 = vshrl.u32 %v3055_v33, 23  ;;  %v3159_v56 = vand.u32 2139095040, %v6651_v52 }
 0x311   :  { %v2721_v55 = vsel %vm2638_vm12, %v2720_v0, %v2719_v13  ;;  %v2823_v1 = vmul.f32 %v2822_v39, %v2820_v17  ;;  %v3931_v28 = vadd.s32 4294967294, %v2912_v30  ;;  %v2930_v7 = vsub.s32 4, %v6616_v25 }
 0x312   :  { %vm6671_vm10 = vcmp.le.f32.partialorder %v7891_v45, 0.7853982  ;;  %v3003_v43 = vmul.u32 %v2996_v54, %v2987_v19  ;;  %vm3005_vm11 = vc.u32 %v6658_v6, %v6644_v62  ;;  %v3937_v9 = vadd.s32 4294967169, %v3056_v3 }
 0x313   :  { %v3160_v59 = vshrl.u32 %v3159_v56, 23  ;;  %v6682_v24 = vand.u32 3, %v2729_v37  ;;  %vm3932_vm9 = vcmp.lt.s32.totalorder %v3931_v28, 0  ;;  %v3007_v46 = vsel %vm3005_vm11, %v3006_v41, %v6645_v8 }
 0x314   :  { %v7684_v15 = vand.u32 2147483647, %v6636_v29  ;;  %4216 = vcosq.f32 %v2620_v40  ;;  %v2915_v22 = vsel %vm3932_vm9, 0, %v3931_v28  ;;  %v3008_v13 = vadd.s32 %v3007_v46, %v3003_v43 }
 0x315   :  { %7894 = vst [vmem:[#allocation95_spill] sm:$0xff] %v6682_v24  ;;  %v3062_v0 = vadd.s32 1, %v3937_v9  ;;  %4218 = vsinq.f32 %v2620_v40  ;;  %v2724_v54 = vsel %vm6556_vm6, %v6246_v51, %v2721_v55  ;;  %v2824_v17 = vxor.u32 2147483648, %v2823_v1 }
 0x316   :  { %v2833_v14 = vadd.s32 3, %v2829_v18  ;;  %v6692_v37 = vsel %vm2846_vm3, %v2930_v7, %v6616_v25  ;;  %v3009_v23 = vadd.s32 536870912, %v3008_v13  ;;  %v3941_v8 = vadd.s32 4294967169, %v3160_v59 }
 0x317   :  { %vm3063_vm12 = vcmp.gt.s32.totalorder %v3062_v0, 0  ;;  %v2916_v33 = vsub.s32 32, %v2915_v22  ;;  %v3059_v39 = vand.u32 8388607, %v7684_v15  ;;  %v7683_v40 = vand.u32 2147483647, %v6651_v52 }
 0x318   :  { %v3064_v30 = vsel %vm3063_vm12, %v3062_v0, 0  ;;  %4220 = vcosq.f32 %v2724_v54  ;;  %v2920_v42 = vsub.s32 4294967266, %v2915_v22  ;;  %v6697_v19 = vshrl.u32 %v3009_v23, 30 }
 0x319   :  { %v3066_v18 = vand.u32 31, %v3064_v30  ;;  %4222 = vsinq.f32 %v2724_v54  ;;  %v6699_v45 = vand.u32 3, %v2833_v14  ;;  %v2900_v25 = vadd.s32 %v6572_v60, %v6577_v16 }
 0x31a   :  { %v6708_v3 = vsel %vm2742_vm8, %v2824_v17, %v2823_v1  ;;  %v3011_v56 = vshll.u32 %v6697_v19, 30  ;;  %v3166_v28 = vadd.s32 1, %v3941_v8  ;;  %v2917_v7 = vshll.u32 %v6634_v27, %v2915_v22 }
 0x31b   :  { %v3067_v55 = vsub.s32 32, %v3066_v18  ;;  %v2918_v43 = vshrl.u32 %v2900_v25, %v2916_v33  ;;  %v3060_v9 = vor.u32 8388608, %v3059_v39  ;;  %v6714_v59 = vand.u32 8388607, %v7683_v40 }
 0x31c   :  { %v2921_v60 = vadd.s32 127, %v2920_v42  ;;  %v6716_v16 = vsub.s32 %v3008_v13, %v3011_v56  ;;  %v3069_v46 = vshll.u32 %v7744_v58, %v3066_v18  ;;  %v3072_v0 = vshll.u32 %v7747_v49, %v3066_v18 }
 0x31d   :  { %v3070_v1 = vshrl.u32 %v7747_v49, %v3067_v55  ;;  %v3073_v54 = vshrl.u32 %v7748_v11, %v3067_v55  ;;  %v3075_v17 = vshll.u32 %v7748_v11, %v3066_v18  ;;  %v3076_v27 = vshrl.u32 %v7737_v12, %v3067_v55 }
 0x31e   :  { %v3014_v22 = vsub.s32 0, %v6716_v16  ;;  %v3065_v14 = vshrl.u32 %v3064_v30, 5  ;;  %vm3167_vm6 = vcmp.gt.s32.totalorder %v3166_v28, 0  ;;  %v3078_v33 = vshll.u32 %v7737_v12, %v3066_v18 }
 0x31f   :  { %v3071_v23 = vor.u32 %v3070_v1, %v3069_v46  ;;  %v3074_v8 = vor.u32 %v3073_v54, %v3072_v0  ;;  %v3077_v13 = vor.u32 %v3076_v27, %v3075_v17  ;;  %v3079_v39 = vshrl.u32 %v7738_v5, %v3067_v55 }
 0x320   :  { %v2922_v42 = vshll.u32 %v2921_v60, 23  ;;  %v3934_v25 = vmin.u32 %v3014_v22, %v6716_v16  ;;  %v3081_v56 = vshll.u32 %v7738_v5, %v3066_v18  ;;  %v3082_v40 = vshrl.u32 %v7740_v26, %v3067_v55 }
 0x321   :  { %v6730_v15 = vpop.eup %4216  ;;  %v2919_v41 = vor.u32 %v2918_v43, %v2917_v7  ;;  %v3004_v30 = vadd.s32 %v6644_v62, %v6658_v6  ;;  %v3080_v46 = vor.u32 %v3079_v39, %v3078_v33  ;;  %v3100_v1 = vshll.u32 %v3060_v9, 8 }
 0x322   :  { %7895 = vst [vmem:[#allocation96_spill] sm:$0xff] %v6730_v15  ;;  %v6734_v0 = vpop.eup %4218  ;;  %v3016_v54 = vclz %v3934_v25  ;;  %v3083_v17 = vor.u32 %v3082_v40, %v3081_v56  ;;  %vm3084_vm5 = vcmp.lt.s32.totalorder %v3065_v14, 1  ;;  %vm3087_vm7 = vcmp.lt.s32.totalorder %v3065_v14, 4 }
 0x323   :  { %7896 = vst [vmem:[#allocation97_spill] sm:$0xff] %v6734_v0  ;;  %v3068_v60 = vshrl.u32 %v7744_v58, %v3067_v55  ;;  %v3089_v18 = vsel %vm3087_vm7, %v3077_v13, 2102212464  ;;  %v3092_v27 = vsel %vm3084_vm5, %v3071_v23, %v3074_v8  ;;  %v3168_v22 = vsel %vm3167_vm6, %v3166_v28, 0 }
 0x324   :  { %v2923_v31 = vor.u32 4788187, %v2922_v42  ;;  %v3935_v7 = vadd.s32 4294967294, %v3016_v54  ;;  %vm3086_vm13 = vcmp.lt.s32.totalorder %v3065_v14, 3  ;;  %v3093_v62 = vsel %vm3087_vm7, %v3080_v46, 920167782 }
 0x325   :  { %v6740_v6 = vpop.eup %4220  ;;  %vm3085_vm8 = vcmp.lt.s32.totalorder %v3065_v14, 2  ;;  %v3088_v43 = vsel %vm3084_vm5, %v3068_v60, %v3071_v23  ;;  %v3094_v9 = vsel %vm3086_vm13, %v3077_v13, %v3093_v62  ;;  %v3096_v40 = vsel %vm3084_vm5, %v3074_v8, %v3077_v13 }
 0x326   :  { %7897 = vst [vmem:[#allocation98_spill] sm:$0xff] %v6740_v6  ;;  %v6742_v33 = vpop.eup %4222  ;;  %vm3936_vm0 = vcmp.lt.s32.totalorder %v3935_v7, 0  ;;  %v3090_v55 = vsel %vm3086_vm13, %v3074_v8, %v3089_v18  ;;  %v3095_v39 = vsel %vm3085_vm8, %v3092_v27, %v3094_v9  ;;  %v3097_v25 = vsel %vm3087_vm7, %v3083_v17, 1326507024 }
 0x327   :  { %7898 = vst [vmem:[#allocation99_spill] sm:$0xff] %v6742_v33  ;;  %v3019_v28 = vsel %vm3936_vm0, 0, %v3935_v7  ;;  %v3098_v42 = vsel %vm3086_vm13, %v3080_v46, %v3097_v25  ;;  %v6746_v56 = vmul.u32.u64.low %v3100_v1, %v3095_v39  ;;  %v6747_v54 = vmul.u32.u64.high %v3100_v1, %v3095_v39, %v6746_v56 }
 0x328   :  { %v2924_v47 = vand.u32 2147483647, %v2923_v31  ;;  %v3020_v57 = vsub.s32 32, %v3019_v28  ;;  %v3024_v32 = vsub.s32 4294967266, %v3019_v28  ;;  %v3099_v23 = vsel %vm3085_vm8, %v3096_v40, %v3098_v42 }
 0x329   :  { %v7899_v13 = vsel %vm6671_vm10, 0, %v6692_v37  ;;  %v3091_v60 = vsel %vm3085_vm8, %v3088_v43, %v3090_v55  ;;  %v6758_v17 = vmul.u32.u64.low %v3100_v1, %v3099_v23  ;;  %v6759_v18 = vmul.u32.u64.high %v3100_v1, %v3099_v23, %v6758_v17 }
 0x32a   :  { %v6755_v8 = vadd.s32 3, %v7899_v13  ;;  %v2926_v46 = vcvt.s32.f32 %v2919_v41  ;;  %v3022_v27 = vshrl.u32 %v3004_v30, %v3020_v57  ;;  %v3025_v7 = vadd.s32 127, %v3024_v32 }
 0x32b   :  { %v3170_v62 = vand.u32 31, %v3168_v22  ;;  %v6765_v31 = vsel %vm6625_vm2, %v6341_v35, %v6708_v3  ;;  %v3021_v9 = vshll.u32 %v6716_v16, %v3019_v28  ;;  %v3110_v37 = vadd.s32 1, %v6747_v54  ;;  %v6781_v28 = vpop.f32.mrf.mxu0 }
 0x32c   :  { %v3164_v14 = vor.u32 8388608, %v6714_v59  ;;  %v2927_v43 = vmul.f32 %v2926_v46, %v2924_v47  ;;  %v3026_v40 = vshll.u32 %v3025_v7, 23  ;;  %v3107_v55 = vmul.u32 %v3100_v1, %v3091_v60 }
 0x32d   :  { %v3171_v39 = vsub.s32 32, %v3170_v62  ;;  %v3023_v41 = vor.u32 %v3022_v27, %v3021_v9  ;;  %vm3109_vm15 = vc.u32 %v6759_v18, %v6746_v56  ;;  %v6772_v32 = vshrl.u32 %v3168_v22, 5 }
 0x32e   :  { %v3173_v57 = vshll.u32 %v7744_v58, %v3170_v62  ;;  %v3027_v63 = vor.u32 4788187, %v3026_v40  ;;  %v3111_v3 = vsel %vm3109_vm15, %v3110_v37, %v6747_v54  ;;  %v3176_v16 = vshll.u32 %v7747_v49, %v3170_v62 }
 0x32f   :  { %v3179_v30 = vshll.u32 %v7748_v11, %v3170_v62  ;;  %v3112_v59 = vadd.s32 %v3111_v3, %v3107_v55  ;;  %v3174_v47 = vshrl.u32 %v7747_v49, %v3171_v39  ;;  %v3177_v1 = vshrl.u32 %v7748_v11, %v3171_v39 }
 0x330   :  { %v3180_v25 = vshrl.u32 %v7737_v12, %v3171_v39  ;;  %v2928_v22 = vxor.u32 2147483648, %v2927_v43  ;;  %v3028_v42 = vand.u32 2147483647, %v3027_v63  ;;  %v3182_v23 = vshll.u32 %v7737_v12, %v3170_v62 }
 0x331   :  { %v3183_v13 = vshrl.u32 %v7738_v5, %v3171_v39  ;;  %v3113_v54 = vadd.s32 536870912, %v3112_v59  ;;  %v3175_v60 = vor.u32 %v3174_v47, %v3173_v57  ;;  %v3178_v17 = vor.u32 %v3177_v1, %v3176_v16 }
 0x332   :  { %v3181_v46 = vor.u32 %v3180_v25, %v3179_v30  ;;  %v3185_v7 = vshll.u32 %v7738_v5, %v3170_v62  ;;  %v3186_v9 = vshrl.u32 %v7740_v26, %v3171_v39  ;;  %v3263_v37 = vand.u32 2139095040, %v6781_v28 }
 0x333   :  { %v3184_v27 = vor.u32 %v3183_v13, %v3182_v23  ;;  %v3030_v40 = vcvt.s32.f32 %v3023_v41  ;;  %v6788_v55 = vshrl.u32 %v3113_v54, 30  ;;  %vm3188_vm2 = vcmp.lt.s32.totalorder %v6772_v32, 1 }
 0x334   :  { %vm3191_vm1 = vcmp.lt.s32.totalorder %v6772_v32, 4  ;;  %vm2950_vm4 = vcmp.lt.s32.totalorder %v6492_v4, 0  ;;  %v3187_v63 = vor.u32 %v3186_v9, %v3185_v7  ;;  %vm3190_vm14 = vcmp.lt.s32.totalorder %v6772_v32, 3 }
 0x335   :  { %v3196_v57 = vsel %vm3188_vm2, %v3175_v60, %v3178_v17  ;;  %v3197_v62 = vsel %vm3191_vm1, %v3184_v27, 920167782  ;;  %v3031_v3 = vmul.f32 %v3030_v40, %v3028_v42  ;;  %v3115_v16 = vshll.u32 %v6788_v55, 30 }
 0x336   :  { %vm3189_vm11 = vcmp.lt.s32.totalorder %v6772_v32, 2  ;;  %v3198_v41 = vsel %vm3190_vm14, %v3181_v46, %v3197_v62  ;;  %v3172_v30 = vshrl.u32 %v7744_v58, %v3171_v39  ;;  %v3193_v47 = vsel %vm3191_vm1, %v3181_v46, 2102212464 }
 0x337   :  { %v3200_v1 = vsel %vm3188_vm2, %v3178_v17, %v3181_v46  ;;  %v3201_v25 = vsel %vm3191_vm1, %v3187_v63, 1326507024  ;;  %v6803_v23 = vsub.s32 %v3112_v59, %v3115_v16  ;;  %v3199_v13 = vsel %vm3189_vm11, %v3196_v57, %v3198_v41 }
 0x338   :  { %v3202_v42 = vsel %vm3190_vm14, %v3184_v27, %v3201_v25  ;;  %v3204_v54 = vshll.u32 %v3164_v14, 8  ;;  %v2929_v7 = vsel %vm2846_vm3, %v2928_v22, %v2927_v43  ;;  %v7900_v9 = vand.u32 2147483647, %v6492_v4 }
 0x339   :  { %v3034_v46 = vsub.s32 4, %v6697_v19  ;;  %v3192_v59 = vsel %vm3188_vm2, %v3172_v30, %v3175_v60  ;;  %v3203_v40 = vsel %vm3189_vm11, %v3200_v1, %v3202_v42  ;;  %v3032_v63 = vxor.u32 2147483648, %v3031_v3 }
 0x33a   :  { %vm6813_vm9 = vcmp.le.f32.partialorder %v7900_v9, 0.7853982  ;;  %v3118_v14 = vsub.s32 0, %v6803_v23  ;;  %v3194_v43 = vsel %vm3190_vm14, %v3178_v17, %v3193_v47  ;;  %v3264_v22 = vshrl.u32 %v3263_v37, 23 }
 0x33b   :  { %v6825_v27 = vmul.u32.u64.low %v3204_v54, %v3203_v40  ;;  %v6826_v57 = vmul.u32.u64.high %v3204_v54, %v3203_v40, %v6825_v27  ;;  %v6828_v62 = vmul.u32.u64.low %v3204_v54, %v3199_v13  ;;  %v6829_v16 = vmul.u32.u64.high %v3204_v54, %v3199_v13, %v6828_v62  ;;  %v6850_v13 = vpop.f32.mrf.mxu0 }
 0x33c   :  { %v2932_v60 = vsel %vm6671_vm10, %v6444_v50, %v2929_v7  ;;  %vm3054_vm3 = vcmp.lt.s32.totalorder %v6636_v29, 0  ;;  %v3938_v41 = vmin.u32 %v3118_v14, %v6803_v23  ;;  %v3945_v30 = vadd.s32 4294967169, %v3264_v22 }
 0x33d   :  { %4224 = vcosq.f32 %v6765_v31  ;;  %v6839_v17 = vand.u32 3, %v6755_v8  ;;  %v3195_v37 = vsel %vm3189_vm11, %v3192_v59, %v3194_v43  ;;  %v7690_v47 = vand.u32 2147483647, %v6781_v28 }
 0x33e   :  { %4226 = vsinq.f32 %v6765_v31  ;;  %v6848_v10 = vsel %vm2950_vm4, %v3034_v46, %v6697_v19  ;;  %v3120_v1 = vclz %v3938_v41  ;;  %v3270_v25 = vadd.s32 1, %v3945_v30 }
 0x33f   :  { %4228 = vcosq.f32 %v2932_v60  ;;  %v3033_v8 = vsel %vm2950_vm4, %v3032_v63, %v3031_v3  ;;  %vm3213_vm10 = vc.u32 %v6826_v57, %v6828_v62  ;;  %v3214_v32 = vadd.s32 1, %v6829_v16 }
 0x340   :  { %v3939_v42 = vadd.s32 4294967294, %v3120_v1  ;;  %v3138_v31 = vsub.s32 4, %v6788_v55  ;;  %v3211_v7 = vmul.u32 %v3204_v54, %v3195_v37  ;;  %vm3271_vm12 = vcmp.gt.s32.totalorder %v3270_v25, 0 }
 0x341   :  { %v3215_v19 = vsel %vm3213_vm10, %v3214_v32, %v6829_v16  ;;  %v3267_v9 = vand.u32 8388607, %v7690_v47  ;;  %v3272_v46 = vsel %vm3271_vm12, %v3270_v25, 0  ;;  %v3367_v59 = vand.u32 2139095040, %v6850_v13 }
 0x342   :  { %v6865_v3 = vsel %vm6813_vm9, %v6492_v4, %v3033_v8  ;;  %vm3940_vm6 = vcmp.lt.s32.totalorder %v3939_v42, 0  ;;  %v3216_v40 = vadd.s32 %v3215_v19, %v3211_v7  ;;  %v3274_v63 = vand.u32 31, %v3272_v46 }
 0x343   :  { %4230 = vsinq.f32 %v2932_v60  ;;  %v3108_v14 = vadd.s32 %v6746_v56, %v6759_v18  ;;  %v3123_v43 = vsel %vm3940_vm6, 0, %v3939_v42  ;;  %v6875_v16 = vsel %vm3054_vm3, %v3138_v31, %v6788_v55 }
 0x344   :  { %v3124_v22 = vsub.s32 32, %v3123_v43  ;;  %v3128_v27 = vsub.s32 4294967266, %v3123_v43  ;;  %v3217_v41 = vadd.s32 536870912, %v3216_v40  ;;  %4232 = vcosq.f32 %v6865_v3 }
 0x345   :  { %v3268_v30 = vor.u32 8388608, %v3267_v9  ;;  %v3275_v60 = vsub.s32 32, %v3274_v63  ;;  %v3368_v37 = vshrl.u32 %v3367_v59, 23  ;;  %v3273_v32 = vshrl.u32 %v3272_v46, 5 }
 0x346   :  { %v3126_v1 = vshrl.u32 %v3108_v14, %v3124_v22  ;;  %v3129_v25 = vadd.s32 127, %v3128_v27  ;;  %v6878_v8 = vshrl.u32 %v3217_v41, 30  ;;  %v3125_v56 = vshll.u32 %v6803_v23, %v3123_v43 }
 0x347   :  { %v3278_v18 = vshrl.u32 %v7747_v49, %v3275_v60  ;;  %v3281_v42 = vshrl.u32 %v7748_v11, %v3275_v60  ;;  %v3284_v55 = vshrl.u32 %v7737_v12, %v3275_v60  ;;  %v3277_v19 = vshll.u32 %v7744_v58, %v3274_v63 }
 0x348   :  { %v3130_v31 = vshll.u32 %v3129_v25, 23  ;;  %v3219_v7 = vshll.u32 %v6878_v8, 30  ;;  %v3280_v9 = vshll.u32 %v7747_v49, %v3274_v63  ;;  %v7903_v59 = vand.u32 2147483647, %v6636_v29 }
 0x349   :  { %v3127_v23 = vor.u32 %v3126_v1, %v3125_v56  ;;  %v3283_v46 = vshll.u32 %v7748_v11, %v3274_v63  ;;  %v3286_v43 = vshll.u32 %v7737_v12, %v3274_v63  ;;  %v3287_v22 = vshrl.u32 %v7738_v5, %v3275_v60 }
 0x34a   :  { %vm6889_vm5 = vcmp.le.f32.partialorder %v7903_v59, 0.7853982  ;;  %v6896_v27 = vpop.eup %4224  ;;  %v3131_v41 = vor.u32 4788187, %v3130_v31  ;;  %v6898_v25 = vsub.s32 %v3216_v40, %v3219_v7  ;;  %v3279_v54 = vor.u32 %v3278_v18, %v3277_v19 }
 0x34b   :  { %v3282_v47 = vor.u32 %v3281_v42, %v3280_v9  ;;  %v6900_v15 = vpop.eup %4226  ;;  %v3285_v59 = vor.u32 %v3284_v55, %v3283_v46  ;;  %v3288_v0 = vor.u32 %v3287_v22, %v3286_v43  ;;  %v3289_v2 = vshll.u32 %v7738_v5, %v3274_v63 }
 0x34c   :  { %v3290_v1 = vshrl.u32 %v7740_v26, %v3275_v60  ;;  %v6904_v56 = vpop.eup %4228  ;;  %v3222_v38 = vsub.s32 0, %v6898_v25  ;;  %v6907_v36 = vshll.u32 %v3268_v30, 8  ;;  %v3949_v40 = vadd.s32 4294967169, %v3368_v37 }
 0x34d   :  { %v3132_v7 = vand.u32 2147483647, %v3131_v41  ;;  %v3134_v18 = vcvt.s32.f32 %v3127_v23  ;;  %v3276_v42 = vshrl.u32 %v7744_v58, %v3275_v60  ;;  %vm3292_vm7 = vcmp.lt.s32.totalorder %v3273_v32, 1 }
 0x34e   :  { %v3291_v19 = vor.u32 %v3290_v1, %v3289_v2  ;;  %v3942_v55 = vmin.u32 %v3222_v38, %v6898_v25  ;;  %vm3293_vm13 = vcmp.lt.s32.totalorder %v3273_v32, 2  ;;  %vm3295_vm8 = vcmp.lt.s32.totalorder %v3273_v32, 4 }
 0x34f   :  { %vm3294_vm0 = vcmp.lt.s32.totalorder %v3273_v32, 3  ;;  %v3297_v63 = vsel %vm3295_vm8, %v3285_v59, 2102212464  ;;  %v3300_v9 = vsel %vm3292_vm7, %v3279_v54, %v3282_v47  ;;  %v3301_v46 = vsel %vm3295_vm8, %v3288_v0, 920167782 }
 0x350   :  { %v6912_v43 = vpop.eup %4230  ;;  %vm3158_vm15 = vcmp.lt.s32.totalorder %v6651_v52, 0  ;;  %v3224_v30 = vclz %v3942_v55  ;;  %v3296_v37 = vsel %vm3292_vm7, %v3276_v42, %v3279_v54  ;;  %v3302_v23 = vsel %vm3294_vm0, %v3285_v59, %v3301_v46 }
 0x351   :  { %v3304_v22 = vsel %vm3292_vm7, %v3282_v47, %v3285_v59  ;;  %v3298_v2 = vsel %vm3294_vm0, %v3282_v47, %v3297_v63  ;;  %v3303_v38 = vsel %vm3293_vm13, %v3300_v9, %v3302_v23  ;;  %v3305_v60 = vsel %vm3295_vm8, %v3291_v19, 1326507024  ;;  %v6918_v1 = vpop.eup %4232  ;;  %v6937_v19 = vpop.f32.mrf.mxu0 }
 0x352   :  { %v3374_v41 = vadd.s32 1, %v3949_v40  ;;  %v3135_v31 = vmul.f32 %v3134_v18, %v3132_v7  ;;  %v3943_v48 = vadd.s32 4294967294, %v3224_v30  ;;  %v3306_v55 = vsel %vm3294_vm0, %v3288_v0, %v3305_v60 }
 0x353   :  { %v3212_v54 = vadd.s32 %v6828_v62, %v6826_v57  ;;  %v3307_v59 = vsel %vm3293_vm13, %v3304_v22, %v3306_v55  ;;  %v6928_v47 = vmul.u32.u64.low %v6907_v36, %v3303_v38  ;;  %v6929_v42 = vmul.u32.u64.high %v6907_v36, %v3303_v38, %v6928_v47 }
 0x354   :  { %vm3944_vm2 = vcmp.lt.s32.totalorder %v3943_v48, 0  ;;  %v3299_v40 = vsel %vm3293_vm13, %v3296_v37, %v3298_v2  ;;  %v6934_v7 = vmul.u32.u64.low %v6907_v36, %v3307_v59  ;;  %v6935_v18 = vmul.u32.u64.high %v6907_v36, %v3307_v59, %v6934_v7 }
 0x355   :  { %v3227_v0 = vsel %vm3944_vm2, 0, %v3943_v48  ;;  %v3242_v63 = vsub.s32 4, %v6878_v8  ;;  %v7906_v57 = vand.u32 2147483647, %v6850_v13  ;;  %vm3375_vm1 = vcmp.gt.s32.totalorder %v3374_v41, 0 }
 0x356   :  { %v3136_v9 = vxor.u32 2147483648, %v3135_v31  ;;  %v3228_v46 = vsub.s32 32, %v3227_v0  ;;  %v3232_v30 = vsub.s32 4294967266, %v3227_v0  ;;  %v3376_v23 = vsel %vm3375_vm1, %v3374_v41, 0 }
 0x357   :  { %v3371_v62 = vand.u32 8388607, %v7906_v57  ;;  %v7907_v32 = vand.u32 2147483647, %v6651_v52  ;;  %v3315_v22 = vmul.u32 %v6907_v36, %v3299_v40  ;;  %v3318_v48 = vadd.s32 1, %v6929_v42 }
 0x358   :  { %v3378_v2 = vand.u32 31, %v3376_v23  ;;  %v3229_v60 = vshll.u32 %v6898_v25, %v3227_v0  ;;  %v3230_v55 = vshrl.u32 %v3212_v54, %v3228_v46  ;;  %v3233_v59 = vadd.s32 127, %v3232_v30 }
 0x359   :  { %vm6944_vm4 = vcmp.le.f32.partialorder %v7907_v32, 0.7853982  ;;  %vm3317_vm14 = vc.u32 %v6935_v18, %v6928_v47  ;;  %v6957_v41 = vsel %vm3158_vm15, %v3242_v63, %v6878_v8  ;;  %v3372_v36 = vor.u32 8388608, %v3371_v62 }
 0x35a   :  { %v3319_v7 = vsel %vm3317_vm14, %v3318_v48, %v6929_v42  ;;  %v3379_v40 = vsub.s32 32, %v3378_v2  ;;  %v3137_v57 = vsel %vm3054_vm3, %v3136_v9, %v3135_v31  ;;  %v3231_v32 = vor.u32 %v3230_v55, %v3229_v60 }
 0x35b   :  { %v3234_v38 = vshll.u32 %v3233_v59, 23  ;;  %v3320_v25 = vadd.s32 %v3319_v7, %v3315_v22  ;;  %v3377_v54 = vshrl.u32 %v3376_v23, 5  ;;  %v3381_v63 = vshll.u32 %v7744_v58, %v3378_v2 }
 0x35c   :  { %v3382_v0 = vshrl.u32 %v7747_v49, %v3379_v40  ;;  %v3385_v46 = vshrl.u32 %v7748_v11, %v3379_v40  ;;  %v3388_v30 = vshrl.u32 %v7737_v12, %v3379_v40  ;;  %v3384_v42 = vshll.u32 %v7747_v49, %v3378_v2 }
 0x35d   :  { %v3235_v34 = vor.u32 4788187, %v3234_v38  ;;  %v3321_v8 = vadd.s32 536870912, %v3320_v25  ;;  %v3238_v62 = vcvt.s32.f32 %v3231_v32  ;;  %vm3262_vm11 = vcmp.lt.s32.totalorder %v6781_v28, 0 }
 0x35e   :  { %v3387_v31 = vshll.u32 %v7748_v11, %v3378_v2  ;;  %v3390_v9 = vshll.u32 %v7737_v12, %v3378_v2  ;;  %v3391_v23 = vshrl.u32 %v7738_v5, %v3379_v40  ;;  %v3393_v60 = vshll.u32 %v7738_v5, %v3378_v2 }
 0x35f   :  { %v3236_v22 = vand.u32 2147483647, %v3235_v34  ;;  %v3322_v48 = vshrl.u32 %v3321_v8, 30  ;;  %v3394_v38 = vshrl.u32 %v7740_v26, %v3379_v40  ;;  %v3383_v55 = vor.u32 %v3382_v0, %v3381_v63 }
 0x360   :  { %v3386_v59 = vor.u32 %v3385_v46, %v3384_v42  ;;  %v3389_v7 = vor.u32 %v3388_v30, %v3387_v31  ;;  %v3392_v53 = vor.u32 %v3391_v23, %v3390_v9  ;;  %v3245_v32 = vsel %vm6944_vm4, 0, %v6957_v41 }
 0x361   :  { %v3239_v6 = vmul.f32 %v3238_v62, %v3236_v22  ;;  %v3323_v24 = vshll.u32 %v3322_v48, 30  ;;  %v3395_v33 = vor.u32 %v3394_v38, %v3393_v60  ;;  %v3140_v34 = vsel %vm6889_vm5, %v6636_v29, %v3137_v57 }
 0x362   :  { %v3380_v8 = vshrl.u32 %v7744_v58, %v3379_v40  ;;  %vm3396_vm3 = vcmp.lt.s32.totalorder %v3377_v54, 1  ;;  %v3412_v2 = vshll.u32 %v3372_v36, 8  ;;  %v7910_v0 = vand.u32 2147483647, %v6781_v28 }
 0x363   :  { %v3240_v51 = vxor.u32 2147483648, %v3239_v6  ;;  %v6986_v30 = vsub.s32 %v3320_v25, %v3323_v24  ;;  %v3346_v41 = vsub.s32 4, %v3322_v48  ;;  %vm3399_vm12 = vcmp.lt.s32.totalorder %v3377_v54, 4 }
 0x364   :  { %vm6982_vm10 = vcmp.le.f32.partialorder %v7910_v0, 0.7853982  ;;  %v3401_v63 = vsel %vm3399_vm12, %v3389_v7, 2102212464  ;;  %v3404_v42 = vsel %vm3396_vm3, %v3383_v55, %v3386_v59  ;;  %v3405_v62 = vsel %vm3399_vm12, %v3392_v53, 920167782 }
 0x365   :  { %v3409_v57 = vsel %vm3399_vm12, %v3395_v33, 1326507024  ;;  %v3326_v40 = vsub.s32 0, %v6986_v30  ;;  %vm3398_vm6 = vcmp.lt.s32.totalorder %v3377_v54, 3  ;;  %v3408_v36 = vsel %vm3396_vm3, %v3386_v59, %v3389_v7 }
 0x366   :  { %v3471_v31 = vand.u32 2139095040, %v6937_v19  ;;  %vm3397_vm7 = vcmp.lt.s32.totalorder %v3377_v54, 2  ;;  %v3400_v9 = vsel %vm3396_vm3, %v3380_v8, %v3383_v55  ;;  %v3406_v23 = vsel %vm3398_vm6, %v3389_v7, %v3405_v62 }
 0x367   :  { %v3410_v24 = vsel %vm3398_vm6, %v3392_v53, %v3409_v57  ;;  %v3946_v25 = vmin.u32 %v3326_v40, %v6986_v30  ;;  %v3347_v22 = vsel %vm3262_vm11, %v3346_v41, %v3322_v48  ;;  %v3402_v60 = vsel %vm3398_vm6, %v3386_v59, %v3401_v63 }
 0x368   :  { %v3407_v33 = vsel %vm3397_vm7, %v3404_v42, %v3406_v23  ;;  %v3241_v38 = vsel %vm3158_vm15, %v3240_v51, %v3239_v6  ;;  %v3411_v0 = vsel %vm3397_vm7, %v3408_v36, %v3410_v24  ;;  %v3472_v53 = vshrl.u32 %v3471_v31, 23 }
 0x369   :  { %v7000_v21 = vmul.u32.u64.low %v3412_v2, %v3407_v33  ;;  %v7001_v20 = vmul.u32.u64.high %v3412_v2, %v3407_v33, %v7000_v21  ;;  %v3328_v44 = vclz %v3946_v25  ;;  %4234 = vsinq.f32 %v6865_v3 }
 0x36a   :  { %v7003_v55 = vmul.u32.u64.low %v3412_v2, %v3411_v0  ;;  %v7004_v7 = vmul.u32.u64.high %v3412_v2, %v3411_v0, %v7003_v55  ;;  %v7913_v48 = vsel %vm6813_vm9, 0, %v6848_v10  ;;  %v7914_v51 = vsel %vm6889_vm5, 0, %v6875_v16 }
 0x36b   :  { %v7011_v59 = vadd.s32 3, %v7913_v48  ;;  %v7017_v6 = vadd.s32 3, %v7914_v51  ;;  %v3403_v8 = vsel %vm3397_vm7, %v3400_v9, %v3402_v60  ;;  %4236 = vcosq.f32 %v3140_v34 }
 0x36c   :  { %v3249_v41 = vadd.s32 3, %v3245_v32  ;;  %v3947_v63 = vadd.s32 4294967294, %v3328_v44  ;;  %v3953_v42 = vadd.s32 4294967169, %v3472_v53  ;;  %v3244_v39 = vsel %vm6944_vm4, %v6651_v52, %v3241_v38 }
 0x36d   :  { %v3349_v10 = vsel %vm6982_vm10, 0, %v3347_v22  ;;  %v3422_v3 = vadd.s32 1, %v7001_v20  ;;  %v7915_v14 = vand.u32 2147483647, %v6937_v19  ;;  %v3419_v62 = vmul.u32 %v3412_v2, %v3403_v8 }
 0x36e   :  { %vm3948_vm9 = vcmp.lt.s32.totalorder %v3947_v63, 0  ;;  %vm3421_vm5 = vc.u32 %v7004_v7, %v7000_v21  ;;  %v3478_v54 = vadd.s32 1, %v3953_v42  ;;  %4238 = vsinq.f32 %v3140_v34 }
 0x36f   :  { %v3475_v16 = vand.u32 8388607, %v7915_v14  ;;  %v3316_v44 = vadd.s32 %v6928_v47, %v6935_v18  ;;  %v3331_v32 = vsel %vm3948_vm9, 0, %v3947_v63  ;;  %v3423_v37 = vsel %vm3421_vm5, %v3422_v3, %v7001_v20 }
 0x370   :  { %v3332_v57 = vsub.s32 32, %v3331_v32  ;;  %v3336_v40 = vsub.s32 4294967266, %v3331_v32  ;;  %v3353_v36 = vadd.s32 3, %v3349_v10  ;;  %vm3366_vm13 = vcmp.lt.s32.totalorder %v6850_v13, 0 }
 0x371   :  { %v3424_v31 = vadd.s32 %v3423_v37, %v3419_v62  ;;  %4240 = vcosq.f32 %v3244_v39  ;;  %v3333_v9 = vshll.u32 %v6986_v30, %v3331_v32  ;;  %v3476_v2 = vor.u32 8388608, %v3475_v16 }
 0x372   :  { %vm3479_vm8 = vcmp.gt.s32.totalorder %v3478_v54, 0  ;;  %v3334_v23 = vshrl.u32 %v3316_v44, %v3332_v57  ;;  %v3337_v24 = vadd.s32 127, %v3336_v40  ;;  %4242 = vsinq.f32 %v3244_v39 }
 0x373   :  { %v3425_v34 = vadd.s32 536870912, %v3424_v31  ;;  %v3480_v25 = vsel %vm3479_vm8, %v3478_v54, 0  ;;  %v7034_v47 = vand.u32 3, %v3249_v41  ;;  %v7916_v20 = vand.u32 2147483647, %v6850_v13 }
 0x374   :  { %v3482_v22 = vand.u32 31, %v3480_v25  ;;  %v3335_v60 = vor.u32 %v3334_v23, %v3333_v9  ;;  %v3338_v33 = vshll.u32 %v3337_v24, 23  ;;  %v7042_v38 = vand.u32 3, %v3353_v36 }
 0x375   :  { %vm7038_vm0 = vcmp.le.f32.partialorder %v7916_v20, 0.7853982  ;;  %v3426_v30 = vshrl.u32 %v3425_v34, 30  ;;  %v7045_v0 = vadd.s32 %v7000_v21, %v7004_v7  ;;  %v7047_v55 = vshrl.u32 %v3480_v25, 5 }
 0x376   :  { %v3483_v53 = vsub.s32 32, %v3482_v22  ;;  %v7049_v48 = vshll.u32 %v3476_v2, 8  ;;  %v3339_v51 = vor.u32 4788187, %v3338_v33  ;;  %v3485_v63 = vshll.u32 %v7744_v58, %v3482_v22  ;;  %v7056_v21 = vpop.eup %4234 }
 0x377   :  { %v3427_v8 = vshll.u32 %v3426_v30, 30  ;;  %v3450_v41 = vsub.s32 4, %v3426_v30  ;;  %v3488_v39 = vshll.u32 %v7747_v49, %v3482_v22  ;;  %v3342_v14 = vcvt.s32.f32 %v3335_v60 }
 0x378   :  { %v3486_v42 = vshrl.u32 %v7747_v49, %v3483_v53  ;;  %v3489_v10 = vshrl.u32 %v7748_v11, %v3483_v53  ;;  %v3492_v3 = vshrl.u32 %v7737_v12, %v3483_v53  ;;  %v3340_v7 = vand.u32 2147483647, %v3339_v51  ;;  %v7061_v54 = vpop.eup %4236 }
 0x379   :  { %v7058_v16 = vsub.s32 %v3424_v31, %v3427_v8  ;;  %v3491_v62 = vshll.u32 %v7748_v11, %v3482_v22  ;;  %v3451_v44 = vsel %vm3366_vm13, %v3450_v41, %v3426_v30  ;;  %v3494_v49 = vshll.u32 %v7737_v12, %v3482_v22 }
 0x37a   :  { %v3487_v32 = vor.u32 %v3486_v42, %v3485_v63  ;;  %v3490_v37 = vor.u32 %v3489_v10, %v3488_v39  ;;  %v3343_v57 = vmul.f32 %v3342_v14, %v3340_v7  ;;  %v3495_v9 = vshrl.u32 %v7738_v5, %v3483_v53 }
 0x37b   :  { %v3430_v40 = vsub.s32 0, %v7058_v16  ;;  %v3493_v36 = vor.u32 %v3492_v3, %v3491_v62  ;;  %v3484_v31 = vshrl.u32 %v7744_v58, %v3483_v53  ;;  %v3497_v2 = vshll.u32 %v7738_v5, %v3482_v22  ;;  %v7072_v24 = vpop.eup %4238 }
 0x37c   :  { %v3498_v11 = vshrl.u32 %v7740_v26, %v3483_v53  ;;  %v2941_v23 = vxor.u32 2147483648, %v6912_v43  ;;  %v3344_v34 = vxor.u32 2147483648, %v3343_v57  ;;  %v3453_v12 = vsel %vm7038_vm0, 0, %v3451_v44 }
 0x37d   :  { %v3950_v25 = vmin.u32 %v3430_v40, %v7058_v16  ;;  %v3496_v20 = vor.u32 %v3495_v9, %v3494_v49  ;;  %vm3252_vm15 = vcmp.eq.s32.totalorder %v7034_v47, 0  ;;  %vm3255_vm2 = vcmp.eq.s32.totalorder %v7034_v47, 2 }
 0x37e   :  { %v3499_v58 = vor.u32 %v3498_v11, %v3497_v2  ;;  %vm3500_vm1 = vcmp.lt.s32.totalorder %v7047_v55, 1  ;;  %vm3501_vm4 = vcmp.lt.s32.totalorder %v7047_v55, 2  ;;  %vm3503_vm14 = vcmp.lt.s32.totalorder %v7047_v55, 4  ;;  %v4241_v5 = vpop.eup %4240 }
 0x37f   :  { %v3345_v26 = vsel %vm3262_vm11, %v3344_v34, %v3343_v57  ;;  %v3432_v22 = vclz %v3950_v25  ;;  %v3505_v60 = vsel %vm3503_vm14, %v3493_v36, 2102212464  ;;  %v3508_v33 = vsel %vm3500_vm1, %v3487_v32, %v3490_v37  ;;  %v4243_v8 = vpop.eup %4242 }
 0x380   :  { %vm3251_vm3 = vcmp.lt.s32.totalorder %v7034_v47, 2  ;;  %v3348_v30 = vsel %vm6982_vm10, %v6781_v28, %v3345_v26  ;;  %vm3502_vm12 = vcmp.lt.s32.totalorder %v7047_v55, 3  ;;  %v3504_v53 = vsel %vm3500_vm1, %v3484_v31, %v3487_v32 }
 0x381   :  { %v3509_v51 = vsel %vm3503_vm14, %v3496_v20, 920167782  ;;  %4244 = vcosq.f32 %v3348_v30  ;;  %v3951_v41 = vadd.s32 4294967294, %v3432_v22  ;;  %v3512_v42 = vsel %vm3500_vm1, %v3490_v37, %v3493_v36 }
 0x382   :  { %v3510_v63 = vsel %vm3502_vm12, %v3493_v36, %v3509_v51  ;;  %vm3248_vm11 = vweird.f32 %v6651_v52  ;;  %4246 = vsinq.f32 %v3348_v30  ;;  %v3506_v46 = vsel %vm3502_vm12, %v3490_v37, %v3505_v60 }
 0x383   :  { %v3511_v39 = vsel %vm3501_vm4, %v3508_v33, %v3510_v63  ;;  %v3513_v10 = vsel %vm3503_vm14, %v3499_v58, 1326507024  ;;  %vm3952_vm10 = vcmp.lt.s32.totalorder %v3951_v41, 0  ;;  %v3253_v32 = vxor.u32 2147483648, %v4243_v8 }
 0x384   :  { %v3514_v3 = vsel %vm3502_vm12, %v3496_v20, %v3513_v10  ;;  %v7105_v7 = vmul.u32.u64.low %v7049_v48, %v3511_v39  ;;  %v7106_v14 = vmul.u32.u64.high %v7049_v48, %v3511_v39, %v7105_v7  ;;  %v3435_v62 = vsel %vm3952_vm10, 0, %v3951_v41 }
 0x385   :  { %v3515_v44 = vsel %vm3501_vm4, %v3512_v42, %v3514_v3  ;;  %v3256_v49 = vxor.u32 2147483648, %v4241_v5  ;;  %v3436_v37 = vsub.s32 32, %v3435_v62  ;;  %v3440_v57 = vsub.s32 4294967266, %v3435_v62 }
 0x386   :  { %v3457_v40 = vadd.s32 3, %v3453_v12  ;;  %v3507_v36 = vsel %vm3501_vm4, %v3504_v53, %v3506_v46  ;;  %v7114_v9 = vmul.u32.u64.low %v7049_v48, %v3515_v44  ;;  %v7115_v31 = vmul.u32.u64.high %v7049_v48, %v3515_v44, %v7114_v9 }
 0x387   :  { %v3254_v2 = vsel %vm3252_vm15, %v4241_v5, %v3253_v32  ;;  %v3257_v11 = vsel %vm3255_vm2, %v3256_v49, %v4243_v8  ;;  %v3437_v34 = vshll.u32 %v7058_v16, %v3435_v62  ;;  %v3438_v25 = vshrl.u32 %v7045_v0, %v3436_v37 }
 0x388   :  { %v3441_v20 = vadd.s32 127, %v3440_v57  ;;  %v3526_v12 = vadd.s32 1, %v7106_v14  ;;  %v7125_v55 = vand.u32 3, %v7011_v59  ;;  %v3146_v58 = vand.u32 3, %v7017_v6 }
 0x389   :  { %v3258_v26 = vsel %vm3251_vm3, %v3254_v2, %v3257_v11  ;;  %v2944_v5 = vxor.u32 2147483648, %v6904_v56  ;;  %v3439_v22 = vor.u32 %v3438_v25, %v3437_v34  ;;  %vm2939_vm6 = vcmp.lt.s32.totalorder %v6839_v17, 2 }
 0x38a   :  { %v3442_v60 = vshll.u32 %v3441_v20, 23  ;;  %vm2940_vm7 = vcmp.eq.s32.totalorder %v6839_v17, 0  ;;  %v7133_v0 = vand.u32 3, %v3457_v40  ;;  %v3523_v16 = vmul.u32 %v7049_v48, %v3507_v36 }
 0x38b   :  { %vm3525_vm9 = vc.u32 %v7115_v31, %v7105_v7  ;;  %vm3359_vm5 = vcmp.eq.s32.totalorder %v7042_v38, 2  ;;  %vm2943_vm8 = vcmp.eq.s32.totalorder %v6839_v17, 2  ;;  %vm3470_vm15 = vcmp.lt.s32.totalorder %v6937_v19, 0 }
 0x38c   :  { %v3443_v59 = vor.u32 4788187, %v3442_v60  ;;  %v3527_v6 = vsel %vm3525_vm9, %v3526_v12, %v7106_v14  ;;  %vm3356_vm2 = vcmp.eq.s32.totalorder %v7042_v38, 0  ;;  %v7145_v47 = vsel %vm3248_vm11, nan, %v3258_v26 }
 0x38d   :  { %v2942_v48 = vsel %vm2940_vm7, %v6904_v56, %v2941_v23  ;;  %v7919_v33 = vand.u32 2147483647, %v6937_v19  ;;  %v3528_v53 = vadd.s32 %v3527_v6, %v3523_v16  ;;  %vm2936_vm4 = vweird.f32 %v6444_v50  ;;  %v7923_v6 = vld [vmem:[#allocation91_spill] sm:$0xff] }
 0x38e   :  { %v2945_v51 = vsel %vm2943_vm8, %v2944_v5, %v6912_v43  ;;  %vm3147_vm14 = vcmp.lt.s32.totalorder %v3146_v58, 2  ;;  %v3149_v52 = vxor.u32 2147483648, %v7072_v24  ;;  %v3444_v8 = vand.u32 2147483647, %v3443_v59  ;;  %v4245_v56 = vpop.eup %4244 }
 0x38f   :  { %vm7152_vm1 = vcmp.le.f32.partialorder %v7919_v33, 0.7853982  ;;  %v3446_v41 = vcvt.s32.f32 %v3439_v22  ;;  %vm3148_vm3 = vcmp.eq.s32.totalorder %v3146_v58, 0  ;;  %v3152_v63 = vxor.u32 2147483648, %v7061_v54  ;;  %v4247_v39 = vpop.eup %4246 }
 0x390   :  { %v3529_v23 = vadd.s32 536870912, %v3528_v53  ;;  %vm3355_vm12 = vcmp.lt.s32.totalorder %v7042_v38, 2  ;;  %v3150_v42 = vsel %vm3148_vm3, %v7061_v54, %v3149_v52  ;;  %vm3151_vm11 = vcmp.eq.s32.totalorder %v3146_v58, 2  ;;  %v7922_v38 = vld [vmem:[#allocation93_spill] sm:$0xff]  ;;  %v7925_v52 = vld [vmem:[#allocation83_spill] sm:$0xff] }
 0x391   :  { %v2837_v46 = vxor.u32 2147483648, %v6900_v15  ;;  %v3447_v10 = vmul.f32 %v3446_v41, %v3444_v8  ;;  %v3360_v43 = vxor.u32 2147483648, %v4245_v56  ;;  %v3153_v3 = vsel %vm3151_vm11, %v3152_v63, %v7072_v24  ;;  %v7926_v8 = vld [vmem:[#allocation99_spill] sm:$0xff]  ;;  %v7928_v63 = vld [vmem:[#allocation98_spill] sm:$0xff] }
 0x392   :  { %v2840_v14 = vxor.u32 2147483648, %v6896_v27  ;;  %v3530_v62 = vshrl.u32 %v3529_v23, 30  ;;  %v3357_v44 = vxor.u32 2147483648, %v4247_v39  ;;  %vm3144_vm10 = vweird.f32 %v6636_v29 }
 0x393   :  { %v3154_v32 = vsel %vm3147_vm14, %v3150_v42, %v3153_v3  ;;  %v3448_v49 = vxor.u32 2147483648, %v3447_v10  ;;  %v7169_v54 = vadd.s32 %v7105_v7, %v7115_v31  ;;  %vm3352_vm7 = vweird.f32 %v6781_v28  ;;  %v7924_v28 = vld [vmem:[#allocation73_spill] sm:$0xff]  ;;  %v7929_v42 = vld [vmem:[#allocation92_spill] sm:$0xff] }
 0x394   :  { %v2946_v37 = vsel %vm2939_vm6, %v2942_v48, %v2945_v51  ;;  %vm2836_vm9 = vcmp.eq.s32.totalorder %v6699_v45, 0  ;;  %vm2832_vm8 = vweird.f32 %v6341_v35  ;;  %v3531_v24 = vshll.u32 %v3530_v62, 30 }
 0x395   :  { %v3554_v57 = vsub.s32 4, %v3530_v62  ;;  %v2838_v29 = vsel %vm2836_vm9, %v6896_v27, %v2837_v46  ;;  %vm2839_vm14 = vcmp.eq.s32.totalorder %v6699_v45, 2  ;;  %v3449_v40 = vsel %vm3366_vm13, %v3448_v49, %v3447_v10  ;;  %v7932_v49 = vld [vmem:[#allocation89_spill] sm:$0xff] }
 0x396   :  { %v3361_v7 = vsel %vm3359_vm5, %v3360_v43, %v4247_v39  ;;  %v3155_v36 = vsel %vm3144_vm10, nan, %v3154_v32  ;;  %v2841_v17 = vsel %vm2839_vm14, %v2840_v14, %v6900_v15  ;;  %vm3040_vm6 = vweird.f32 %v6492_v4  ;;  %v7930_v39 = vld [vmem:[#allocation66_spill] sm:$0xff] }
 0x397   :  { %v3452_v9 = vsel %vm7038_vm0, %v6850_v13, %v3449_v40  ;;  %v7187_v31 = vsub.s32 %v3528_v53, %v3531_v24  ;;  %v3555_v27 = vsel %vm3470_vm15, %v3554_v57, %v3530_v62  ;;  %v3358_v2 = vsel %vm3356_vm2, %v4245_v56, %v3357_v44  ;;  %v7931_v32 = vld [vmem:[#allocation90_spill] sm:$0xff]  ;;  %v7933_v57 = vld [vmem:[#allocation75_spill] sm:$0xff] }
 0x398   :  { %4248 = vcosq.f32 %v3452_v9  ;;  %v3557_v11 = vsel %vm7152_vm1, 0, %v3555_v27  ;;  %v2947_v15 = vsel %vm2936_vm4, nan, %v2946_v37  ;;  %vm2835_vm13 = vcmp.lt.s32.totalorder %v6699_v45, 2 }
 0x399   :  { %4250 = vsinq.f32 %v3452_v9  ;;  %v3534_v18 = vsub.s32 0, %v7187_v31  ;;  %v7199_v34 = vpack.c.bf16 %v3155_v36, %v2947_v15  ;;  %v3045_v25 = vxor.u32 2147483648, %v7056_v21 }
 0x39a   :  { %v3362_v20 = vsel %vm3355_vm12, %v3358_v2, %v3361_v7  ;;  %v2842_v12 = vsel %vm2835_vm13, %v2838_v29, %v2841_v17  ;;  %vm3044_vm0 = vcmp.eq.s32.totalorder %v7125_v55, 0  ;;  %v3048_v58 = vxor.u32 2147483648, %v6918_v1 }
 0x39b   :  { %v3954_v50 = vmin.u32 %v3534_v18, %v7187_v31  ;;  %v3561_v26 = vadd.s32 3, %v3557_v11  ;;  %v3046_v45 = vsel %vm3044_vm0, %v6918_v1, %v3045_v25  ;;  %vm3047_vm5 = vcmp.eq.s32.totalorder %v7125_v55, 2  ;;  %v7935_v25 = vld [vmem:[#allocation97_spill] sm:$0xff] }
 0x39c   :  { %vm3043_vm2 = vcmp.lt.s32.totalorder %v7125_v55, 2  ;;  %v3049_v5 = vsel %vm3047_vm5, %v3048_v58, %v7056_v21  ;;  %v2525_v22 = vxor.u32 2147483648, %v6638_v61  ;;  %v2528_v60 = vxor.u32 2147483648, %v7922_v38 }
 0x39d   :  { %v3536_v16 = vclz %v3954_v50  ;;  %v7215_v59 = vsel %vm3352_vm7, nan, %v3362_v20  ;;  %vm2524_vm4 = vcmp.eq.s32.totalorder %v7923_v6, 0  ;;  %vm2527_vm3 = vcmp.eq.s32.totalorder %v7923_v6, 2 }
 0x39e   :  { %v2843_v1 = vsel %vm2832_vm8, nan, %v2842_v12  ;;  %v3050_v48 = vsel %vm3043_vm2, %v3046_v45, %v3049_v5  ;;  %v2526_v55 = vsel %vm2524_vm4, %v7922_v38, %v2525_v22  ;;  %v2529_v21 = vsel %vm2527_vm3, %v2528_v60, %v6638_v61  ;;  %v7927_v61 = vld [vmem:[#allocation95_spill] sm:$0xff] }
 0x39f   :  { %v3955_v33 = vadd.s32 4294967294, %v3536_v16  ;;  %v7223_v53 = vand.u32 3, %v3561_v26  ;;  %vm3463_vm12 = vcmp.eq.s32.totalorder %v7133_v0, 2  ;;  %vm2520_vm11 = vweird.f32 %v7924_v28  ;;  %v7936_v26 = vld [vmem:[#allocation96_spill] sm:$0xff] }
 0x3a0   :  { %vm2523_vm10 = vcmp.lt.s32.totalorder %v7923_v6, 2  ;;  %vm3460_vm7 = vcmp.eq.s32.totalorder %v7133_v0, 0  ;;  %v3051_v35 = vsel %vm3040_vm6, nan, %v3050_v48  ;;  %vm2728_vm9 = vweird.f32 %v7925_v52  ;;  %v7941_v52 = vld [vmem:[#allocation51_spill] sm:$0xff] }
 0x3a1   :  { %v2530_v51 = vsel %vm2523_vm10, %v2526_v55, %v2529_v21  ;;  %v2733_v41 = vxor.u32 2147483648, %v7926_v8  ;;  %vm3956_vm8 = vcmp.lt.s32.totalorder %v3955_v33, 0  ;;  %vm3459_vm14 = vcmp.lt.s32.totalorder %v7133_v0, 2  ;;  %v7937_v55 = vld [vmem:[#allocation52_spill] sm:$0xff]  ;;  %v7938_v21 = vld [vmem:[#allocation82_spill] sm:$0xff] }
 0x3a2   :  { %vm2731_vm13 = vcmp.lt.s32.totalorder %v7927_v61, 2  ;;  %vm2732_vm0 = vcmp.eq.s32.totalorder %v7927_v61, 0  ;;  %v2736_v56 = vxor.u32 2147483648, %v7928_v63  ;;  %vm3456_vm5 = vweird.f32 %v6850_v13 }
 0x3a3   :  { %v3539_v23 = vsel %vm3956_vm8, 0, %v3955_v33  ;;  %v2734_v4 = vsel %vm2732_vm0, %v7928_v63, %v2733_v41  ;;  %vm2735_vm6 = vcmp.eq.s32.totalorder %v7927_v61, 2  ;;  %v2421_v46 = vxor.u32 2147483648, %v7929_v42 }
 0x3a4   :  { %vm2416_vm2 = vweird.f32 %v7930_v39  ;;  %v3540_v10 = vsub.s32 32, %v3539_v23  ;;  %v3544_v43 = vsub.s32 4294967266, %v3539_v23  ;;  %v7242_v3 = vpack.c.bf16 %v3051_v35, %v2843_v1  ;;  %v7939_v35 = vld [vmem:[#allocation76_spill] sm:$0xff] }
 0x3a5   :  { %v2737_v14 = vsel %vm2735_vm6, %v2736_v56, %v7926_v8  ;;  %v2531_v62 = vsel %vm2520_vm11, nan, %v2530_v51  ;;  %vm2420_vm4 = vcmp.eq.s32.totalorder %v7931_v32, 0  ;;  %v2424_v37 = vxor.u32 2147483648, %v7932_v49  ;;  %v4249_v24 = vpop.eup %4248  ;;  %v7940_v51 = vld [vmem:[#allocation81_spill] sm:$0xff] }
 0x3a6   :  { %v2738_v44 = vsel %vm2731_vm13, %v2734_v4, %v2737_v14  ;;  %vm2624_vm3 = vweird.f32 %v7933_v57  ;;  %v3541_v29 = vshll.u32 %v7187_v31, %v3539_v23  ;;  %v3542_v40 = vshrl.u32 %v7169_v54, %v3540_v10  ;;  %v4251_v36 = vpop.eup %4250  ;;  %v7934_v31 = vld [vmem:[#allocation94_spill] sm:$0xff]  ;;  %v7942_v23 = vld [vmem:[#allocation63_spill] sm:$0xff]  ;;  %v7943_v4 = vld [vmem:[#allocation88_spill] sm:$0xff] }
 0x3a7   :  { %v3545_v7 = vadd.s32 127, %v3544_v43  ;;  %vm2423_vm10 = vcmp.eq.s32.totalorder %v7931_v32, 2  ;;  %v3464_v17 = vxor.u32 2147483648, %v4249_v24  ;;  %vm2419_vm8 = vcmp.lt.s32.totalorder %v7931_v32, 2  ;;  %v7946_v10 = vld [vmem:[#allocation57_spill] sm:$0xff]  ;;  %v7949_v57 = vld [vmem:[#allocation79_spill] sm:$0xff] }
 0x3a8   :  { %v2422_v9 = vsel %vm2420_vm4, %v7932_v49, %v2421_v46  ;;  %v2425_v27 = vsel %vm2423_vm10, %v2424_v37, %v7929_v42  ;;  %v3543_v2 = vor.u32 %v3542_v40, %v3541_v29  ;;  %v3461_v15 = vxor.u32 2147483648, %v4251_v36  ;;  %v7944_v46 = vld [vmem:[#allocation85_spill] sm:$0xff] }
 0x3a9   :  { %v3546_v11 = vshll.u32 %v3545_v7, 23  ;;  %v2739_v18 = vsel %vm2728_vm9, nan, %v2738_v44  ;;  %v3465_v54 = vsel %vm3463_vm12, %v3464_v17, %v4251_v36  ;;  %vm2627_vm11 = vcmp.lt.s32.totalorder %v7934_v31, 2  ;;  %v7947_v44 = vld [vmem:[#allocation80_spill] sm:$0xff] }
 0x3aa   :  { %vm2628_vm13 = vcmp.eq.s32.totalorder %v7934_v31, 0  ;;  %v2629_v20 = vxor.u32 2147483648, %v7935_v25  ;;  %v3462_v58 = vsel %vm3460_vm7, %v4249_v24, %v3461_v15  ;;  %v2426_v50 = vsel %vm2419_vm8, %v2422_v9, %v2425_v27  ;;  %v7948_v24 = vld [vmem:[#allocation74_spill] sm:$0xff] }
 0x3ab   :  { %v3547_v12 = vor.u32 4788187, %v3546_v11  ;;  %v2632_v45 = vxor.u32 2147483648, %v7936_v26  ;;  %v3466_v5 = vsel %vm3459_vm14, %v3462_v58, %v3465_v54  ;;  %v7268_v22 = vpack.c.bf16 %v2739_v18, %v2531_v62  ;;  %v7951_v18 = vld [vmem:[#allocation77_spill] sm:$0xff]  ;;  %v7952_v54 = vld [vmem:[#allocation84_spill] sm:$0xff] }
 0x3ac   :  { %v2630_v38 = vsel %vm2628_vm13, %v7936_v26, %v2629_v20  ;;  %vm2631_vm12 = vcmp.eq.s32.totalorder %v7934_v31, 2  ;;  %v3550_v16 = vcvt.s32.f32 %v3543_v2  ;;  %v3467_v6 = vsel %vm3456_vm5, nan, %v3466_v5  ;;  %v7950_v2 = vld [vmem:[#allocation86_spill] sm:$0xff]  ;;  %v7954_v26 = vld [vmem:[#allocation37_spill] sm:$0xff] }
 0x3ad   :  { %v3548_v60 = vand.u32 2147483647, %v3547_v12  ;;  %v2633_v1 = vsel %vm2631_vm12, %v2632_v45, %v7935_v25  ;;  %v2427_v48 = vsel %vm2416_vm2, nan, %v2426_v50  ;;  %vm2104_vm7 = vweird.f32 %v7937_v55  ;;  %v7953_v12 = vld [vmem:[#allocation69_spill] sm:$0xff]  ;;  %v7955_v45 = vld [vmem:[#allocation56_spill] sm:$0xff] }
 0x3ae   :  { %v2634_v0 = vsel %vm2627_vm11, %v2630_v38, %v2633_v1  ;;  %v2109_v33 = vxor.u32 2147483648, %v7938_v21  ;;  %vm2107_vm9 = vcmp.lt.s32.totalorder %v7939_v35, 2  ;;  %vm2108_vm14 = vcmp.eq.s32.totalorder %v7939_v35, 0  ;;  %v7956_v5 = vld [vmem:[#allocation65_spill] sm:$0xff]  ;;  %v7958_v55 = vld [vmem:[#allocation68_spill] sm:$0xff] }
 0x3af   :  { %v3551_v28 = vmul.f32 %v3550_v16, %v3548_v60  ;;  %v2112_v13 = vxor.u32 2147483648, %v7940_v51  ;;  %vm2000_vm0 = vweird.f32 %v7941_v52  ;;  %v7286_v8 = vpack.c.bf16 %v3467_v6, %v7145_v47  ;;  %v7945_v47 = vld [vmem:[#allocation87_spill] sm:$0xff]  ;;  %v7957_v6 = vld [vmem:[#allocation78_spill] sm:$0xff] }
 0x3b0   :  { %v2635_v41 = vsel %vm2624_vm3, nan, %v2634_v0  ;;  %v2110_v61 = vsel %vm2108_vm14, %v7940_v51, %v2109_v33  ;;  %vm2111_vm5 = vcmp.eq.s32.totalorder %v7939_v35, 2  ;;  %vm2312_vm6 = vweird.f32 %v7942_v23  ;;  %v7961_v35 = vld [vmem:[#allocation44_spill] sm:$0xff] }
 0x3b1   :  { %v3552_v63 = vxor.u32 2147483648, %v3551_v28  ;;  %v2113_v56 = vsel %vm2111_vm5, %v2112_v13, %v7938_v21  ;;  %v2317_v42 = vxor.u32 2147483648, %v7943_v4  ;;  %vm2315_vm2 = vcmp.lt.s32.totalorder %v7944_v46, 2  ;;  %v7959_v21 = vld [vmem:[#allocation72_spill] sm:$0xff]  ;;  %v7962_v13 = vld [vmem:[#allocation42_spill] sm:$0xff] }
 0x3b2   :  { %vm2316_vm4 = vcmp.eq.s32.totalorder %v7944_v46, 0  ;;  %vm2319_vm10 = vcmp.eq.s32.totalorder %v7944_v46, 2  ;;  %v2320_v39 = vxor.u32 2147483648, %v7945_v47  ;;  %vm2208_vm3 = vweird.f32 %v7946_v10  ;;  %v7966_v10 = vld [vmem:[#allocation71_spill] sm:$0xff] }
 0x3b3   :  { %v3553_v43 = vsel %vm3470_vm15, %v3552_v63, %v3551_v28  ;;  %v2114_v14 = vsel %vm2107_vm9, %v2110_v61, %v2113_v56  ;;  %v2318_v62 = vsel %vm2316_vm4, %v7945_v47, %v2317_v42  ;;  %v2005_v32 = vxor.u32 2147483648, %v7947_v44  ;;  %v7960_v28 = vld [vmem:[#allocation33_spill] sm:$0xff]  ;;  %v7963_v61 = vld [vmem:[#allocation64_spill] sm:$0xff]  ;;  %v7965_v42 = vld [vmem:[#allocation62_spill] sm:$0xff] }
 0x3b4   :  { %v3556_v49 = vsel %vm7152_vm1, %v6937_v19, %v3553_v43  ;;  %v2321_v37 = vsel %vm2319_vm10, %v2320_v39, %v7943_v4  ;;  %vm2004_vm8 = vcmp.eq.s32.totalorder %v7948_v24, 0  ;;  %v2008_v29 = vxor.u32 2147483648, %v7949_v57  ;;  %v7964_v4 = vld [vmem:[#allocation55_spill] sm:$0xff] }
 0x3b5   :  { %4252 = vcosq.f32 %v3556_v49  ;;  %v2322_v40 = vsel %vm2315_vm2, %v2318_v62, %v2321_v37  ;;  %v2006_v7 = vsel %vm2004_vm8, %v7949_v57, %v2005_v32  ;;  %vm2007_vm15 = vcmp.eq.s32.totalorder %v7948_v24, 2  ;;  %v7967_v62 = vld [vmem:[#allocation67_spill] sm:$0xff] }
 0x3b6   :  { %4254 = vsinq.f32 %v3556_v49  ;;  %v2323_v36 = vsel %vm2312_vm6, nan, %v2322_v40  ;;  %vm2003_vm11 = vcmp.lt.s32.totalorder %v7948_v24, 2  ;;  %v2009_v30 = vsel %vm2007_vm15, %v2008_v29, %v7947_v44  ;;  %v7968_v44 = vld [vmem:[#allocation70_spill] sm:$0xff] }
 0x3b7   :  { %v7318_v17 = vpack.c.bf16 %v2635_v41, %v2427_v48  ;;  %v2115_v9 = vsel %vm2104_vm7, nan, %v2114_v14  ;;  %v2010_v27 = vsel %vm2003_vm11, %v2006_v7, %v2009_v30  ;;  %v2213_v11 = vxor.u32 2147483648, %v7950_v2 }
 0x3b8   :  { %v7323_v15 = vpack.c.bf16 %v2323_v36, %v2115_v9  ;;  %vm2211_vm1 = vcmp.lt.s32.totalorder %v7951_v18, 2  ;;  %vm2212_vm13 = vcmp.eq.s32.totalorder %v7951_v18, 0  ;;  %v2216_v31 = vxor.u32 2147483648, %v7952_v54 }
 0x3b9   :  { %v2011_v25 = vsel %vm2000_vm0, nan, %v2010_v27  ;;  %v2214_v20 = vsel %vm2212_vm13, %v7952_v54, %v2213_v11  ;;  %vm2215_vm12 = vcmp.eq.s32.totalorder %v7951_v18, 2  ;;  %v1693_v58 = vxor.u32 2147483648, %v7953_v12  ;;  %v7969_v27 = vld [vmem:[#allocation17_spill] sm:$0xff] }
 0x3ba   :  { %v2217_v50 = vsel %vm2215_vm12, %v2216_v31, %v7950_v2  ;;  %vm1688_vm7 = vweird.f32 %v7954_v26  ;;  %vm1692_vm9 = vcmp.eq.s32.totalorder %v7955_v45, 0  ;;  %v1696_v38 = vxor.u32 2147483648, %v7956_v5  ;;  %v7970_v2 = vld [vmem:[#allocation50_spill] sm:$0xff]  ;;  %v7971_v54 = vld [vmem:[#allocation45_spill] sm:$0xff] }
 0x3bb   :  { %v2218_v60 = vsel %vm2211_vm1, %v2214_v20, %v2217_v50  ;;  %v1694_v16 = vsel %vm1692_vm9, %v7956_v5, %v1693_v58  ;;  %vm1695_vm14 = vcmp.eq.s32.totalorder %v7955_v45, 2  ;;  %v1901_v1 = vxor.u32 2147483648, %v7957_v6  ;;  %v7972_v31 = vld [vmem:[#allocation49_spill] sm:$0xff] }
 0x3bc   :  { %vm3567_vm0 = vcmp.eq.s32.totalorder %v7223_v53, 2  ;;  %v2219_v48 = vsel %vm2208_vm3, nan, %v2218_v60  ;;  %v1697_v0 = vsel %vm1695_vm14, %v1696_v38, %v7953_v12  ;;  %vm1900_vm5 = vcmp.eq.s32.totalorder %v7958_v55, 0  ;;  %v7973_v5 = vld [vmem:[#allocation61_spill] sm:$0xff]  ;;  %v7974_v60 = vld [vmem:[#allocation26_spill] sm:$0xff] }
 0x3bd   :  { %v1904_v33 = vxor.u32 2147483648, %v7959_v21  ;;  %vm1584_vm6 = vweird.f32 %v7960_v28  ;;  %vm3564_vm2 = vcmp.eq.s32.totalorder %v7223_v53, 0  ;;  %vm1691_vm4 = vcmp.lt.s32.totalorder %v7955_v45, 2 }
 0x3be   :  { %vm1896_vm10 = vweird.f32 %v7961_v35  ;;  %v1902_v51 = vsel %vm1900_vm5, %v7959_v21, %v1901_v1  ;;  %vm1903_vm8 = vcmp.eq.s32.totalorder %v7958_v55, 2  ;;  %vm1792_vm3 = vweird.f32 %v7962_v13  ;;  %v7975_v1 = vld [vmem:[#allocation54_spill] sm:$0xff]  ;;  %v7978_v21 = vld [vmem:[#allocation29_spill] sm:$0xff]  ;;  %v7979_v35 = vld [vmem:[#allocation48_spill] sm:$0xff] }
 0x3bf   :  { %vm3563_vm15 = vcmp.lt.s32.totalorder %v7223_v53, 2  ;;  %v7354_v52 = vpack.c.bf16 %v2219_v48, %v2011_v25  ;;  %vm1899_vm11 = vcmp.lt.s32.totalorder %v7958_v55, 2  ;;  %v1905_v41 = vsel %vm1903_vm8, %v1904_v33, %v7957_v6  ;;  %v7976_v48 = vld [vmem:[#allocation60_spill] sm:$0xff]  ;;  %v7977_v55 = vld [vmem:[#allocation15_spill] sm:$0xff] }
 0x3c0   :  { %v1589_v63 = vxor.u32 2147483648, %v7963_v61  ;;  %vm3560_vm1 = vweird.f32 %v6937_v19  ;;  %v1698_v56 = vsel %vm1691_vm4, %v1694_v16, %v1697_v0  ;;  %v1906_v23 = vsel %vm1899_vm11, %v1902_v51, %v1905_v41  ;;  %v7980_v41 = vld [vmem:[#allocation43_spill] sm:$0xff] }
 0x3c1   :  { %vm1588_vm13 = vcmp.eq.s32.totalorder %v7964_v4, 0  ;;  %v1592_v46 = vxor.u32 2147483648, %v7965_v42  ;;  %v1907_v47 = vsel %vm1896_vm10, nan, %v1906_v23  ;;  %vm1591_vm12 = vcmp.eq.s32.totalorder %v7964_v4, 2 }
 0x3c2   :  { %v1590_v39 = vsel %vm1588_vm13, %v7965_v42, %v1589_v63  ;;  %v1797_v43 = vxor.u32 2147483648, %v7966_v10  ;;  %vm1587_vm9 = vcmp.lt.s32.totalorder %v7964_v4, 2  ;;  %vm1796_vm14 = vcmp.eq.s32.totalorder %v7967_v62, 0  ;;  %v4253_v49 = vpop.eup %4252  ;;  %v7982_v4 = vld [vmem:[#allocation59_spill] sm:$0xff] }
 0x3c3   :  { %v1593_v14 = vsel %vm1591_vm12, %v1592_v46, %v7963_v61  ;;  %v1800_v32 = vxor.u32 2147483648, %v7968_v44  ;;  %v1699_v37 = vsel %vm1688_vm7, nan, %v1698_v56  ;;  %vm1795_vm5 = vcmp.lt.s32.totalorder %v7967_v62, 2  ;;  %v4255_v57 = vpop.eup %4254  ;;  %v7981_v61 = vld [vmem:[#allocation47_spill] sm:$0xff] }
 0x3c4   :  { %v1798_v24 = vsel %vm1796_vm14, %v7968_v44, %v1797_v43  ;;  %vm1799_vm4 = vcmp.eq.s32.totalorder %v7967_v62, 2  ;;  %v3568_v29 = vxor.u32 2147483648, %v4253_v49  ;;  %v7374_v40 = vpack.c.bf16 %v1907_v47, %v1699_v37  ;;  %v7983_v47 = vld [vmem:[#allocation53_spill] sm:$0xff]  ;;  %v7986_v44 = vld [vmem:[#allocation35_spill] sm:$0xff]  ;;  %v7987_v37 = vld [vmem:[#allocation32_spill] sm:$0xff] }
 0x3c5   :  { %v1594_v7 = vsel %vm1587_vm9, %v1590_v39, %v1593_v14  ;;  %v1801_v36 = vsel %vm1799_vm4, %v1800_v32, %v7966_v10  ;;  %v3565_v30 = vxor.u32 2147483648, %v4255_v57  ;;  %vm1272_vm10 = vweird.f32 %v7969_v27  ;;  %v7984_v39 = vld [vmem:[#allocation58_spill] sm:$0xff] }
 0x3c6   :  { %v1802_v9 = vsel %vm1795_vm5, %v1798_v24, %v1801_v36  ;;  %v1277_v11 = vxor.u32 2147483648, %v7970_v2  ;;  %v3569_v18 = vsel %vm3567_vm0, %v3568_v29, %v4255_v57  ;;  %vm1275_vm7 = vcmp.lt.s32.totalorder %v7971_v54, 2  ;;  %v7988_v24 = vld [vmem:[#allocation34_spill] sm:$0xff] }
 0x3c7   :  { %vm1276_vm8 = vcmp.eq.s32.totalorder %v7971_v54, 0  ;;  %v1280_v25 = vxor.u32 2147483648, %v7972_v31  ;;  %v3566_v20 = vsel %vm3564_vm2, %v4253_v49, %v3565_v30  ;;  %v1595_v12 = vsel %vm1584_vm6, nan, %v1594_v7  ;;  %v7989_v36 = vld [vmem:[#allocation46_spill] sm:$0xff]  ;;  %v7990_v30 = vld [vmem:[#allocation11_spill] sm:$0xff] }
 0x3c8   :  { %v1278_v58 = vsel %vm1276_vm8, %v7972_v31, %v1277_v11  ;;  %vm1279_vm11 = vcmp.eq.s32.totalorder %v7971_v54, 2  ;;  %v3570_v50 = vsel %vm3563_vm15, %v3566_v20, %v3569_v18  ;;  %v1803_v26 = vsel %vm1792_vm3, nan, %v1802_v9  ;;  %v7992_v11 = vld [vmem:[#allocation41_spill] sm:$0xff]  ;;  %v7994_v54 = vld [vmem:[#allocation12_spill] sm:$0xff] }
 0x3c9   :  { %v1281_v45 = vsel %vm1279_vm11, %v1280_v25, %v7970_v2  ;;  %v1485_v38 = vxor.u32 2147483648, %v7973_v5  ;;  %vm1376_vm0 = vweird.f32 %v7974_v60  ;;  %v3571_v16 = vsel %vm3560_vm1, nan, %v3570_v50  ;;  %v7991_v2 = vld [vmem:[#allocation40_spill] sm:$0xff]  ;;  %v7993_v18 = vld [vmem:[#allocation9_spill] sm:$0xff] }
 0x3ca   :  { %v1282_v6 = vsel %vm1275_vm7, %v1278_v58, %v1281_v45  ;;  %vm1484_vm6 = vcmp.eq.s32.totalorder %v7975_v1, 0  ;;  %v1488_v0 = vxor.u32 2147483648, %v7976_v48  ;;  %vm1168_vm2 = vweird.f32 %v7977_v55  ;;  %v7995_v58 = vld [vmem:[#allocation31_spill] sm:$0xff] }
 0x3cb   :  { %v3603_v53 = vpack.c.bf16 %v3571_v16, %v7215_v59  ;;  %vm1480_vm3 = vweird.f32 %v7978_v21  ;;  %v1486_v33 = vsel %vm1484_vm6, %v7976_v48, %v1485_v38  ;;  %vm1487_vm15 = vcmp.eq.s32.totalorder %v7975_v1, 2  ;;  %v7996_v45 = vld [vmem:[#allocation19_spill] sm:$0xff]  ;;  %v7999_v48 = vld [vmem:[#allocation36_spill] sm:$0xff] }
 0x3cc   :  { %v7406_v28 = vpack.c.bf16 %v1803_v26, %v1595_v12  ;;  %vm1483_vm13 = vcmp.lt.s32.totalorder %v7975_v1, 2  ;;  %v1489_v19 = vsel %vm1487_vm15, %v1488_v0, %v7973_v5  ;;  %v1173_v51 = vxor.u32 2147483648, %v7979_v35  ;;  %v7997_v5 = vld [vmem:[#allocation30_spill] sm:$0xff]  ;;  %v7998_v16 = vld [vmem:[#allocation39_spill] sm:$0xff] }
 0x3cd   :  { %3652 = vmatprep.subr.bf16.mxu0 %v3603_v53  ;;  %3965 = vmatprep.subr.bf16.mxu1 %v3603_v53  ;;  %v1283_v13 = vsel %vm1272_vm10, nan, %v1282_v6  ;;  %v1490_v59 = vsel %vm1483_vm13, %v1486_v33, %v1489_v19  ;;  %vm1172_vm1 = vcmp.eq.s32.totalorder %v7980_v41, 0  ;;  %v1176_v63 = vxor.u32 2147483648, %v7981_v61  ;;  %v8000_v0 = vld [vmem:[#allocation38_spill] sm:$0xff] }
 0x3ce   :  { %3653 = vmatpush1.bf16.msra.mxu0 %v7286_v8  ;;  %3973 = vmatpush1.bf16.msra.mxu1 %v7286_v8  ;;  %v1491_v56 = vsel %vm1480_vm3, nan, %v1490_v59  ;;  %v1174_v23 = vsel %vm1172_vm1, %v7981_v61, %v1173_v51  ;;  %vm1175_vm12 = vcmp.eq.s32.totalorder %v7980_v41, 2  ;;  %v1381_v42 = vxor.u32 2147483648, %v7982_v4  ;;  %v8002_v51 = vld [vmem:[#allocation23_spill] sm:$0xff]  ;;  %v8003_v59 = vld [vmem:[#allocation14_spill] sm:$0xff] }
 0x3cf   :  { %3654 = vmatprep.subr.bf16.mxu0 %v7199_v34  ;;  %3966 = vmatprep.subr.bf16.mxu1 %v7199_v34  ;;  %vm1171_vm9 = vcmp.lt.s32.totalorder %v7980_v41, 2  ;;  %v1177_v46 = vsel %vm1175_vm12, %v1176_v63, %v7979_v35  ;;  %vm1380_vm14 = vcmp.eq.s32.totalorder %v7983_v47, 0  ;;  %v1384_v10 = vxor.u32 2147483648, %v7984_v39  ;;  %v7985_v34 = vld [vmem:[#allocation10_spill] sm:$0xff] }
 0x3d0   :  { %v7426_v8 = vpack.c.bf16 %v1491_v56, %v1283_v13  ;;  %vm1379_vm5 = vcmp.lt.s32.totalorder %v7983_v47, 2  ;;  %v1382_v43 = vsel %vm1380_vm14, %v7984_v39, %v1381_v42  ;;  %vm1383_vm4 = vcmp.eq.s32.totalorder %v7983_v47, 2  ;;  %v8001_v35 = vld [vmem:[#allocation6_spill] sm:$0xff]  ;;  %v8005_v56 = vld [vmem:[#allocation28_spill] sm:$0xff]  ;;  %v8007_v47 = vld [vmem:[#allocation27_spill] sm:$0xff] }
 0x3d1   :  { %v1178_v14 = vsel %vm1171_vm9, %v1174_v23, %v1177_v46  ;;  %v1385_v62 = vsel %vm1383_vm4, %v1384_v10, %v7982_v4  ;;  %vm856_vm10 = vweird.f32 %v7985_v34  ;;  %v861_v32 = vxor.u32 2147483648, %v7986_v44  ;;  %v8004_v41 = vld [vmem:[#allocation22_spill] sm:$0xff]  ;;  %v8008_v10 = vld [vmem:[#allocation8_spill] sm:$0xff]  ;;  %v8009_v34 = vld [vmem:[#allocation21_spill] sm:$0xff] }
 0x3d2   :  { %3655 = vmatpush1.bf16.msra.mxu0 %v7242_v3  ;;  %3974 = vmatpush1.bf16.msra.mxu1 %v7242_v3  ;;  %v1386_v49 = vsel %vm1379_vm5, %v1382_v43, %v1385_v62  ;;  %vm859_vm7 = vcmp.lt.s32.totalorder %v7987_v37, 2  ;;  %vm860_vm8 = vcmp.eq.s32.totalorder %v7987_v37, 0  ;;  %v864_v57 = vxor.u32 2147483648, %v7988_v24  ;;  %v8006_v46 = vld [vmem:[#allocation18_spill] sm:$0xff] }
 0x3d3   :  { %3656 = vmatprep.subr.bf16.mxu0 %v7268_v22  ;;  %3967 = vmatprep.subr.bf16.mxu1 %v7268_v22  ;;  %v1387_v29 = vsel %vm1376_vm0, nan, %v1386_v49  ;;  %v862_v7 = vsel %vm860_vm8, %v7988_v24, %v861_v32  ;;  %vm863_vm11 = vcmp.eq.s32.totalorder %v7987_v37, 2  ;;  %v1069_v3 = vxor.u32 2147483648, %v7989_v36  ;;  %v8010_v49 = vld [vmem:[#allocation13_spill] sm:$0xff] }
 0x3d4   :  { %vm960_vm6 = vweird.f32 %v7990_v30  ;;  %v1179_v9 = vsel %vm1168_vm2, nan, %v1178_v14  ;;  %v865_v27 = vsel %vm863_vm11, %v864_v57, %v7986_v44  ;;  %vm1068_vm3 = vcmp.eq.s32.totalorder %v7991_v2, 0  ;;  %v8014_v30 = vld [vmem:[#allocation24_spill] sm:$0xff] }
 0x3d5   :  { %v1072_v22 = vxor.u32 2147483648, %v7992_v11  ;;  %vm752_vm15 = vweird.f32 %v7993_v18  ;;  %vm1064_vm0 = vweird.f32 %v7994_v54  ;;  %vm1067_vm13 = vcmp.lt.s32.totalorder %v7991_v2, 2 }
 0x3d6   :  { %v1070_v31 = vsel %vm1068_vm3, %v7992_v11, %v1069_v3  ;;  %vm1071_vm1 = vcmp.eq.s32.totalorder %v7991_v2, 2  ;;  %3657 = vmatpush1.bf16.msra.mxu0 %v7318_v17  ;;  %3975 = vmatpush1.bf16.msra.mxu1 %v7318_v17  ;;  %v3592_v25 = vpack.c.bf16 %v1387_v29, %v1179_v9  ;;  %v866_v20 = vsel %vm859_vm7, %v862_v7, %v865_v27  ;;  %v8012_v29 = vld [vmem:[#allocation25_spill] sm:$0xff]  ;;  %v8013_v3 = vld [vmem:[#allocation16_spill] sm:$0xff] }
 0x3d7   :  { %v1073_v12 = vsel %vm1071_vm1, %v1072_v22, %v7989_v36  ;;  %v757_v50 = vxor.u32 2147483648, %v7995_v58  ;;  %3658 = vmatprep.subr.bf16.mxu0 %v7323_v15  ;;  %3968 = vmatprep.subr.bf16.mxu1 %v7323_v15  ;;  %vm755_vm2 = vcmp.lt.s32.totalorder %v7996_v45, 2  ;;  %vm756_vm12 = vcmp.eq.s32.totalorder %v7996_v45, 0 }
 0x3d8   :  { %v1074_v26 = vsel %vm1067_vm13, %v1070_v31, %v1073_v12  ;;  %v760_v38 = vxor.u32 2147483648, %v7997_v5  ;;  %vm759_vm9 = vcmp.eq.s32.totalorder %v7996_v45, 2  ;;  %v965_v6 = vxor.u32 2147483648, %v7998_v16  ;;  %v8015_v31 = vld [vmem:[#allocation5_spill] sm:$0xff] }
 0x3d9   :  { %v1075_v17 = vsel %vm1064_vm0, nan, %v1074_v26  ;;  %v758_v60 = vsel %vm756_vm12, %v7997_v5, %v757_v50  ;;  %v867_v1 = vsel %vm856_vm10, nan, %v866_v20  ;;  %vm964_vm14 = vcmp.eq.s32.totalorder %v7999_v48, 0  ;;  %v4120_v26 = vld [vmem:[%s7561_s2 + $0x8] sm:$0xff]   ;;  %v4126_v45 = vld [vmem:[%s7561_s2] sm:$0xff]   ;;  %v4121_v5 = vld [vmem:[%s7561_s2 + $0x10] sm:$0xff]  }
 0x3da   :  { %v761_v15 = vsel %vm759_vm9, %v760_v38, %v7995_v58  ;;  %v968_v55 = vxor.u32 2147483648, %v8000_v0  ;;  %3659 = vmatpush1.bf16.msra.mxu0 %v7354_v52  ;;  %3976 = vmatpush1.bf16.msra.mxu1 %v7354_v52  ;;  %v3591_v53 = vpack.c.bf16 %v1075_v17, %v867_v1  ;;  %vm963_vm5 = vcmp.lt.s32.totalorder %v7999_v48, 2  ;;  %v4122_v38 = vld [vmem:[%s7561_s2 + $0x18] sm:$0xff]   ;;  %v4123_v17 = vld [vmem:[%s7561_s2 + $0x20] sm:$0xff]  }
 0x3db   :  { %v966_v21 = vsel %vm964_vm14, %v8000_v0, %v965_v6  ;;  %vm967_vm4 = vcmp.eq.s32.totalorder %v7999_v48, 2  ;;  %3660 = vmatprep.subr.bf16.mxu0 %v7374_v40  ;;  %3969 = vmatprep.subr.bf16.mxu1 %v7374_v40  ;;  %v762_v33 = vsel %vm755_vm2, %v758_v60, %v761_v15  ;;  %vm440_vm10 = vweird.f32 %v8001_v35  ;;  %v4124_v60 = vld [vmem:[%s7561_s2 + $0x28] sm:$0xff]   ;;  %v4127_v6 = vld [vmem:[%s7561_s2 + $0x38] sm:$0xff]  }
 0x3dc   :  { %v969_v19 = vsel %vm967_vm4, %v968_v55, %v7998_v16  ;;  %v445_v52 = vxor.u32 2147483648, %v8002_v51  ;;  %vm443_vm7 = vcmp.lt.s32.totalorder %v8003_v59, 2  ;;  %vm444_vm8 = vcmp.eq.s32.totalorder %v8003_v59, 0  ;;  %v4125_v16 = vld [vmem:[%s7561_s2 + $0x30] sm:$0xff]   ;;  %s4286_s2 = smov [#allocation2]  }
 0x3dd   :  { %v970_v13 = vsel %vm963_vm5, %v966_v21, %v969_v19  ;;  %v448_v61 = vxor.u32 2147483648, %v8004_v41  ;;  %vm447_vm11 = vcmp.eq.s32.totalorder %v8003_v59, 2  ;;  %v653_v23 = vxor.u32 2147483648, %v8005_v56  ;;  %s3802_s7 = sshll.u32 %s4286_s2, 4  ;;  %s3803_s7 = int_to_ptr.vmem [resolvable:$true] %s3802_s7 }
 0x3de   :  { %v971_v63 = vsel %vm960_vm6, nan, %v970_v13  ;;  %v446_v40 = vsel %vm444_vm8, %v8004_v41, %v445_v52  ;;  %3661 = vmatpush1.bf16.msra.mxu0 %v7406_v28  ;;  %3977 = vmatpush1.bf16.msra.mxu1 %v7406_v28  ;;  %v763_v4 = vsel %vm752_vm15, nan, %v762_v33  ;;  %vm652_vm3 = vcmp.eq.s32.totalorder %v8006_v46, 0  ;;  %s4256_s8 = scalar_lea.vmem %s3803_s7, 4096  ;;  %p4261_p1 = scmp.lt.s32.totalorder %s3803_s7, %s3803_s7 }
 0x3df   :  { %v449_v42 = vsel %vm447_vm11, %v448_v61, %v8002_v51  ;;  %v656_v39 = vxor.u32 2147483648, %v8007_v47  ;;  %3662 = vmatprep.subr.bf16.mxu0 %v7426_v8  ;;  %3970 = vmatprep.subr.bf16.mxu1 %v7426_v8  ;;  %vm648_vm6 = vweird.f32 %v8008_v10  ;;  %vm651_vm0 = vcmp.lt.s32.totalorder %v8006_v46, 2  ;;  %v8011_v8 = vld [vmem:[#allocation20_spill] sm:$0xff]  ;;  %p4257_p0 = scmp.ne.s32.totalorder %s3803_s7, %s4256_s8  ;;  %p4262_p2 = scmp.lt.s32.totalorder %s4256_s8, %s4256_s8 }
 0x3e0   :  { %v654_v43 = vsel %vm652_vm3, %v8007_v47, %v653_v23  ;;  %vm655_vm13 = vcmp.eq.s32.totalorder %v8006_v46, 2  ;;  %v3590_v28 = vpack.c.bf16 %v971_v63, %v763_v4  ;;  %v450_v14 = vsel %vm443_vm7, %v446_v40, %v449_v42 }
 0x3e1   :  { %v657_v62 = vsel %vm655_vm13, %v656_v39, %v8005_v56  ;;  %v341_v44 = vxor.u32 2147483648, %v8009_v34  ;;  %vm339_vm15 = vcmp.lt.s32.totalorder %v8010_v49, 2  ;;  %vm340_vm1 = vcmp.eq.s32.totalorder %v8010_v49, 0  ;;  %p4263_p3 = por %p4262_p2, %p4261_p1 }
 0x3e2   :  { %v658_v32 = vsel %vm651_vm0, %v654_v43, %v657_v62  ;;  %v344_v37 = vxor.u32 2147483648, %v8011_v8  ;;  %3663 = vmatpush1.bf16.msra.mxu0 %v3592_v25  ;;  %3978 = vmatpush1.bf16.msra.mxu1 %v3592_v25  ;;  %vm343_vm2 = vcmp.eq.s32.totalorder %v8010_v49, 2  ;;  %v549_v7 = vxor.u32 2147483648, %v8012_v29  ;;  %v8016_v25 = vld [vmem:[#allocation7_spill] sm:$0xff] }
 0x3e3   :  { %v659_v24 = vsel %vm648_vm6, nan, %v658_v32  ;;  %v342_v57 = vsel %vm340_vm1, %v8011_v8, %v341_v44  ;;  %3664 = vmatprep.subr.bf16.mxu0 %v3591_v53  ;;  %3971 = vmatprep.subr.bf16.mxu1 %v3591_v53  ;;  %vm548_vm12 = vcmp.eq.s32.totalorder %v8013_v3, 0  ;;  %v552_v9 = vxor.u32 2147483648, %v8014_v30  ;;  %p4264_p4 = pnand %p4263_p3, %p4257_p0 }
 0x3e4   :  { %v345_v36 = vsel %vm343_vm2, %v344_v37, %v8009_v34  ;;  %v451_v27 = vsel %vm440_vm10, nan, %v450_v14  ;;  %v550_v11 = vsel %vm548_vm12, %v8014_v30, %v549_v7  ;;  %vm551_vm9 = vcmp.eq.s32.totalorder %v8013_v3, 2 }
 0x3e5   :  { %v346_v2 = vsel %vm339_vm15, %v342_v57, %v345_v36  ;;  %v4285_v22 = vmov 0   ;;  %v3589_v18 = vpack.c.bf16 %v659_v24, %v451_v27  ;;  %vm547_vm14 = vcmp.lt.s32.totalorder %v8013_v3, 2 }
 0x3e6   :  { %3694 = vmatprep.mubr.bf16.mxu1 %v4285_v22  ;;  %3684 = vmatprep.mubr.bf16.mxu0 %v4285_v22  ;;  %v553_v54 = vsel %vm551_vm9, %v552_v9, %v8012_v29  ;;  %vm336_vm5 = vweird.f32 %v8015_v31  ;;  %vm544_vm4 = vweird.f32 %v8016_v25 }
 0x3e7   :  { %3665 = vmatpush1.bf16.msra.mxu0 %v3590_v28  ;;  %3979 = vmatpush1.bf16.msra.mxu1 %v3590_v28  ;;  %v554_v20 = vsel %vm547_vm14, %v550_v11, %v553_v54  ;;  %v347_v12 = vsel %vm336_vm5, nan, %v346_v2 }
 0x3e8   :  { %3666 = vmatprep.subr.bf16.mxu0 %v3589_v18  ;;  %3972 = vmatprep.subr.bf16.mxu1 %v3589_v18  ;;  %v555_v58 = vsel %vm544_vm4, nan, %v554_v20 }
 0x3e9   :  { %v3588_v50 = vpack.c.bf16 %v555_v58, %v347_v12 }
 0x3eb   :  { %3667 = vmatpush1.bf16.msra.mxu0 %v3588_v50  ;;  %3980 = vmatpush1.bf16.msra.mxu1 %v3588_v50 }
 0x3ee   :  { %3695 = vmatmul.mubr.bf16.vlgmr.msra.gmra.mxu1 %v4120_v26  ;;  %3685 = vmatmul.mubr.bf16.vlgmr.msra.gmra.mxu0 %v4126_v45 }
 0x3ef   :  { %3704 = vmatprep.mubr.bf16.mxu1 %v4285_v22 }
 0x3f6   :  { %3705 = vmatmul.mubr.bf16.gmra.mxu1 %v4121_v5 }
 0x3f7   :  { %3714 = vmatprep.mubr.bf16.mxu1 %v4285_v22 }
 0x3fe   :  { %3715 = vmatmul.mubr.bf16.gmra.mxu1 %v4122_v38 }
 0x3ff   :  { %3724 = vmatprep.mubr.bf16.mxu1 %v4285_v22 }
 0x406   :  { %3725 = vmatmul.mubr.bf16.gmra.mxu1 %v4123_v17 }
 0x407   :  { %3734 = vmatprep.mubr.bf16.mxu1 %v4285_v22 }
 0x40e   :  { %3735 = vmatmul.mubr.bf16.gmra.mxu1 %v4124_v60 }
 0x40f   :  { %3744 = vmatprep.mubr.bf16.mxu1 %v4285_v22 }
 0x416   :  { %3745 = vmatmul.mubr.bf16.gmra.mxu1 %v4125_v16 }
 0x417   :  { %3754 = vmatprep.mubr.bf16.mxu1 %v4285_v22 }
 0x41e   :  { %3755 = vmatmul.mubr.bf16.gmra.mxu1 %v4127_v6 }
 0x4ae   :  { %v3696_v1 = vpop.f32.mrf.mxu1  ;;  %v3686_v15 = vpop.f32.mrf.mxu0 }
 0x4af   :  { %3769 = vst [vmem:[#allocation2 + $0x20] sm:$0xff] %v3696_v1  ;;  %3765 = vst [vmem:[#allocation2] sm:$0xff] %v3686_v15 }
 0x4b0   :  { %v3698_v48 = vpop.f32.mrf.mxu1  ;;  %v3688_v0 = vpop.f32.mrf.mxu0 }
 0x4b1   :  { %3770 = vst [vmem:[#allocation2 + $0x28] sm:$0xff] %v3698_v48  ;;  %3766 = vst [vmem:[#allocation2 + $0x8] sm:$0xff] %v3688_v0 }
 0x4b2   :  { %v3700_v55 = vpop.f32.mrf.mxu1  ;;  %v3690_v53 = vpop.f32.mrf.mxu0 }
 0x4b3   :  { %3771 = vst [vmem:[#allocation2 + $0x30] sm:$0xff] %v3700_v55  ;;  %3767 = vst [vmem:[#allocation2 + $0x10] sm:$0xff] %v3690_v53 }
 0x4b4   :  { %v3702_v21 = vpop.f32.mrf.mxu1  ;;  %v3692_v33 = vpop.f32.mrf.mxu0 }
 0x4b5   :  { %3772 = vst [vmem:[#allocation2 + $0x38] sm:$0xff] %v3702_v21  ;;  %3768 = vst [vmem:[#allocation2 + $0x18] sm:$0xff] %v3692_v33 }
 0x4b6   :  { %v3706_v19 = vpop.f32.mrf.mxu1 }
 0x4b7   :  { %3773 = vst [vmem:[#allocation2 + $0x40] sm:$0xff] %v3706_v19 }
 0x4b8   :  { %v3708_v35 = vpop.f32.mrf.mxu1 }
 0x4b9   :  { %3774 = vst [vmem:[#allocation2 + $0x48] sm:$0xff] %v3708_v35 }
 0x4ba   :  { %v3710_v51 = vpop.f32.mrf.mxu1 }
 0x4bb   :  { %3775 = vst [vmem:[#allocation2 + $0x50] sm:$0xff] %v3710_v51 }
 0x4bc   :  { %v3712_v52 = vpop.f32.mrf.mxu1 }
 0x4bd   :  { %3776 = vst [vmem:[#allocation2 + $0x58] sm:$0xff] %v3712_v52 }
 0x4be   :  { %v3716_v13 = vpop.f32.mrf.mxu1 }
 0x4bf   :  { %3777 = vst [vmem:[#allocation2 + $0x60] sm:$0xff] %v3716_v13 }
 0x4c0   :  { %v3718_v59 = vpop.f32.mrf.mxu1 }
 0x4c1   :  { %3778 = vst [vmem:[#allocation2 + $0x68] sm:$0xff] %v3718_v59 }
 0x4c2   :  { %v3720_v41 = vpop.f32.mrf.mxu1 }
 0x4c3   :  { %3779 = vst [vmem:[#allocation2 + $0x70] sm:$0xff] %v3720_v41 }
 0x4c4   :  { %v3722_v61 = vpop.f32.mrf.mxu1 }
 0x4c5   :  { %3780 = vst [vmem:[#allocation2 + $0x78] sm:$0xff] %v3722_v61 }
 0x4c6   :  { %v3726_v63 = vpop.f32.mrf.mxu1 }
 0x4c7   :  { %3781 = vst [vmem:[#allocation2 + $0x80] sm:$0xff] %v3726_v63 }
 0x4c8   :  { %v3728_v40 = vpop.f32.mrf.mxu1 }
 0x4c9   :  { %3782 = vst [vmem:[#allocation2 + $0x88] sm:$0xff] %v3728_v40 }
 0x4ca   :  { %v3730_v56 = vpop.f32.mrf.mxu1 }
 0x4cb   :  { %3783 = vst [vmem:[#allocation2 + $0x90] sm:$0xff] %v3730_v56 }
 0x4cc   :  { %v3732_v23 = vpop.f32.mrf.mxu1 }
 0x4cd   :  { %3784 = vst [vmem:[#allocation2 + $0x98] sm:$0xff] %v3732_v23 }
 0x4ce   :  { %v3736_v4 = vpop.f32.mrf.mxu1 }
 0x4cf   :  { %3785 = vst [vmem:[#allocation2 + $0xa0] sm:$0xff] %v3736_v4 }
 0x4d0   :  { %v3738_v42 = vpop.f32.mrf.mxu1 }
 0x4d1   :  { %3786 = vst [vmem:[#allocation2 + $0xa8] sm:$0xff] %v3738_v42 }
 0x4d2   :  { %v3740_v46 = vpop.f32.mrf.mxu1 }
 0x4d3   :  { %3787 = vst [vmem:[#allocation2 + $0xb0] sm:$0xff] %v3740_v46 }
 0x4d4   :  { %v3742_v47 = vpop.f32.mrf.mxu1 }
 0x4d5   :  { %3788 = vst [vmem:[#allocation2 + $0xb8] sm:$0xff] %v3742_v47 }
 0x4d6   :  { %v3746_v39 = vpop.f32.mrf.mxu1 }
 0x4d7   :  { %3789 = vst [vmem:[#allocation2 + $0xc0] sm:$0xff] %v3746_v39 }
 0x4d8   :  { %v3748_v10 = vpop.f32.mrf.mxu1 }
 0x4d9   :  { %3790 = vst [vmem:[#allocation2 + $0xc8] sm:$0xff] %v3748_v10 }
 0x4da   :  { %v3750_v43 = vpop.f32.mrf.mxu1 }
 0x4db   :  { %3791 = vst [vmem:[#allocation2 + $0xd0] sm:$0xff] %v3750_v43 }
 0x4dc   :  { %v3752_v28 = vpop.f32.mrf.mxu1 }
 0x4dd   :  { %3792 = vst [vmem:[#allocation2 + $0xd8] sm:$0xff] %v3752_v28 }
 0x4de   :  { %v3756_v14 = vpop.f32.mrf.mxu1 }
 0x4df   :  { %3793 = vst [vmem:[#allocation2 + $0xe0] sm:$0xff] %v3756_v14 }
 0x4e0   :  { %v3758_v62 = vpop.f32.mrf.mxu1 }
 0x4e1   :  { %3794 = vst [vmem:[#allocation2 + $0xe8] sm:$0xff] %v3758_v62 }
 0x4e2   :  { %v3760_v34 = vpop.f32.mrf.mxu1 }
 0x4e3   :  { %3795 = vst [vmem:[#allocation2 + $0xf0] sm:$0xff] %v3760_v34 }
 0x4e4   :  { %v3762_v44 = vpop.f32.mrf.mxu1 }
 0x4e5   :  { %3796 = vst [vmem:[#allocation2 + $0xf8] sm:$0xff] %v3762_v44 }
 0x4e6   :  { %4267 = shalt.err (!%p4264_p4)
}
 0x4e7   :  { %s4287_s9 = smov 256   ;;  %s4288_s10 = smov 16  }
 0x4e8   :  { %3808 = dma.vmem_to_hbm [thread:$0]  %s3803_s7, 4096, %s7562_s3, [#allocation3], %s4287_s9, %s4287_s9, %s4288_s10  }
 0x4e9   :  { %4276 = dma.done.wait [#allocation3], 4096  }
 0x4ea   :  { %4277 = vsyncadd [#allocation3], 4294963200 }
 0x4eb   :  { %3812 = vsyncpa [#allocation3], 1 }

</bundles_post_ra>
